<compile_context>
chip_gen: v7x
topology: tpu7x:2x2x1
jax: 0.10.0
libtpu: 0.0.40
codegen_flags: <defaults>
</compile_context>

<pallas_src>
import functools

import jax
import jax.numpy as jnp
from jax.experimental import pallas as pl
from jax.experimental.pallas import tpu as pltpu


# ----------------------------- Pallas kernel ----------------------------------

def _conv3x3_bn_kernel(*refs, stride, n, rr, wo, relu, shortcut, sc_r0, sc_c0, out_halo):
    """One block of `rr` output rows (all batches) x one Cout tile.

    refs = phase refs (stride*stride, each (n, bh, Wc_p, Cin)) [, shortcut refs],
           w_ref (9, K, tn), b_ref (1, tn), o_ref.
    """
    nph = stride * stride
    x_refs = refs[:nph]
    pos = nph
    sc_ref = w_sc_ref = b_sc_ref = None
    if shortcut == "identity":
        sc_ref = refs[pos]
        pos += 1
    elif shortcut == "proj":
        sc_ref, w_sc_ref, b_sc_ref = refs[pos:pos + 3]
        pos += 3
    w_ref, b_ref, o_ref = refs[pos:pos + 3]

    m = n * rr * wo
    acc = None
    for kh in range(3):
        q, dh = kh % stride, kh // stride
        for kw in range(3):
            p, dw = kw % stride, kw // stride
            xr = x_refs[q * stride + p]
            # slice directly on the ref (no load-then-slice relayout)
            xs = xr[:, dh:dh + rr, dw:dw + wo, :].reshape(m, xr.shape[-1])
            d = jnp.dot(xs, w_ref[kh * 3 + kw],          # bf16 x bf16 -> f32 on the MXU
                        preferred_element_type=jnp.float32)
            acc = d if acc is None else acc + d

    out = acc + b_ref[...]                               # (m, tn) + (1, tn), f32

    if shortcut is not None:                             # fused residual branch
        sv = sc_ref[:, sc_r0:sc_r0 + rr, sc_c0:sc_c0 + wo, :].reshape(m, sc_ref.shape[-1])
        if shortcut == "proj":                           # fused 1x1 conv + BN shortcut
            out = out + jnp.dot(sv, w_sc_ref[...], preferred_element_type=jnp.float32)
            out = out + b_sc_ref[...]
        else:                                            # identity shortcut
            out = out + sv.astype(jnp.float32)

    if relu:
        out = jnp.maximum(out, 0.0)

    res = out.reshape(n, rr, wo, o_ref.shape[-1]).astype(o_ref.dtype)
    if out_halo:
        # emit a 1-px zero halo so the next conv needs no glue-side jnp.pad
        o_ref[...] = jnp.zeros(o_ref.shape, o_ref.dtype)
        o_ref[:, 1:1 + rr, 1:1 + wo, :] = res
    else:
        o_ref[...] = res


# ------------------------------ wrapper ----------------------------------------

def _round_up(v, m):
    return (v + m - 1) // m * m


def _vmem_budget():
    """Generation-aware usable VMEM budget (bytes): ~3/4 of capacity, capped at 96 MiB."""
    try:
        cap = pltpu.get_tpu_info().vmem_capacity_bytes
        if isinstance(cap, int) and cap > 0:
            return int(min(cap * 3 // 4, 96 * 1024 * 1024))
    except Exception:
        pass
    return 32 * 1024 * 1024


def _compiler_params():
    # rows axis leads and both axes are parallel -> v7x shards rows across its 2 TCs
    return pltpu.CompilerParams(dimension_semantics=("parallel", "parallel"),
                                vmem_limit_bytes=_vmem_budget())


def _choose_tiles(n, ho, wo, cin, cp_out, stride, budget):
    """Pick (rows-per-step rr, Cout tile tn): prefer full-Cout residency and rr == ho."""
    def lane(c):
        return _round_up(max(c, 1), 128)

    def sub(w):
        return _round_up(max(w, 1), 8)

    def step_bytes(rr, tn):
        # conv2 (the heavier call): h window + x shortcut window + weights + output,
        # double-buffered, with VMEM lane/sublane padding accounted for.
        h_in = n * (rr + 2) * sub(wo + 2) * lane(cp_out) * 2
        sc_in = n * (rr + 2 // stride) * sub(wo + 2) * lane(cin) * 2
        wts = (9 * cp_out + cin) * tn * 2
        outb = n * rr * sub(wo) * tn * 4
        return 2 * (h_in + sc_in + wts + outb)

    tn_opts = [cp_out]
    if cp_out > 256 and cp_out % 256 == 0:
        tn_opts.append(256)
    if cp_out > 128:
        tn_opts.append(128)
    for tn in tn_opts:
        rr = ho
        while rr > 1 and step_bytes(rr, tn) > budget:
            rr = (rr + 1) // 2
        if step_bytes(rr, tn) <= budget:
            return rr, tn
    return 1, tn_opts[-1]


def fused_conv3x3_bn(phases, w_taps, bias, *, stride, ho, wo, relu, out_dtype,
                     rr, nb, tn, shortcut=None, emit_halo=False):
    """Patches-free fused 3x3 conv + BN (+fused shortcut) (+ReLU).

    phases:   dict {(row_phase, col_phase): (nb, N, bh, Wc_p, Cin)} bf16 row-blocked
              phase arrays of the spatially zero-padded input (no im2col blow-up).
    w_taps:   (9, K, cp_out) bf16, BN scale folded in.
    bias:     (1, cp_out) f32.
    shortcut: None | ("identity", x_phase (nb,N,bh,Wc,cp_out), r0, c0)
                   | ("proj", x_phase (nb,N,bh,Wc,Csc), w_sc (Csc,cp_out), b_sc (1,cp_out), r0, c0)
    emit_halo: output is (N, ho+2, wo+2, cp_out) with a zero 1-px halo (requires nb == 1).
    """
    assert stride in (1, 2) and len(phases) == stride * stride
    x00 = phases[(0, 0)]
    n, k_in = x00.shape[1], x00.shape[-1]
    assert w_taps.shape[0] == 9 and w_taps.shape[1] == k_in
    cp_out = w_taps.shape[2]
    assert cp_out % tn == 0
    n_ct = cp_out // tn
    grid = (nb, n_ct)                          # rows leading (preferred core sharding)

    in_specs, args = [], []
    for q in range(stride):
        for p in range(stride):
            xa = phases[(q, p)]
            in_specs.append(pl.BlockSpec((None,) + xa.shape[1:],
                                         lambda i, j: (i, 0, 0, 0, 0)))
            args.append(xa)

    sc_mode, sc_r0, sc_c0 = None, 0, 0
    if shortcut is not None:
        sc_mode = shortcut[0]
        if sc_mode == "identity":
            _, sc_arr, sc_r0, sc_c0 = shortcut
            assert sc_arr.shape[-1] == cp_out
            in_specs.append(pl.BlockSpec((None,) + sc_arr.shape[1:-1] + (tn,),
                                         lambda i, j: (i, 0, 0, 0, j)))
            args.append(sc_arr)
        else:  # "proj": fused 1x1 conv + BN on the original input
            _, sc_arr, w_sc, b_sc, sc_r0, sc_c0 = shortcut
            assert w_sc.shape == (sc_arr.shape[-1], cp_out)
            in_specs.append(pl.BlockSpec((None,) + sc_arr.shape[1:],
                                         lambda i, j: (i, 0, 0, 0, 0)))
            args.append(sc_arr)
            in_specs.append(pl.BlockSpec((w_sc.shape[0], tn), lambda i, j: (0, j)))
            args.append(w_sc)
            in_specs.append(pl.BlockSpec((1, tn), lambda i, j: (0, j)))
            args.append(b_sc)

    in_specs.append(pl.BlockSpec((9, k_in, tn), lambda i, j: (0, 0, j)))   # weights
    args.append(w_taps)
    in_specs.append(pl.BlockSpec((1, tn), lambda i, j: (0, j)))            # bias
    args.append(bias)

    if emit_halo:
        assert nb == 1
        out_shape = jax.ShapeDtypeStruct((n, ho + 2, wo + 2, cp_out), out_dtype)
        out_spec = pl.BlockSpec((n, ho + 2, wo + 2, tn), lambda i, j: (0, 0, 0, j))
    else:
        out_shape = jax.ShapeDtypeStruct((n, ho, wo, cp_out), out_dtype)
        out_spec = pl.BlockSpec((n, rr, wo, tn), lambda i, j: (0, i, 0, j))

    kernel = functools.partial(_conv3x3_bn_kernel, stride=stride, n=n, rr=rr, wo=wo,
                               relu=relu, shortcut=sc_mode, sc_r0=sc_r0, sc_c0=sc_c0,
                               out_halo=emit_halo)
    return pl.pallas_call(
        kernel,
        out_shape=out_shape,
        grid=grid,
        in_specs=in_specs,
        out_specs=out_spec,
        compiler_params=_compiler_params(),
    )(*args)


# ------------------------------- JAX glue --------------------------------------

def _pad_channels(x, cp):
    c = x.shape[-1]
    if c == cp:
        return x
    return jnp.pad(x, [(0, 0)] * (x.ndim - 1) + [(0, cp - c)])


def _phase_blocks(x, stride, pad, rr, nb, bh):
    """Zero-pad spatially (if pad>0) and split into stride x stride row/col phase arrays,
    pre-blocked into `nb` row windows of `bh` phase-rows each (windows start at multiples
    of `rr` phase-rows; halo rows are duplicated only when nb > 1).  No im2col blow-up."""
    if pad:
        x = jnp.pad(x, ((0, 0), (pad, pad), (pad, pad), (0, 0)))
    phases = {}
    for q in range(stride):
        xq = x if stride == 1 else x[:, q::stride]
        hq = xq.shape[1]
        if nb == 1:
            if hq < bh:
                xq = jnp.pad(xq, ((0, 0), (0, bh - hq), (0, 0), (0, 0)))
            blk = xq[:, :bh][None]                                    # (1, N, bh, Wp, C)
        else:
            idx = jnp.minimum(jnp.arange(nb)[:, None] * rr + jnp.arange(bh)[None, :],
                              hq - 1)
            blk = jnp.moveaxis(xq[:, idx], 1, 0)                      # (nb, N, bh, Wp, C)
        for p in range(stride):
            phases[(q, p)] = blk if stride == 1 else blk[:, :, :, p::stride, :]
    return phases


def _fold_bn(w_oihw, gamma, beta, mean, var, cp_in, cp_out, eps=1e-5):
    """torch (Cout,Cin,kh,kw) conv weight + BN stats -> bf16 (kh*kw, cp_in, cp_out) taps
    with the BN scale folded in, and an f32 (1, cp_out) bias."""
    cout, cin, kh, kw = w_oihw.shape
    scale = gamma * jax.lax.rsqrt(var + eps)
    bias = beta - mean * scale
    w = jnp.transpose(w_oihw, (2, 3, 1, 0)).reshape(kh * kw, cin, cout) * scale
    w = jnp.pad(w, ((0, 0), (0, cp_in - cin), (0, cp_out - cout)))
    b = jnp.pad(bias, (0, cp_out - cout)).reshape(1, cp_out)
    return w.astype(jnp.bfloat16), b.astype(jnp.float32)


def res_block_forward(x_nhwc, params, stride):
    """ResBlock forward (activation='relu', batch_norm=True, eval-mode BN)."""
    N, H, W, Cin = x_nhwc.shape
    Cout = params["w1"].shape[0]
    cp_out = _round_up(Cout, 128)         # lane-dense output channels
    Ho = (H - 1) // stride + 1
    Wo = (W - 1) // stride + 1
    use_proj = (stride != 1 or Cin != Cout)

    # conv1 / proj input keeps its natural (small) channel count — no 32x HBM inflation;
    # only the identity-shortcut case pads x (its raw lanes are added to the accumulator).
    cin_eff = Cin if use_proj else cp_out
    x_bf = _pad_channels(x_nhwc, cin_eff).astype(jnp.bfloat16)

    rr, tn = _choose_tiles(N, Ho, Wo, cin_eff, cp_out, stride, _vmem_budget())
    nb = pl.cdiv(Ho, rr)
    emit_halo = (nb == 1)                 # conv1 writes conv2's halo padding in-kernel

    x_phases = _phase_blocks(x_bf, stride, 1, rr, nb, rr + 2 // stride)

    # --- conv1 + bn1 + relu (3x3, stride, pad=1); bf16 intermediate ---
    w1, b1 = _fold_bn(params["w1"], params["g1"], params["b1"],
                      params["m1"], params["v1"], cin_eff, cp_out)
    h = fused_conv3x3_bn(x_phases, w1, b1, stride=stride, ho=Ho, wo=Wo, relu=True,
                         out_dtype=jnp.bfloat16, rr=rr, nb=nb, tn=tn,
                         emit_halo=emit_halo)

    # --- conv2 + bn2 + fused shortcut + relu (3x3, stride=1, pad=1) ---
    h_phases = _phase_blocks(h, 1, 0 if emit_halo else 1, rr, nb, rr + 2)
    w2, b2 = _fold_bn(params["w2"], params["g2"], params["b2"],
                      params["m2"], params["v2"], cp_out, cp_out)

    # shortcut stream reuses the already-built x phase array (no strided-slice copy)
    q_sc = 1 % stride
    sc_arr = x_phases[(q_sc, q_sc)]
    sc_off = (1 - q_sc) // stride         # 1 for stride=1, 0 for stride=2
    if use_proj:
        w_sc, b_sc = _fold_bn(params["w_sc"], params["g_sc"], params["b_sc"],
                              params["m_sc"], params["v_sc"], cin_eff, cp_out)
        shortcut = ("proj", sc_arr, w_sc.reshape(cin_eff, cp_out), b_sc, sc_off, sc_off)
    else:
        shortcut = ("identity", sc_arr, sc_off, sc_off)

    out = fused_conv3x3_bn(h_phases, w2, b2, stride=1, ho=Ho, wo=Wo, relu=True,
                           out_dtype=jnp.float32, rr=rr, nb=nb, tn=tn,
                           shortcut=shortcut, emit_halo=False)
    # When chaining bf16 ResBlocks, keep the padded channels / bf16 output instead.
    return out if cp_out == Cout else out[..., :Cout]


# ---------------------------- pure-JAX reference -------------------------------

def _ref_conv(x_nhwc, w_oihw, stride, padding):
    return jax.lax.conv_general_dilated(
        x_nhwc, w_oihw, (stride, stride), [(padding, padding)] * 2,
        dimension_numbers=("NHWC", "OIHW", "NHWC"))


def _ref_bn(x, gamma, beta, mean, var, eps=1e-5):
    return (x - mean) / jnp.sqrt(var + eps) * gamma + beta


def res_block_reference(x_nhwc, params, stride):
    Cin = x_nhwc.shape[-1]
    Cout = params["w1"].shape[0]
    if stride != 1 or Cin != Cout:
        identity = _ref_conv(x_nhwc, params["w_sc"], stride, 0)
        identity = _ref_bn(identity, params["g_sc"], params["b_sc"],
                           params["m_sc"], params["v_sc"])
    else:
        identity = x_nhwc
    out = _ref_conv(x_nhwc, params["w1"], stride, 1)
    out = jnp.maximum(_ref_bn(out, params["g1"], params["b1"],
                              params["m1"], params["v1"]), 0.0)
    out = _ref_conv(out, params["w2"], 1, 1)
    out = _ref_bn(out, params["g2"], params["b2"], params["m2"], params["v2"])
    return jnp.maximum(out + identity, 0.0)


# --------------------------------- main ----------------------------------------

def make_params(key, in_channel, out_channel, stride):
    ks = jax.random.split(key, 12)
    p = {
        "w1": jax.random.normal(ks[0], (out_channel, in_channel, 3, 3), jnp.float32) * 0.1,
        "g1": jax.random.uniform(ks[1], (out_channel,), jnp.float32, 0.5, 1.5),
        "b1": jax.random.normal(ks[2], (out_channel,), jnp.float32) * 0.1,
        "m1": jax.random.normal(ks[3], (out_channel,), jnp.float32) * 0.1,
        "v1": jax.random.uniform(ks[4], (out_channel,), jnp.float32, 0.5, 1.5),
        "w2": jax.random.normal(ks[5], (out_channel, out_channel, 3, 3), jnp.float32) * 0.1,
        "g2": jax.random.uniform(ks[6], (out_channel,), jnp.float32, 0.5, 1.5),
        "b2": jax.random.normal(ks[7], (out_channel,), jnp.float32) * 0.1,
        "m2": jax.random.normal(ks[8], (out_channel,), jnp.float32) * 0.1,
        "v2": jax.random.uniform(ks[9], (out_channel,), jnp.float32, 0.5, 1.5),
    }
    if stride != 1 or in_channel != out_channel:
        ks2 = jax.random.split(ks[10], 5)
        p.update({
            "w_sc": jax.random.normal(ks2[0], (out_channel, in_channel, 1, 1), jnp.float32) * 0.1,
            "g_sc": jax.random.uniform(ks2[1], (out_channel,), jnp.float32, 0.5, 1.5),
            "b_sc": jax.random.normal(ks2[2], (out_channel,), jnp.float32) * 0.1,
            "m_sc": jax.random.normal(ks2[3], (out_channel,), jnp.float32) * 0.1,
            "v_sc": jax.random.uniform(ks2[4], (out_channel,), jnp.float32, 0.5, 1.5),
        })
    return p


if __name__ == "__main__":
    key = jax.random.PRNGKey(0)
    k_x1, k_p1, k_x2, k_p2 = jax.random.split(key, 4)
    fwd = jax.jit(res_block_forward, static_argnames=("stride",))

    # case 1: stride-2 downsample block -> fused 1x1-conv+BN projection shortcut
    N, C_in, H, W, C_out, stride = 2, 4, 16, 16, 8, 2
    x1 = jnp.transpose(jax.random.normal(k_x1, (N, C_in, H, W), jnp.float32), (0, 2, 3, 1))
    p1 = make_params(k_p1, C_in, C_out, stride)
    out1 = jax.block_until_ready(fwd(x1, p1, stride=stride))
    ref1 = jax.block_until_ready(res_block_reference(x1, p1, stride))
    assert out1.shape == ref1.shape, (out1.shape, ref1.shape)
    err1 = float(jnp.max(jnp.abs(out1 - ref1)))
    # bf16 MXU inputs + bf16 intermediate vs. a pure-f32 reference -> loose tolerance.
    assert err1 < 5e-2, err1

    # case 2: stride-1 block -> fused identity shortcut
    N2, C2, H2, W2 = 2, 8, 16, 16
    x2 = jnp.transpose(jax.random.normal(k_x2, (N2, C2, H2, W2), jnp.float32), (0, 2, 3, 1))
    p2 = make_params(k_p2, C2, C2, 1)
    out2 = jax.block_until_ready(fwd(x2, p2, stride=1))
    ref2 = jax.block_until_ready(res_block_reference(x2, p2, 1))
    assert out2.shape == ref2.shape, (out2.shape, ref2.shape)
    err2 = float(jnp.max(jnp.abs(out2 - ref2)))
    assert err2 < 5e-2, err2

    print("KERNEL_OK")
</pallas_src>

<mosaic_0001>
module attributes {stable_mosaic.version = 11 : i64} {
  func.func @_conv3x3_bn_kernel(%arg0: i32, %arg1: i32, %arg2: memref<1x2x9x9x4xbf16, #tpu.memory_space<vmem>>, %arg3: memref<1x2x9x9x4xbf16, #tpu.memory_space<vmem>>, %arg4: memref<1x2x9x9x4xbf16, #tpu.memory_space<vmem>>, %arg5: memref<1x2x9x9x4xbf16, #tpu.memory_space<vmem>>, %arg6: memref<9x4x128xbf16, #tpu.memory_space<vmem>>, %arg7: memref<1x128xf32, #tpu.memory_space<vmem>>, %arg8: memref<2x10x10x128xbf16, #tpu.memory_space<vmem>>) attributes {dimension_semantics = [#tpu.dimension_semantics<parallel>, #tpu.dimension_semantics<parallel>], iteration_bounds = array<i64: 1, 1>, scalar_prefetch = 0 : i64, scratch_operands = 0 : i64, tpu.core_type = #tpu.core_type<tc>, window_params = [{transform_indices = @transform_0, window_bounds = array<i64: 1, 2, 9, 9, 4>}, {transform_indices = @transform_1, window_bounds = array<i64: 1, 2, 9, 9, 4>}, {transform_indices = @transform_2, window_bounds = array<i64: 1, 2, 9, 9, 4>}, {transform_indices = @transform_3, window_bounds = array<i64: 1, 2, 9, 9, 4>}, {transform_indices = @transform_4, window_bounds = array<i64: 9, 4, 128>}, {transform_indices = @transform_5, window_bounds = array<i64: 1, 128>}, {transform_indices = @transform_6, window_bounds = array<i64: 2, 10, 10, 128>}]} {
    %c0 = arith.constant 0 : index
    %c0_0 = arith.constant 0 : index
    %c0_1 = arith.constant 0 : index
    %c0_2 = arith.constant 0 : index
    %c0_3 = arith.constant 0 : index
    %0 = vector.load %arg2[%c0, %c0_0, %c0_1, %c0_2, %c0_3] : memref<1x2x9x9x4xbf16, #tpu.memory_space<vmem>>, vector<1x2x8x8x4xbf16>
    %1 = vector.shape_cast %0 : vector<1x2x8x8x4xbf16> to vector<2x8x8x4xbf16>
    %2 = vector.shape_cast %1 : vector<2x8x8x4xbf16> to vector<128x4xbf16>
    %c0_4 = arith.constant 0 : index
    %c0_5 = arith.constant 0 : index
    %c0_6 = arith.constant 0 : index
    %3 = vector.load %arg6[%c0_4, %c0_5, %c0_6] : memref<9x4x128xbf16, #tpu.memory_space<vmem>>, vector<1x4x128xbf16>
    %4 = vector.shape_cast %3 : vector<1x4x128xbf16> to vector<4x128xbf16>
    %cst = arith.constant dense<0.000000e+00> : vector<128x128xf32>
    %5 = tpu.matmul %2, %4, %cst {dimension_numbers = #tpu.dot_dimension_numbers<[1], [0], [0], [1], [0, 0, 1, 1], [], []>} : vector<128x4xbf16>, vector<4x128xbf16>, vector<128x128xf32> -> vector<128x128xf32>
    %c0_7 = arith.constant 0 : index
    %c0_8 = arith.constant 0 : index
    %c0_9 = arith.constant 0 : index
    %c0_10 = arith.constant 0 : index
    %c0_11 = arith.constant 0 : index
    %6 = vector.load %arg3[%c0_7, %c0_8, %c0_9, %c0_10, %c0_11] : memref<1x2x9x9x4xbf16, #tpu.memory_space<vmem>>, vector<1x2x8x8x4xbf16>
    %7 = vector.shape_cast %6 : vector<1x2x8x8x4xbf16> to vector<2x8x8x4xbf16>
    %8 = vector.shape_cast %7 : vector<2x8x8x4xbf16> to vector<128x4xbf16>
    %c1 = arith.constant 1 : index
    %c0_12 = arith.constant 0 : index
    %c0_13 = arith.constant 0 : index
    %9 = vector.load %arg6[%c1, %c0_12, %c0_13] : memref<9x4x128xbf16, #tpu.memory_space<vmem>>, vector<1x4x128xbf16>
    %10 = vector.shape_cast %9 : vector<1x4x128xbf16> to vector<4x128xbf16>
    %cst_14 = arith.constant dense<0.000000e+00> : vector<128x128xf32>
    %11 = tpu.matmul %8, %10, %cst_14 {dimension_numbers = #tpu.dot_dimension_numbers<[1], [0], [0], [1], [0, 0, 1, 1], [], []>} : vector<128x4xbf16>, vector<4x128xbf16>, vector<128x128xf32> -> vector<128x128xf32>
    %12 = arith.addf %5, %11 : vector<128x128xf32>
    %c0_15 = arith.constant 0 : index
    %c0_16 = arith.constant 0 : index
    %c0_17 = arith.constant 0 : index
    %c1_18 = arith.constant 1 : index
    %c0_19 = arith.constant 0 : index
    %13 = vector.load %arg2[%c0_15, %c0_16, %c0_17, %c1_18, %c0_19] : memref<1x2x9x9x4xbf16, #tpu.memory_space<vmem>>, vector<1x2x8x8x4xbf16>
    %14 = vector.shape_cast %13 : vector<1x2x8x8x4xbf16> to vector<2x8x8x4xbf16>
    %15 = vector.shape_cast %14 : vector<2x8x8x4xbf16> to vector<128x4xbf16>
    %c2 = arith.constant 2 : index
    %c0_20 = arith.constant 0 : index
    %c0_21 = arith.constant 0 : index
    %16 = vector.load %arg6[%c2, %c0_20, %c0_21] : memref<9x4x128xbf16, #tpu.memory_space<vmem>>, vector<1x4x128xbf16>
    %17 = vector.shape_cast %16 : vector<1x4x128xbf16> to vector<4x128xbf16>
    %cst_22 = arith.constant dense<0.000000e+00> : vector<128x128xf32>
    %18 = tpu.matmul %15, %17, %cst_22 {dimension_numbers = #tpu.dot_dimension_numbers<[1], [0], [0], [1], [0, 0, 1, 1], [], []>} : vector<128x4xbf16>, vector<4x128xbf16>, vector<128x128xf32> -> vector<128x128xf32>
    %19 = arith.addf %12, %18 : vector<128x128xf32>
    %c0_23 = arith.constant 0 : index
    %c0_24 = arith.constant 0 : index
    %c0_25 = arith.constant 0 : index
    %c0_26 = arith.constant 0 : index
    %c0_27 = arith.constant 0 : index
    %20 = vector.load %arg4[%c0_23, %c0_24, %c0_25, %c0_26, %c0_27] : memref<1x2x9x9x4xbf16, #tpu.memory_space<vmem>>, vector<1x2x8x8x4xbf16>
    %21 = vector.shape_cast %20 : vector<1x2x8x8x4xbf16> to vector<2x8x8x4xbf16>
    %22 = vector.shape_cast %21 : vector<2x8x8x4xbf16> to vector<128x4xbf16>
    %c3 = arith.constant 3 : index
    %c0_28 = arith.constant 0 : index
    %c0_29 = arith.constant 0 : index
    %23 = vector.load %arg6[%c3, %c0_28, %c0_29] : memref<9x4x128xbf16, #tpu.memory_space<vmem>>, vector<1x4x128xbf16>
    %24 = vector.shape_cast %23 : vector<1x4x128xbf16> to vector<4x128xbf16>
    %cst_30 = arith.constant dense<0.000000e+00> : vector<128x128xf32>
    %25 = tpu.matmul %22, %24, %cst_30 {dimension_numbers = #tpu.dot_dimension_numbers<[1], [0], [0], [1], [0, 0, 1, 1], [], []>} : vector<128x4xbf16>, vector<4x128xbf16>, vector<128x128xf32> -> vector<128x128xf32>
    %26 = arith.addf %19, %25 : vector<128x128xf32>
    %c0_31 = arith.constant 0 : index
    %c0_32 = arith.constant 0 : index
    %c0_33 = arith.constant 0 : index
    %c0_34 = arith.constant 0 : index
    %c0_35 = arith.constant 0 : index
    %27 = vector.load %arg5[%c0_31, %c0_32, %c0_33, %c0_34, %c0_35] : memref<1x2x9x9x4xbf16, #tpu.memory_space<vmem>>, vector<1x2x8x8x4xbf16>
    %28 = vector.shape_cast %27 : vector<1x2x8x8x4xbf16> to vector<2x8x8x4xbf16>
    %29 = vector.shape_cast %28 : vector<2x8x8x4xbf16> to vector<128x4xbf16>
    %c4 = arith.constant 4 : index
    %c0_36 = arith.constant 0 : index
    %c0_37 = arith.constant 0 : index
    %30 = vector.load %arg6[%c4, %c0_36, %c0_37] : memref<9x4x128xbf16, #tpu.memory_space<vmem>>, vector<1x4x128xbf16>
    %31 = vector.shape_cast %30 : vector<1x4x128xbf16> to vector<4x128xbf16>
    %cst_38 = arith.constant dense<0.000000e+00> : vector<128x128xf32>
    %32 = tpu.matmul %29, %31, %cst_38 {dimension_numbers = #tpu.dot_dimension_numbers<[1], [0], [0], [1], [0, 0, 1, 1], [], []>} : vector<128x4xbf16>, vector<4x128xbf16>, vector<128x128xf32> -> vector<128x128xf32>
    %33 = arith.addf %26, %32 : vector<128x128xf32>
    %c0_39 = arith.constant 0 : index
    %c0_40 = arith.constant 0 : index
    %c0_41 = arith.constant 0 : index
    %c1_42 = arith.constant 1 : index
    %c0_43 = arith.constant 0 : index
    %34 = vector.load %arg4[%c0_39, %c0_40, %c0_41, %c1_42, %c0_43] : memref<1x2x9x9x4xbf16, #tpu.memory_space<vmem>>, vector<1x2x8x8x4xbf16>
    %35 = vector.shape_cast %34 : vector<1x2x8x8x4xbf16> to vector<2x8x8x4xbf16>
    %36 = vector.shape_cast %35 : vector<2x8x8x4xbf16> to vector<128x4xbf16>
    %c5 = arith.constant 5 : index
    %c0_44 = arith.constant 0 : index
    %c0_45 = arith.constant 0 : index
    %37 = vector.load %arg6[%c5, %c0_44, %c0_45] : memref<9x4x128xbf16, #tpu.memory_space<vmem>>, vector<1x4x128xbf16>
    %38 = vector.shape_cast %37 : vector<1x4x128xbf16> to vector<4x128xbf16>
    %cst_46 = arith.constant dense<0.000000e+00> : vector<128x128xf32>
    %39 = tpu.matmul %36, %38, %cst_46 {dimension_numbers = #tpu.dot_dimension_numbers<[1], [0], [0], [1], [0, 0, 1, 1], [], []>} : vector<128x4xbf16>, vector<4x128xbf16>, vector<128x128xf32> -> vector<128x128xf32>
    %40 = arith.addf %33, %39 : vector<128x128xf32>
    %c0_47 = arith.constant 0 : index
    %c0_48 = arith.constant 0 : index
    %c1_49 = arith.constant 1 : index
    %c0_50 = arith.constant 0 : index
    %c0_51 = arith.constant 0 : index
    %41 = vector.load %arg2[%c0_47, %c0_48, %c1_49, %c0_50, %c0_51] : memref<1x2x9x9x4xbf16, #tpu.memory_space<vmem>>, vector<1x2x8x8x4xbf16>
    %42 = vector.shape_cast %41 : vector<1x2x8x8x4xbf16> to vector<2x8x8x4xbf16>
    %43 = vector.shape_cast %42 : vector<2x8x8x4xbf16> to vector<128x4xbf16>
    %c6 = arith.constant 6 : index
    %c0_52 = arith.constant 0 : index
    %c0_53 = arith.constant 0 : index
    %44 = vector.load %arg6[%c6, %c0_52, %c0_53] : memref<9x4x128xbf16, #tpu.memory_space<vmem>>, vector<1x4x128xbf16>
    %45 = vector.shape_cast %44 : vector<1x4x128xbf16> to vector<4x128xbf16>
    %cst_54 = arith.constant dense<0.000000e+00> : vector<128x128xf32>
    %46 = tpu.matmul %43, %45, %cst_54 {dimension_numbers = #tpu.dot_dimension_numbers<[1], [0], [0], [1], [0, 0, 1, 1], [], []>} : vector<128x4xbf16>, vector<4x128xbf16>, vector<128x128xf32> -> vector<128x128xf32>
    %47 = arith.addf %40, %46 : vector<128x128xf32>
    %c0_55 = arith.constant 0 : index
    %c0_56 = arith.constant 0 : index
    %c1_57 = arith.constant 1 : index
    %c0_58 = arith.constant 0 : index
    %c0_59 = arith.constant 0 : index
    %48 = vector.load %arg3[%c0_55, %c0_56, %c1_57, %c0_58, %c0_59] : memref<1x2x9x9x4xbf16, #tpu.memory_space<vmem>>, vector<1x2x8x8x4xbf16>
    %49 = vector.shape_cast %48 : vector<1x2x8x8x4xbf16> to vector<2x8x8x4xbf16>
    %50 = vector.shape_cast %49 : vector<2x8x8x4xbf16> to vector<128x4xbf16>
    %c7 = arith.constant 7 : index
    %c0_60 = arith.constant 0 : index
    %c0_61 = arith.constant 0 : index
    %51 = vector.load %arg6[%c7, %c0_60, %c0_61] : memref<9x4x128xbf16, #tpu.memory_space<vmem>>, vector<1x4x128xbf16>
    %52 = vector.shape_cast %51 : vector<1x4x128xbf16> to vector<4x128xbf16>
    %cst_62 = arith.constant dense<0.000000e+00> : vector<128x128xf32>
    %53 = tpu.matmul %50, %52, %cst_62 {dimension_numbers = #tpu.dot_dimension_numbers<[1], [0], [0], [1], [0, 0, 1, 1], [], []>} : vector<128x4xbf16>, vector<4x128xbf16>, vector<128x128xf32> -> vector<128x128xf32>
    %54 = arith.addf %47, %53 : vector<128x128xf32>
    %c0_63 = arith.constant 0 : index
    %c0_64 = arith.constant 0 : index
    %c1_65 = arith.constant 1 : index
    %c1_66 = arith.constant 1 : index
    %c0_67 = arith.constant 0 : index
    %55 = vector.load %arg2[%c0_63, %c0_64, %c1_65, %c1_66, %c0_67] : memref<1x2x9x9x4xbf16, #tpu.memory_space<vmem>>, vector<1x2x8x8x4xbf16>
    %56 = vector.shape_cast %55 : vector<1x2x8x8x4xbf16> to vector<2x8x8x4xbf16>
    %57 = vector.shape_cast %56 : vector<2x8x8x4xbf16> to vector<128x4xbf16>
    %c8 = arith.constant 8 : index
    %c0_68 = arith.constant 0 : index
    %c0_69 = arith.constant 0 : index
    %58 = vector.load %arg6[%c8, %c0_68, %c0_69] : memref<9x4x128xbf16, #tpu.memory_space<vmem>>, vector<1x4x128xbf16>
    %59 = vector.shape_cast %58 : vector<1x4x128xbf16> to vector<4x128xbf16>
    %cst_70 = arith.constant dense<0.000000e+00> : vector<128x128xf32>
    %60 = tpu.matmul %57, %59, %cst_70 {dimension_numbers = #tpu.dot_dimension_numbers<[1], [0], [0], [1], [0, 0, 1, 1], [], []>} : vector<128x4xbf16>, vector<4x128xbf16>, vector<128x128xf32> -> vector<128x128xf32>
    %61 = arith.addf %54, %60 : vector<128x128xf32>
    %c0_71 = arith.constant 0 : index
    %c0_72 = arith.constant 0 : index
    %62 = vector.load %arg7[%c0_71, %c0_72] : memref<1x128xf32, #tpu.memory_space<vmem>>, vector<1x128xf32>
    %63 = vector.broadcast %62 : vector<1x128xf32> to vector<128x128xf32>
    %64 = arith.addf %61, %63 : vector<128x128xf32>
    %cst_73 = arith.constant 0.000000e+00 : f32
    %65 = vector.broadcast %cst_73 : f32 to vector<128x128xf32>
    %66 = arith.maximumf %64, %65 : vector<128x128xf32>
    %67 = vector.shape_cast %66 : vector<128x128xf32> to vector<2x8x8x128xf32>
    %68 = arith.truncf %67 : vector<2x8x8x128xf32> to vector<2x8x8x128xbf16>
    %cst_74 = arith.constant 0.000000e+00 : bf16
    %69 = vector.broadcast %cst_74 : bf16 to vector<2x10x10x128xbf16>
    %c0_75 = arith.constant 0 : index
    %c0_76 = arith.constant 0 : index
    %c0_77 = arith.constant 0 : index
    %c0_78 = arith.constant 0 : index
    %70 = vector.load %arg8[%c0_75, %c0_76, %c0_77, %c0_78] : memref<2x10x10x128xbf16, #tpu.memory_space<vmem>>, vector<2x10x10x128xbf16>
    tpu.vector_store %arg8[%c0_75, %c0_76, %c0_77, %c0_78], %69 {strides = array<i32>} : memref<2x10x10x128xbf16, #tpu.memory_space<vmem>>, vector<2x10x10x128xbf16>,
    %c0_79 = arith.constant 0 : index
    %c1_80 = arith.constant 1 : index
    %c1_81 = arith.constant 1 : index
    %c0_82 = arith.constant 0 : index
    %71 = vector.load %arg8[%c0_79, %c1_80, %c1_81, %c0_82] : memref<2x10x10x128xbf16, #tpu.memory_space<vmem>>, vector<2x8x8x128xbf16>
    tpu.vector_store %arg8[%c0_79, %c1_80, %c1_81, %c0_82], %68 {strides = array<i32>} : memref<2x10x10x128xbf16, #tpu.memory_space<vmem>>, vector<2x8x8x128xbf16>,
    return
  }
  func.func @transform_0(%arg0: i32, %arg1: i32) -> (i32, i32, i32, i32, i32) {
    %c0_i32 = arith.constant 0 : i32
    %c0_i32_0 = arith.constant 0 : i32
    %c0_i32_1 = arith.constant 0 : i32
    %c0_i32_2 = arith.constant 0 : i32
    %c0_i32_3 = arith.constant 0 : i32
    return %arg0, %c0_i32, %c0_i32_0, %c0_i32_1, %c0_i32_2 : i32, i32, i32, i32, i32
  }
  func.func @transform_1(%arg0: i32, %arg1: i32) -> (i32, i32, i32, i32, i32) {
    %c0_i32 = arith.constant 0 : i32
    %c0_i32_0 = arith.constant 0 : i32
    %c0_i32_1 = arith.constant 0 : i32
    %c0_i32_2 = arith.constant 0 : i32
    %c0_i32_3 = arith.constant 0 : i32
    return %arg0, %c0_i32, %c0_i32_0, %c0_i32_1, %c0_i32_2 : i32, i32, i32, i32, i32
  }
  func.func @transform_2(%arg0: i32, %arg1: i32) -> (i32, i32, i32, i32, i32) {
    %c0_i32 = arith.constant 0 : i32
    %c0_i32_0 = arith.constant 0 : i32
    %c0_i32_1 = arith.constant 0 : i32
    %c0_i32_2 = arith.constant 0 : i32
    %c0_i32_3 = arith.constant 0 : i32
    return %arg0, %c0_i32, %c0_i32_0, %c0_i32_1, %c0_i32_2 : i32, i32, i32, i32, i32
  }
  func.func @transform_3(%arg0: i32, %arg1: i32) -> (i32, i32, i32, i32, i32) {
    %c0_i32 = arith.constant 0 : i32
    %c0_i32_0 = arith.constant 0 : i32
    %c0_i32_1 = arith.constant 0 : i32
    %c0_i32_2 = arith.constant 0 : i32
    %c0_i32_3 = arith.constant 0 : i32
    return %arg0, %c0_i32, %c0_i32_0, %c0_i32_1, %c0_i32_2 : i32, i32, i32, i32, i32
  }
  func.func @transform_4(%arg0: i32, %arg1: i32) -> (i32, i32, i32) {
    %c0_i32 = arith.constant 0 : i32
    %c0_i32_0 = arith.constant 0 : i32
    %c0_i32_1 = arith.constant 0 : i32
    return %c0_i32, %c0_i32_0, %arg1 : i32, i32, i32
  }
  func.func @transform_5(%arg0: i32, %arg1: i32) -> (i32, i32) {
    %c0_i32 = arith.constant 0 : i32
    %c0_i32_0 = arith.constant 0 : i32
    return %c0_i32, %arg1 : i32, i32
  }
  func.func @transform_6(%arg0: i32, %arg1: i32) -> (i32, i32, i32, i32) {
    %c0_i32 = arith.constant 0 : i32
    %c0_i32_0 = arith.constant 0 : i32
    %c0_i32_1 = arith.constant 0 : i32
    %c0_i32_2 = arith.constant 0 : i32
    return %c0_i32, %c0_i32_0, %c0_i32_1, %arg1 : i32, i32, i32, i32
  }
}

module attributes {stable_mosaic.version = 11 : i64} {
  func.func @_conv3x3_bn_kernel(%arg0: i32, %arg1: i32, %arg2: memref<1x2x10x10x128xbf16, #tpu.memory_space<vmem>>, %arg3: memref<1x2x9x9x4xbf16, #tpu.memory_space<vmem>>, %arg4: memref<4x128xbf16, #tpu.memory_space<vmem>>, %arg5: memref<1x128xf32, #tpu.memory_space<vmem>>, %arg6: memref<9x128x128xbf16, #tpu.memory_space<vmem>>, %arg7: memref<1x128xf32, #tpu.memory_space<vmem>>, %arg8: memref<2x8x8x128xf32, #tpu.memory_space<vmem>>) attributes {dimension_semantics = [#tpu.dimension_semantics<parallel>, #tpu.dimension_semantics<parallel>], iteration_bounds = array<i64: 1, 1>, scalar_prefetch = 0 : i64, scratch_operands = 0 : i64, tpu.core_type = #tpu.core_type<tc>, window_params = [{transform_indices = @transform_0, window_bounds = array<i64: 1, 2, 10, 10, 128>}, {transform_indices = @transform_1, window_bounds = array<i64: 1, 2, 9, 9, 4>}, {transform_indices = @transform_2, window_bounds = array<i64: 4, 128>}, {transform_indices = @transform_3, window_bounds = array<i64: 1, 128>}, {transform_indices = @transform_4, window_bounds = array<i64: 9, 128, 128>}, {transform_indices = @transform_5, window_bounds = array<i64: 1, 128>}, {transform_indices = @transform_6, window_bounds = array<i64: 2, 8, 8, 128>}]} {
    %c0 = arith.constant 0 : index
    %c0_0 = arith.constant 0 : index
    %c0_1 = arith.constant 0 : index
    %c0_2 = arith.constant 0 : index
    %c0_3 = arith.constant 0 : index
    %0 = vector.load %arg2[%c0, %c0_0, %c0_1, %c0_2, %c0_3] : memref<1x2x10x10x128xbf16, #tpu.memory_space<vmem>>, vector<1x2x8x8x128xbf16>
    %1 = vector.shape_cast %0 : vector<1x2x8x8x128xbf16> to vector<2x8x8x128xbf16>
    %2 = vector.shape_cast %1 : vector<2x8x8x128xbf16> to vector<128x128xbf16>
    %c0_4 = arith.constant 0 : index
    %c0_5 = arith.constant 0 : index
    %c0_6 = arith.constant 0 : index
    %3 = vector.load %arg6[%c0_4, %c0_5, %c0_6] : memref<9x128x128xbf16, #tpu.memory_space<vmem>>, vector<1x128x128xbf16>
    %4 = vector.shape_cast %3 : vector<1x128x128xbf16> to vector<128x128xbf16>
    %cst = arith.constant dense<0.000000e+00> : vector<128x128xf32>
    %5 = tpu.matmul %2, %4, %cst {dimension_numbers = #tpu.dot_dimension_numbers<[1], [0], [0], [1], [0, 0, 1, 1], [], []>} : vector<128x128xbf16>, vector<128x128xbf16>, vector<128x128xf32> -> vector<128x128xf32>
    %c0_7 = arith.constant 0 : index
    %c0_8 = arith.constant 0 : index
    %c0_9 = arith.constant 0 : index
    %c1 = arith.constant 1 : index
    %c0_10 = arith.constant 0 : index
    %6 = vector.load %arg2[%c0_7, %c0_8, %c0_9, %c1, %c0_10] : memref<1x2x10x10x128xbf16, #tpu.memory_space<vmem>>, vector<1x2x8x8x128xbf16>
    %7 = vector.shape_cast %6 : vector<1x2x8x8x128xbf16> to vector<2x8x8x128xbf16>
    %8 = vector.shape_cast %7 : vector<2x8x8x128xbf16> to vector<128x128xbf16>
    %c1_11 = arith.constant 1 : index
    %c0_12 = arith.constant 0 : index
    %c0_13 = arith.constant 0 : index
    %9 = vector.load %arg6[%c1_11, %c0_12, %c0_13] : memref<9x128x128xbf16, #tpu.memory_space<vmem>>, vector<1x128x128xbf16>
    %10 = vector.shape_cast %9 : vector<1x128x128xbf16> to vector<128x128xbf16>
    %cst_14 = arith.constant dense<0.000000e+00> : vector<128x128xf32>
    %11 = tpu.matmul %8, %10, %cst_14 {dimension_numbers = #tpu.dot_dimension_numbers<[1], [0], [0], [1], [0, 0, 1, 1], [], []>} : vector<128x128xbf16>, vector<128x128xbf16>, vector<128x128xf32> -> vector<128x128xf32>
    %12 = arith.addf %5, %11 : vector<128x128xf32>
    %c0_15 = arith.constant 0 : index
    %c0_16 = arith.constant 0 : index
    %c0_17 = arith.constant 0 : index
    %c2 = arith.constant 2 : index
    %c0_18 = arith.constant 0 : index
    %13 = vector.load %arg2[%c0_15, %c0_16, %c0_17, %c2, %c0_18] : memref<1x2x10x10x128xbf16, #tpu.memory_space<vmem>>, vector<1x2x8x8x128xbf16>
    %14 = vector.shape_cast %13 : vector<1x2x8x8x128xbf16> to vector<2x8x8x128xbf16>
    %15 = vector.shape_cast %14 : vector<2x8x8x128xbf16> to vector<128x128xbf16>
    %c2_19 = arith.constant 2 : index
    %c0_20 = arith.constant 0 : index
    %c0_21 = arith.constant 0 : index
    %16 = vector.load %arg6[%c2_19, %c0_20, %c0_21] : memref<9x128x128xbf16, #tpu.memory_space<vmem>>, vector<1x128x128xbf16>
    %17 = vector.shape_cast %16 : vector<1x128x128xbf16> to vector<128x128xbf16>
    %cst_22 = arith.constant dense<0.000000e+00> : vector<128x128xf32>
    %18 = tpu.matmul %15, %17, %cst_22 {dimension_numbers = #tpu.dot_dimension_numbers<[1], [0], [0], [1], [0, 0, 1, 1], [], []>} : vector<128x128xbf16>, vector<128x128xbf16>, vector<128x128xf32> -> vector<128x128xf32>
    %19 = arith.addf %12, %18 : vector<128x128xf32>
    %c0_23 = arith.constant 0 : index
    %c0_24 = arith.constant 0 : index
    %c1_25 = arith.constant 1 : index
    %c0_26 = arith.constant 0 : index
    %c0_27 = arith.constant 0 : index
    %20 = vector.load %arg2[%c0_23, %c0_24, %c1_25, %c0_26, %c0_27] : memref<1x2x10x10x128xbf16, #tpu.memory_space<vmem>>, vector<1x2x8x8x128xbf16>
    %21 = vector.shape_cast %20 : vector<1x2x8x8x128xbf16> to vector<2x8x8x128xbf16>
    %22 = vector.shape_cast %21 : vector<2x8x8x128xbf16> to vector<128x128xbf16>
    %c3 = arith.constant 3 : index
    %c0_28 = arith.constant 0 : index
    %c0_29 = arith.constant 0 : index
    %23 = vector.load %arg6[%c3, %c0_28, %c0_29] : memref<9x128x128xbf16, #tpu.memory_space<vmem>>, vector<1x128x128xbf16>
    %24 = vector.shape_cast %23 : vector<1x128x128xbf16> to vector<128x128xbf16>
    %cst_30 = arith.constant dense<0.000000e+00> : vector<128x128xf32>
    %25 = tpu.matmul %22, %24, %cst_30 {dimension_numbers = #tpu.dot_dimension_numbers<[1], [0], [0], [1], [0, 0, 1, 1], [], []>} : vector<128x128xbf16>, vector<128x128xbf16>, vector<128x128xf32> -> vector<128x128xf32>
    %26 = arith.addf %19, %25 : vector<128x128xf32>
    %c0_31 = arith.constant 0 : index
    %c0_32 = arith.constant 0 : index
    %c1_33 = arith.constant 1 : index
    %c1_34 = arith.constant 1 : index
    %c0_35 = arith.constant 0 : index
    %27 = vector.load %arg2[%c0_31, %c0_32, %c1_33, %c1_34, %c0_35] : memref<1x2x10x10x128xbf16, #tpu.memory_space<vmem>>, vector<1x2x8x8x128xbf16>
    %28 = vector.shape_cast %27 : vector<1x2x8x8x128xbf16> to vector<2x8x8x128xbf16>
    %29 = vector.shape_cast %28 : vector<2x8x8x128xbf16> to vector<128x128xbf16>
    %c4 = arith.constant 4 : index
    %c0_36 = arith.constant 0 : index
    %c0_37 = arith.constant 0 : index
    %30 = vector.load %arg6[%c4, %c0_36, %c0_37] : memref<9x128x128xbf16, #tpu.memory_space<vmem>>, vector<1x128x128xbf16>
    %31 = vector.shape_cast %30 : vector<1x128x128xbf16> to vector<128x128xbf16>
    %cst_38 = arith.constant dense<0.000000e+00> : vector<128x128xf32>
    %32 = tpu.matmul %29, %31, %cst_38 {dimension_numbers = #tpu.dot_dimension_numbers<[1], [0], [0], [1], [0, 0, 1, 1], [], []>} : vector<128x128xbf16>, vector<128x128xbf16>, vector<128x128xf32> -> vector<128x128xf32>
    %33 = arith.addf %26, %32 : vector<128x128xf32>
    %c0_39 = arith.constant 0 : index
    %c0_40 = arith.constant 0 : index
    %c1_41 = arith.constant 1 : index
    %c2_42 = arith.constant 2 : index
    %c0_43 = arith.constant 0 : index
    %34 = vector.load %arg2[%c0_39, %c0_40, %c1_41, %c2_42, %c0_43] : memref<1x2x10x10x128xbf16, #tpu.memory_space<vmem>>, vector<1x2x8x8x128xbf16>
    %35 = vector.shape_cast %34 : vector<1x2x8x8x128xbf16> to vector<2x8x8x128xbf16>
    %36 = vector.shape_cast %35 : vector<2x8x8x128xbf16> to vector<128x128xbf16>
    %c5 = arith.constant 5 : index
    %c0_44 = arith.constant 0 : index
    %c0_45 = arith.constant 0 : index
    %37 = vector.load %arg6[%c5, %c0_44, %c0_45] : memref<9x128x128xbf16, #tpu.memory_space<vmem>>, vector<1x128x128xbf16>
    %38 = vector.shape_cast %37 : vector<1x128x128xbf16> to vector<128x128xbf16>
    %cst_46 = arith.constant dense<0.000000e+00> : vector<128x128xf32>
    %39 = tpu.matmul %36, %38, %cst_46 {dimension_numbers = #tpu.dot_dimension_numbers<[1], [0], [0], [1], [0, 0, 1, 1], [], []>} : vector<128x128xbf16>, vector<128x128xbf16>, vector<128x128xf32> -> vector<128x128xf32>
    %40 = arith.addf %33, %39 : vector<128x128xf32>
    %c0_47 = arith.constant 0 : index
    %c0_48 = arith.constant 0 : index
    %c2_49 = arith.constant 2 : index
    %c0_50 = arith.constant 0 : index
    %c0_51 = arith.constant 0 : index
    %41 = vector.load %arg2[%c0_47, %c0_48, %c2_49, %c0_50, %c0_51] : memref<1x2x10x10x128xbf16, #tpu.memory_space<vmem>>, vector<1x2x8x8x128xbf16>
    %42 = vector.shape_cast %41 : vector<1x2x8x8x128xbf16> to vector<2x8x8x128xbf16>
    %43 = vector.shape_cast %42 : vector<2x8x8x128xbf16> to vector<128x128xbf16>
    %c6 = arith.constant 6 : index
    %c0_52 = arith.constant 0 : index
    %c0_53 = arith.constant 0 : index
    %44 = vector.load %arg6[%c6, %c0_52, %c0_53] : memref<9x128x128xbf16, #tpu.memory_space<vmem>>, vector<1x128x128xbf16>
    %45 = vector.shape_cast %44 : vector<1x128x128xbf16> to vector<128x128xbf16>
    %cst_54 = arith.constant dense<0.000000e+00> : vector<128x128xf32>
    %46 = tpu.matmul %43, %45, %cst_54 {dimension_numbers = #tpu.dot_dimension_numbers<[1], [0], [0], [1], [0, 0, 1, 1], [], []>} : vector<128x128xbf16>, vector<128x128xbf16>, vector<128x128xf32> -> vector<128x128xf32>
    %47 = arith.addf %40, %46 : vector<128x128xf32>
    %c0_55 = arith.constant 0 : index
    %c0_56 = arith.constant 0 : index
    %c2_57 = arith.constant 2 : index
    %c1_58 = arith.constant 1 : index
    %c0_59 = arith.constant 0 : index
    %48 = vector.load %arg2[%c0_55, %c0_56, %c2_57, %c1_58, %c0_59] : memref<1x2x10x10x128xbf16, #tpu.memory_space<vmem>>, vector<1x2x8x8x128xbf16>
    %49 = vector.shape_cast %48 : vector<1x2x8x8x128xbf16> to vector<2x8x8x128xbf16>
    %50 = vector.shape_cast %49 : vector<2x8x8x128xbf16> to vector<128x128xbf16>
    %c7 = arith.constant 7 : index
    %c0_60 = arith.constant 0 : index
    %c0_61 = arith.constant 0 : index
    %51 = vector.load %arg6[%c7, %c0_60, %c0_61] : memref<9x128x128xbf16, #tpu.memory_space<vmem>>, vector<1x128x128xbf16>
    %52 = vector.shape_cast %51 : vector<1x128x128xbf16> to vector<128x128xbf16>
    %cst_62 = arith.constant dense<0.000000e+00> : vector<128x128xf32>
    %53 = tpu.matmul %50, %52, %cst_62 {dimension_numbers = #tpu.dot_dimension_numbers<[1], [0], [0], [1], [0, 0, 1, 1], [], []>} : vector<128x128xbf16>, vector<128x128xbf16>, vector<128x128xf32> -> vector<128x128xf32>
    %54 = arith.addf %47, %53 : vector<128x128xf32>
    %c0_63 = arith.constant 0 : index
    %c0_64 = arith.constant 0 : index
    %c2_65 = arith.constant 2 : index
    %c2_66 = arith.constant 2 : index
    %c0_67 = arith.constant 0 : index
    %55 = vector.load %arg2[%c0_63, %c0_64, %c2_65, %c2_66, %c0_67] : memref<1x2x10x10x128xbf16, #tpu.memory_space<vmem>>, vector<1x2x8x8x128xbf16>
    %56 = vector.shape_cast %55 : vector<1x2x8x8x128xbf16> to vector<2x8x8x128xbf16>
    %57 = vector.shape_cast %56 : vector<2x8x8x128xbf16> to vector<128x128xbf16>
    %c8 = arith.constant 8 : index
    %c0_68 = arith.constant 0 : index
    %c0_69 = arith.constant 0 : index
    %58 = vector.load %arg6[%c8, %c0_68, %c0_69] : memref<9x128x128xbf16, #tpu.memory_space<vmem>>, vector<1x128x128xbf16>
    %59 = vector.shape_cast %58 : vector<1x128x128xbf16> to vector<128x128xbf16>
    %cst_70 = arith.constant dense<0.000000e+00> : vector<128x128xf32>
    %60 = tpu.matmul %57, %59, %cst_70 {dimension_numbers = #tpu.dot_dimension_numbers<[1], [0], [0], [1], [0, 0, 1, 1], [], []>} : vector<128x128xbf16>, vector<128x128xbf16>, vector<128x128xf32> -> vector<128x128xf32>
    %61 = arith.addf %54, %60 : vector<128x128xf32>
    %c0_71 = arith.constant 0 : index
    %c0_72 = arith.constant 0 : index
    %62 = vector.load %arg7[%c0_71, %c0_72] : memref<1x128xf32, #tpu.memory_space<vmem>>, vector<1x128xf32>
    %63 = vector.broadcast %62 : vector<1x128xf32> to vector<128x128xf32>
    %64 = arith.addf %61, %63 : vector<128x128xf32>
    %c0_73 = arith.constant 0 : index
    %c0_74 = arith.constant 0 : index
    %c0_75 = arith.constant 0 : index
    %c0_76 = arith.constant 0 : index
    %c0_77 = arith.constant 0 : index
    %65 = vector.load %arg3[%c0_73, %c0_74, %c0_75, %c0_76, %c0_77] : memref<1x2x9x9x4xbf16, #tpu.memory_space<vmem>>, vector<1x2x8x8x4xbf16>
    %66 = vector.shape_cast %65 : vector<1x2x8x8x4xbf16> to vector<2x8x8x4xbf16>
    %67 = vector.shape_cast %66 : vector<2x8x8x4xbf16> to vector<128x4xbf16>
    %c0_78 = arith.constant 0 : index
    %c0_79 = arith.constant 0 : index
    %68 = vector.load %arg4[%c0_78, %c0_79] : memref<4x128xbf16, #tpu.memory_space<vmem>>, vector<4x128xbf16>
    %cst_80 = arith.constant dense<0.000000e+00> : vector<128x128xf32>
    %69 = tpu.matmul %67, %68, %cst_80 {dimension_numbers = #tpu.dot_dimension_numbers<[1], [0], [0], [1], [0, 0, 1, 1], [], []>} : vector<128x4xbf16>, vector<4x128xbf16>, vector<128x128xf32> -> vector<128x128xf32>
    %70 = arith.addf %64, %69 : vector<128x128xf32>
    %c0_81 = arith.constant 0 : index
    %c0_82 = arith.constant 0 : index
    %71 = vector.load %arg5[%c0_81, %c0_82] : memref<1x128xf32, #tpu.memory_space<vmem>>, vector<1x128xf32>
    %72 = vector.broadcast %71 : vector<1x128xf32> to vector<128x128xf32>
    %73 = arith.addf %70, %72 : vector<128x128xf32>
    %cst_83 = arith.constant 0.000000e+00 : f32
    %74 = vector.broadcast %cst_83 : f32 to vector<128x128xf32>
    %75 = arith.maximumf %73, %74 : vector<128x128xf32>
    %76 = vector.shape_cast %75 : vector<128x128xf32> to vector<2x8x8x128xf32>
    %c0_84 = arith.constant 0 : index
    %c0_85 = arith.constant 0 : index
    %c0_86 = arith.constant 0 : index
    %c0_87 = arith.constant 0 : index
    %77 = vector.load %arg8[%c0_84, %c0_85, %c0_86, %c0_87] : memref<2x8x8x128xf32, #tpu.memory_space<vmem>>, vector<2x8x8x128xf32>
    tpu.vector_store %arg8[%c0_84, %c0_85, %c0_86, %c0_87], %76 {strides = array<i32>} : memref<2x8x8x128xf32, #tpu.memory_space<vmem>>, vector<2x8x8x128xf32>,
    return
  }
  func.func @transform_0(%arg0: i32, %arg1: i32) -> (i32, i32, i32, i32, i32) {
    %c0_i32 = arith.constant 0 : i32
    %c0_i32_0 = arith.constant 0 : i32
    %c0_i32_1 = arith.constant 0 : i32
    %c0_i32_2 = arith.constant 0 : i32
    %c0_i32_3 = arith.constant 0 : i32
    return %arg0, %c0_i32, %c0_i32_0, %c0_i32_1, %c0_i32_2 : i32, i32, i32, i32, i32
  }
  func.func @transform_1(%arg0: i32, %arg1: i32) -> (i32, i32, i32, i32, i32) {
    %c0_i32 = arith.constant 0 : i32
    %c0_i32_0 = arith.constant 0 : i32
    %c0_i32_1 = arith.constant 0 : i32
    %c0_i32_2 = arith.constant 0 : i32
    %c0_i32_3 = arith.constant 0 : i32
    return %arg0, %c0_i32, %c0_i32_0, %c0_i32_1, %c0_i32_2 : i32, i32, i32, i32, i32
  }
  func.func @transform_2(%arg0: i32, %arg1: i32) -> (i32, i32) {
    %c0_i32 = arith.constant 0 : i32
    %c0_i32_0 = arith.constant 0 : i32
    return %c0_i32, %arg1 : i32, i32
  }
  func.func @transform_3(%arg0: i32, %arg1: i32) -> (i32, i32) {
    %c0_i32 = arith.constant 0 : i32
    %c0_i32_0 = arith.constant 0 : i32
    return %c0_i32, %arg1 : i32, i32
  }
  func.func @transform_4(%arg0: i32, %arg1: i32) -> (i32, i32, i32) {
    %c0_i32 = arith.constant 0 : i32
    %c0_i32_0 = arith.constant 0 : i32
    %c0_i32_1 = arith.constant 0 : i32
    return %c0_i32, %c0_i32_0, %arg1 : i32, i32, i32
  }
  func.func @transform_5(%arg0: i32, %arg1: i32) -> (i32, i32) {
    %c0_i32 = arith.constant 0 : i32
    %c0_i32_0 = arith.constant 0 : i32
    return %c0_i32, %arg1 : i32, i32
  }
  func.func @transform_6(%arg0: i32, %arg1: i32) -> (i32, i32, i32, i32) {
    %c0_i32 = arith.constant 0 : i32
    %c0_i32_0 = arith.constant 0 : i32
    %c0_i32_1 = arith.constant 0 : i32
    return %c0_i32, %arg0, %c0_i32_0, %arg1 : i32, i32, i32, i32
  }
}

</mosaic_0001>

<bundles_post_ra>
// kernel: res_block_forward.2
= control target key start
LH: loop header
LB: loop body
LE: loop exit
PB: predicated region body
PF: predicated region fallthrough
CT: control target
= control target key end

     0   :  { %vm124_vm0 = vcmask 1041408   ;;  %vm99_vm1 = vcmask 31744   ;;  %vm421_vm2 = vsmask.f32 3328  ;;  %vm422_vm3 = vsmask.f32 7440  ;;  %s4718_s4 = inlined_call_operand.vmem [shape: bf16[9,4,128], index: 4, kind: input, shape index: {}]   ;;  %s4719_s1 = inlined_call_operand.vmem [shape: bf16[1,2,9,9,4], index: 1, kind: input, shape index: {}]   ;;  %s4720_s3 = inlined_call_operand.vmem [shape: bf16[1,2,9,9,4], index: 3, kind: input, shape index: {}]   ;;  %s4721_s2 = inlined_call_operand.vmem [shape: bf16[1,2,9,9,4], index: 2, kind: input, shape index: {}]   ;;  %s4722_s0 = inlined_call_operand.vmem [shape: bf16[1,2,9,9,4], index: 0, kind: input, shape index: {}]   ;;  %s4723_s6 = inlined_call_operand.vmem [shape: bf16[2,10,10,128], index: 6, kind: output, shape index: {}]   ;;  %s4724_s5 = inlined_call_operand.vmem [shape: f32[1,128], index: 5, kind: input, shape index: {}]  }
   0x1   :  { %v2862_v0 = vld [vmem:[%s4718_s4 + $0x2] sm:$0x3]  ;;  %v3649_v1 = vld [vmem:[%s4718_s4 + $0x8] sm:$0x3]  ;;  %v3561_v6 = vld [vmem:[%s4719_s1 + $0x10] ss:$8 sps:$4 sm:$0xff]  }
   0x2   :  { %3548 = vmatprep.subr.msk.bf16.mxu1 %vm124_vm0, %v2862_v0  ;;  %3552 = vmatprep.subr.msk.bf16.mxu0 %vm124_vm0, %v3649_v1  ;;  %v126_v2 = vsel %vm124_vm0, %v2862_v0, 0  ;;  %v3657_v3 = vsel %vm124_vm0, %v3649_v1, 0  ;;  %v3559_v4 = vld [vmem:[%s4719_s1] ss:$8 sps:$4 sm:$0xff]   ;;  %v3562_v8 = vld [vmem:[%s4720_s3 + $0x10] ss:$8 sps:$4 sm:$0xff]   ;;  %vm3734_vm4 = vmor %vm421_vm2, %vm422_vm3 }
   0x3   :  { %3257 = vmatpush3.bf16.msra.mxu1 %v126_v2  ;;  %3329 = vmatpush3.bf16.msra.mxu0 %v3657_v3  ;;  %v3560_v5 = vld [vmem:[%s4720_s3] ss:$8 sps:$4 sm:$0xff]   ;;  %v3565_v14 = vld [vmem:[%s4719_s1 + $0x30] ss:$8 sps:$4 sm:$0xff]   ;;  %v1211_v18 = vld [vmem:[%s4721_s2 + $0x4] sm:$0x1] }
   0x4   :  { %3258 = vmatprep.mubr.msk.bf16.mxu1 %vm99_vm1, %v3559_v4  ;;  %3330 = vmatprep.mubr.msk.bf16.mxu0 %vm99_vm1, %v3560_v5  ;;  %v40_v7 = vld [vmem:[%s4718_s4] sm:$0x3]  ;;  %v2946_v9 = vld [vmem:[%s4718_s4 + $0xa] sm:$0x3]  ;;  %v3566_v15 = vld [vmem:[%s4720_s3 + $0x30] ss:$8 sps:$4 sm:$0xff]  }
   0x5   :  { %3549 = vmatprep.subr.msk.bf16.mxu1 %vm124_vm0, %v40_v7  ;;  %v290_v10 = vsel %vm124_vm0, %v40_v7, 0  ;;  %3554 = vmatprep.subr.msk.bf16.mxu0 %vm124_vm0, %v2946_v9  ;;  %v1517_v11 = vsel %vm124_vm0, %v2946_v9, 0  ;;  %v3563_v12 = vld [vmem:[%s4719_s1 + $0x20] ss:$8 sps:$4 sm:$0xff]   ;;  %v1213_v20 = vld [vmem:[%s4721_s2 + $0xc] sm:$0x1] }
   0x6   :  { %3259 = vmatmul.mubr.msk.bf16.vlgmr.msra.gmra.mrb[0].mxu1 %vm99_vm1, %v3561_v6  ;;  %3331 = vmatmul.mubr.msk.bf16.vlgmr.msra.gmra.mrb[0].mxu0 %vm99_vm1, %v3562_v8  ;;  %v3564_v13 = vld [vmem:[%s4720_s3 + $0x20] ss:$8 sps:$4 sm:$0xff]   ;;  %v1252_v23 = vshll.u32 %v1211_v18, 16  ;;  %v1266_v26 = vshll.u32 %v1213_v20, 16  ;;  %v1214_v34 = vld [vmem:[%s4721_s2 + $0x10] sm:$0xf] }
   0x7   :  { %3275 = vmatpush3.bf16.msra.mxu1 %v290_v10  ;;  %3347 = vmatpush3.bf16.msra.mxu0 %v1517_v11  ;;  %v3567_v16 = vld [vmem:[%s4719_s1 + $0x48] ss:$8 sps:$4 sm:$0xff]   ;;  %v1210_v17 = vld [vmem:[%s4721_s2] sm:$0xf]  ;;  %v1215_v36 = vld [vmem:[%s4721_s2 + $0x14] sm:$0x1] }
   0x8   :  { %3262 = vmatprep.mubr.msk.bf16.mxu1 %vm99_vm1, %v3563_v12  ;;  %3334 = vmatprep.mubr.msk.bf16.mxu0 %vm99_vm1, %v3564_v13  ;;  %v1212_v19 = vld [vmem:[%s4721_s2 + $0x8] sm:$0xf]  ;;  %v1243_v21 = vshrl.u32 %v1210_v17, 16  ;;  %v1246_v22 = vshll.u32 %v1210_v17, 16  ;;  %v1254_v29 = vrot.slane %v1252_v23, 5  ;;  %v1268_v32 = vrot.slane %v1266_v26, 5 }
   0x9   :  { %v1257_v24 = vshrl.u32 %v1212_v19, 16  ;;  %v1260_v25 = vshll.u32 %v1212_v19, 16  ;;  %v3568_v33 = vld [vmem:[%s4719_s1 + $0x58] ss:$8 sps:$4 sm:$0xff]   ;;  %v1217_v38 = vld [vmem:[%s4721_s2 + $0x1c] sm:$0x1] }
   0xa   :  { %v1245_v27 = vrot.slane %v1243_v21, 4  ;;  %v1248_v28 = vrot.slane %v1246_v22, 5  ;;  %v1216_v37 = vld [vmem:[%s4721_s2 + $0x18] sm:$0xf]  ;;  %v1271_v41 = vshrl.u32 %v1214_v34, 16  ;;  %v1274_v42 = vshll.u32 %v1214_v34, 16 }
   0xb   :  { %v1259_v30 = vrot.slane %v1257_v24, 4  ;;  %v1262_v31 = vrot.slane %v1260_v25, 5  ;;  %v1280_v43 = vshll.u32 %v1215_v36, 16  ;;  %v2979_v44 = vld [vmem:[%s4718_s4 + $0xc] sm:$0x3]  ;;  %v1285_v46 = vshrl.u32 %v1216_v37, 16 }
   0xc   :  { %v1249_v35 = vor.u32 %v1248_v28, %v1245_v27  ;;  %v1288_v47 = vshll.u32 %v1216_v37, 16  ;;  %v1294_v48 = vshll.u32 %v1217_v38, 16  ;;  %3555 = vmatprep.subr.msk.bf16.mxu0 %vm124_vm0, %v2979_v44  ;;  %v1273_v50 = vrot.slane %v1271_v41, 4  ;;  %v3569_v55 = vld [vmem:[%s4719_s1 + $0x68] ss:$8 sps:$4 sm:$0xff]  }
   0xd   :  { %v1263_v40 = vor.u32 %v1262_v31, %v1259_v30  ;;  %v1276_v51 = vrot.slane %v1274_v42, 5  ;;  %v1287_v53 = vrot.slane %v1285_v46, 4  ;;  %v1282_v58 = vrot.slane %v1280_v43, 5  ;;  %v1218_v60 = vld [vmem:[%s4721_s2 + $0x20] sm:$0xf] }
   0xe   :  { %3263 = vmatmul.mubr.msk.bf16.gmra.mrb[4].mxu1 %vm99_vm1, %v3565_v14  ;;  %3335 = vmatmul.mubr.msk.bf16.gmra.mrb[4].mxu0 %vm99_vm1, %v3566_v15  ;;  %v1250_v45 = vrot.slane %v1249_v35, 4  ;;  %v1290_v54 = vrot.slane %v1288_v47, 5  ;;  %v1296_v59 = vrot.slane %v1294_v48, 5  ;;  %v1219_v61 = vld [vmem:[%s4721_s2 + $0x24] sm:$0x1]  ;;  %v1299_v4 = vshrl.u32 %v1218_v60, 16 }
   0xf   :  { %3266 = vmatprep.mubr.msk.bf16.mxu1 %vm99_vm1, %v3567_v16  ;;  %v1264_v49 = vrot.slane %v1263_v40, 4  ;;  %v1277_v57 = vor.u32 %v1276_v51, %v1273_v50  ;;  %v1220_v0 = vld [vmem:[%s4721_s2 + $0x28] sm:$0xf]  ;;  %v1221_v2 = vld [vmem:[%s4721_s2 + $0x2c] sm:$0x1]  ;;  %v1302_v5 = vshll.u32 %v1218_v60, 16 }
  0x10   :  { %v1255_v52 = vsel %vm3734_vm4, %v1250_v45, %v1254_v29  ;;  %v1291_v63 = vor.u32 %v1290_v54, %v1287_v53  ;;  %v1308_v7 = vshll.u32 %v1219_v61, 16  ;;  %v1313_v8 = vshrl.u32 %v1220_v0, 16  ;;  %v3570_v18 = vld [vmem:[%s4719_s1 + $0x78] ss:$8 sps:$4 sm:$0xff]   ;;  %v1222_v23 = vld [vmem:[%s4721_s2 + $0x30] sm:$0xf] }
  0x11   :  { %v1269_v56 = vsel %vm3734_vm4, %v1264_v49, %v1268_v32  ;;  %v1278_v6 = vrot.slane %v1277_v57, 4  ;;  %v1316_v9 = vshll.u32 %v1220_v0, 16  ;;  %v1301_v11 = vrot.slane %v1299_v4, 4  ;;  %v1223_v24 = vld [vmem:[%s4721_s2 + $0x34] sm:$0x1] }
  0x12   :  { %v2947_v62 = vcombine.low %v1255_v52, %v1269_v56  ;;  %v1292_v10 = vrot.slane %v1291_v63, 4  ;;  %v1304_v12 = vrot.slane %v1302_v5, 5  ;;  %v1322_v13 = vshll.u32 %v1221_v2, 16  ;;  %v1224_v27 = vld [vmem:[%s4721_s2 + $0x38] sm:$0xf] }
  0x13   :  { %v1283_v14 = vsel %vm3734_vm4, %v1278_v6, %v1282_v58  ;;  %v1716_v15 = vsel %vm124_vm0, %v2979_v44, 0  ;;  %v1315_v16 = vrot.slane %v1313_v8, 4  ;;  %v1318_v17 = vrot.slane %v1316_v9, 5  ;;  %v1225_v28 = vld [vmem:[%s4721_s2 + $0x3c] sm:$0x1] }
  0x14   :  { %3348 = vmatprep.mubr.msk.bf16.mxu0 %vm99_vm1, %v2947_v62  ;;  %v1297_v19 = vsel %vm3734_vm4, %v1292_v10, %v1296_v59  ;;  %v1305_v20 = vor.u32 %v1304_v12, %v1301_v11  ;;  %v1310_v21 = vrot.slane %v1308_v7, 5  ;;  %v1324_v22 = vrot.slane %v1322_v13, 5  ;;  %v3571_v43 = vld [vmem:[%s4722_s0] ss:$8 sps:$4 sm:$0xff]   ;;  %v1227_v49 = vld [vmem:[%s4721_s2 + $0x4c] sm:$0x1] }
  0x15   :  { %v2948_v25 = vcombine.low %v1283_v14, %v1297_v19  ;;  %v1319_v26 = vor.u32 %v1318_v17, %v1315_v16  ;;  %v1327_v29 = vshrl.u32 %v1222_v23, 16  ;;  %v1330_v30 = vshll.u32 %v1222_v23, 16  ;;  %v1226_v48 = vld [vmem:[%s4721_s2 + $0x48] sm:$0xf]  ;;  %v1228_v52 = vld [vmem:[%s4721_s2 + $0x50] sm:$0xf] }
  0x16   :  { %3267 = vmatmul.mubr.msk.bf16.gmra.mrb[8].mxu1 %vm99_vm1, %v3568_v33  ;;  %v1306_v31 = vrot.slane %v1305_v20, 4  ;;  %v1336_v32 = vshll.u32 %v1223_v24, 16  ;;  %v1341_v33 = vshrl.u32 %v1224_v27, 16  ;;  %v1344_v34 = vshll.u32 %v1224_v27, 16  ;;  %v1229_v53 = vld [vmem:[%s4721_s2 + $0x54] sm:$0x1] }
  0x17   :  { %3270 = vmatprep.mubr.msk.bf16.mxu1 %vm99_vm1, %v3569_v55  ;;  %3349 = vmatmul.mubr.msk.bf16.vlgmr.msra.gmra.mrb[0].mxu0 %vm99_vm1, %v2948_v25  ;;  %v1320_v35 = vrot.slane %v1319_v26, 4  ;;  %v1329_v36 = vrot.slane %v1327_v29, 4  ;;  %v1332_v37 = vrot.slane %v1330_v30, 5  ;;  %v1350_v38 = vshll.u32 %v1225_v28, 16  ;;  %v3572_v5 = vld [vmem:[%s4722_s0 + $0x10] ss:$8 sps:$4 sm:$0xff]  }
  0x18   :  { %3365 = vmatpush3.bf16.msra.mxu0 %v1716_v15  ;;  %v1311_v40 = vsel %vm3734_vm4, %v1306_v31, %v1310_v21  ;;  %v1343_v41 = vrot.slane %v1341_v33, 4  ;;  %v1346_v42 = vrot.slane %v1344_v34, 5  ;;  %v1338_v46 = vrot.slane %v1336_v32, 5  ;;  %v2895_v10 = vld [vmem:[%s4718_s4 + $0x4] sm:$0x3] }
  0x19   :  { %v1325_v44 = vsel %vm3734_vm4, %v1320_v35, %v1324_v22  ;;  %v1333_v45 = vor.u32 %v1332_v37, %v1329_v36  ;;  %v1352_v47 = vrot.slane %v1350_v38, 5  ;;  %v1355_v54 = vshrl.u32 %v1226_v48, 16  ;;  %v1230_v11 = vld [vmem:[%s4721_s2 + $0x58] sm:$0xf]  ;;  %3550 = vmatprep.subr.msk.bf16.mxu1 %vm124_vm0, %v2895_v10  ;;  %v1231_v14 = vld [vmem:[%s4721_s2 + $0x5c] sm:$0x1] }
  0x1a   :  { %v2949_v50 = vcombine.low %v1311_v40, %v1325_v44  ;;  %v1347_v51 = vor.u32 %v1346_v42, %v1343_v41  ;;  %v1358_v55 = vshll.u32 %v1226_v48, 16  ;;  %v1364_v57 = vshll.u32 %v1227_v49, 16  ;;  %v1232_v15 = vld [vmem:[%s4721_s2 + $0x60] sm:$0xf]  ;;  %v1233_v16 = vld [vmem:[%s4721_s2 + $0x64] sm:$0x1] }
  0x1b   :  { %v1334_v56 = vrot.slane %v1333_v45, 4  ;;  %v1369_v58 = vshrl.u32 %v1228_v52, 16  ;;  %v1372_v59 = vshll.u32 %v1228_v52, 16  ;;  %v1357_v61 = vrot.slane %v1355_v54, 4  ;;  %v3573_v29 = vld [vmem:[%s4722_s0 + $0x20] ss:$8 sps:$4 sm:$0xff]  }
  0x1c   :  { %3352 = vmatprep.mubr.msk.bf16.mxu0 %vm99_vm1, %v2949_v50  ;;  %v1348_v60 = vrot.slane %v1347_v51, 4  ;;  %v1360_v62 = vrot.slane %v1358_v55, 5  ;;  %v1378_v63 = vshll.u32 %v1229_v53, 16  ;;  %v1366_v8 = vrot.slane %v1364_v57, 5  ;;  %v1234_v34 = vld [vmem:[%s4721_s2 + $0x68] sm:$0xf] }
  0x1d   :  { %v1339_v0 = vsel %vm3734_vm4, %v1334_v56, %v1338_v46  ;;  %v1371_v2 = vrot.slane %v1369_v58, 4  ;;  %v1374_v4 = vrot.slane %v1372_v59, 5  ;;  %v1386_v19 = vshll.u32 %v1230_v11, 16  ;;  %v1235_v38 = vld [vmem:[%s4721_s2 + $0x6c] sm:$0x1] }
  0x1e   :  { %3271 = vmatmul.mubr.msk.bf16.gmra.mrb[12].mxu1 %vm99_vm1, %v3570_v18  ;;  %v1353_v6 = vsel %vm3734_vm4, %v1348_v60, %v1352_v47  ;;  %v1361_v7 = vor.u32 %v1360_v62, %v1357_v61  ;;  %v1380_v9 = vrot.slane %v1378_v63, 5  ;;  %v1383_v18 = vshrl.u32 %v1230_v11, 16  ;;  %v1236_v40 = vld [vmem:[%s4721_s2 + $0x70] sm:$0xf]  ;;  %v1238_v59 = vld [vmem:[%s4721_s2 + $0x78] sm:$0xf] }
  0x1f   :  { %3276 = vmatprep.mubr.msk.bf16.mxu1 %vm99_vm1, %v3571_v43  ;;  %v2950_v12 = vcombine.low %v1339_v0, %v1353_v6  ;;  %v1375_v13 = vor.u32 %v1374_v4, %v1371_v2  ;;  %v1392_v20 = vshll.u32 %v1231_v14, 16  ;;  %v1397_v22 = vshrl.u32 %v1232_v15, 16  ;;  %v1237_v43 = vld [vmem:[%s4721_s2 + $0x74] sm:$0x1]  ;;  %v3574_v58 = vld [vmem:[%s4722_s0 + $0x30] ss:$8 sps:$4 sm:$0xff]  }
  0x20   :  { %v1362_v17 = vrot.slane %v1361_v7, 4  ;;  %v1400_v23 = vshll.u32 %v1232_v15, 16  ;;  %v1406_v24 = vshll.u32 %v1233_v16, 16  ;;  %v1385_v26 = vrot.slane %v1383_v18, 4  ;;  %v1239_v62 = vld [vmem:[%s4721_s2 + $0x7c] sm:$0x1] }
  0x21   :  { %3353 = vmatmul.mubr.msk.bf16.gmra.mrb[4].mxu0 %vm99_vm1, %v2950_v12  ;;  %v1376_v21 = vrot.slane %v1375_v13, 4  ;;  %v1388_v27 = vrot.slane %v1386_v19, 5  ;;  %v1394_v28 = vrot.slane %v1392_v20, 5  ;;  %v1399_v31 = vrot.slane %v1397_v22, 4  ;;  %v1240_v63 = vld [vmem:[%s4721_s2 + $0x80] sm:$0xf] }
  0x22   :  { %v1367_v25 = vsel %vm3734_vm4, %v1362_v17, %v1366_v8  ;;  %v1402_v32 = vrot.slane %v1400_v23, 5  ;;  %v1408_v33 = vrot.slane %v1406_v24, 5  ;;  %v699_v37 = vsel %vm124_vm0, %v2895_v10, 0  ;;  %v1241_v0 = vld [vmem:[%s4721_s2 + $0x84] sm:$0x1] }
  0x23   :  { %v1381_v30 = vsel %vm3734_vm4, %v1376_v21, %v1380_v9  ;;  %v1389_v36 = vor.u32 %v1388_v27, %v1385_v26  ;;  %v1411_v41 = vshrl.u32 %v1234_v34, 16  ;;  %v1414_v44 = vshll.u32 %v1234_v34, 16  ;;  %v3575_v11 = vld [vmem:[%s4722_s0 + $0x48] ss:$8 sps:$4 sm:$0xff]  }
  0x24   :  { %v2951_v35 = vcombine.low %v1367_v25, %v1381_v30  ;;  %v1403_v42 = vor.u32 %v1402_v32, %v1399_v31  ;;  %v1420_v45 = vshll.u32 %v1235_v38, 16  ;;  %v1425_v46 = vshrl.u32 %v1236_v40, 16  ;;  %v3577_v25 = vld [vmem:[%s4722_s0 + $0x58] ss:$8 sps:$4 sm:$0xff]   ;;  %v3579_v30 = vld [vmem:[%s4722_s0 + $0x68] ss:$8 sps:$4 sm:$0xff]  }
  0x25   :  { %v1390_v47 = vrot.slane %v1389_v36, 4  ;;  %v1413_v48 = vrot.slane %v1411_v41, 4  ;;  %v1428_v49 = vshll.u32 %v1236_v40, 16  ;;  %v1434_v50 = vshll.u32 %v1237_v43, 16  ;;  %v3576_v32 = vld [vmem:[%s4722_s0 + $0x8] ss:$8 sps:$4 sm:$0xff]  }
  0x26   :  { %3277 = vmatmul.mubr.msk.bf16.vlgmr.msra.gmra.mrb[0].mxu1 %vm99_vm1, %v3572_v5  ;;  %3356 = vmatprep.mubr.msk.bf16.mxu0 %vm99_vm1, %v2951_v35  ;;  %v1404_v51 = vrot.slane %v1403_v42, 4  ;;  %v1416_v52 = vrot.slane %v1414_v44, 5  ;;  %v1422_v53 = vrot.slane %v1420_v45, 5  ;;  %v1427_v54 = vrot.slane %v1425_v46, 4  ;;  %v3581_v35 = vld [vmem:[%s4722_s0 + $0x78] ss:$8 sps:$4 sm:$0xff]  }
  0x27   :  { %3280 = vmatprep.mubr.msk.bf16.mxu1 %vm99_vm1, %v3573_v29  ;;  %3293 = vmatpush3.bf16.msra.mxu1 %v699_v37  ;;  %v1395_v55 = vsel %vm3734_vm4, %v1390_v47, %v1394_v28  ;;  %v1430_v56 = vrot.slane %v1428_v49, 5  ;;  %v1436_v57 = vrot.slane %v1434_v50, 5  ;;  %v1439_v5 = vshrl.u32 %v1238_v59, 16  ;;  %v3012_v28 = vld [vmem:[%s4718_s4 + $0xe] sm:$0x3] }
  0x28   :  { %v1409_v60 = vsel %vm3734_vm4, %v1404_v51, %v1408_v33  ;;  %v1417_v61 = vor.u32 %v1416_v52, %v1413_v48  ;;  %v1442_v6 = vshll.u32 %v1238_v59, 16  ;;  %v1448_v8 = vshll.u32 %v1239_v62, 16  ;;  %3556 = vmatprep.subr.msk.bf16.mxu0 %vm124_vm0, %v3012_v28  ;;  %v389_v36 = vld [vmem:[%s4722_s0] sm:$0xf]  ;;  %v390_v37 = vld [vmem:[%s4722_s0 + $0x4] sm:$0x1] }
  0x29   :  { %v2952_v2 = vcombine.low %v1395_v55, %v1409_v60  ;;  %v1431_v4 = vor.u32 %v1430_v56, %v1427_v54  ;;  %v1453_v9 = vshrl.u32 %v1240_v63, 16  ;;  %v1456_v10 = vshll.u32 %v1240_v63, 16  ;;  %v391_v38 = vld [vmem:[%s4722_s0 + $0x8] sm:$0xf]  ;;  %v392_v40 = vld [vmem:[%s4722_s0 + $0xc] sm:$0x1] }
  0x2a   :  { %v1418_v7 = vrot.slane %v1417_v61, 4  ;;  %v1441_v13 = vrot.slane %v1439_v5, 4  ;;  %v1444_v14 = vrot.slane %v1442_v6, 5  ;;  %v1462_v15 = vshll.u32 %v1241_v0, 16  ;;  %v3578_v45 = vld [vmem:[%s4722_s0 + $0x18] ss:$8 sps:$4 sm:$0xff]  }
  0x2b   :  { %3357 = vmatmul.mubr.msk.bf16.gmra.mrb[8].mxu0 %vm99_vm1, %v2952_v2  ;;  %v1432_v12 = vrot.slane %v1431_v4, 4  ;;  %v1455_v17 = vrot.slane %v1453_v9, 4  ;;  %v1458_v18 = vrot.slane %v1456_v10, 5  ;;  %v1450_v21 = vrot.slane %v1448_v8, 5  ;;  %v3580_v48 = vld [vmem:[%s4722_s0 + $0x28] ss:$8 sps:$4 sm:$0xff]  }
  0x2c   :  { %v1423_v16 = vsel %vm3734_vm4, %v1418_v7, %v1422_v53  ;;  %v1445_v20 = vor.u32 %v1444_v14, %v1441_v13  ;;  %v1464_v22 = vrot.slane %v1462_v15, 5  ;;  %v1915_v34 = vsel %vm124_vm0, %v3012_v28, 0  ;;  %v393_v55 = vld [vmem:[%s4722_s0 + $0x10] sm:$0xf]  ;;  %v394_v56 = vld [vmem:[%s4722_s0 + $0x14] sm:$0x1] }
  0x2d   :  { %v1437_v19 = vsel %vm3734_vm4, %v1432_v12, %v1436_v57  ;;  %v1459_v24 = vor.u32 %v1458_v18, %v1455_v17  ;;  %v425_v41 = vshrl.u32 %v389_v36, 16  ;;  %v428_v42 = vshll.u32 %v389_v36, 16  ;;  %v396_v59 = vld [vmem:[%s4722_s0 + $0x1c] sm:$0x1]  ;;  %v2912_v4 = vld [vmem:[%s4718_s4 + $0x6] sm:$0x3] }
  0x2e   :  { %3281 = vmatmul.mubr.msk.bf16.gmra.mrb[4].mxu1 %vm99_vm1, %v3574_v58  ;;  %v2953_v23 = vcombine.low %v1423_v16, %v1437_v19  ;;  %v1446_v26 = vrot.slane %v1445_v20, 4  ;;  %v434_v43 = vshll.u32 %v390_v37, 16  ;;  %v439_v44 = vshrl.u32 %v391_v38, 16  ;;  %v395_v58 = vld [vmem:[%s4722_s0 + $0x18] sm:$0xf]  ;;  %3551 = vmatprep.subr.msk.bf16.mxu1 %vm124_vm0, %v2912_v4 }
  0x2f   :  { %3284 = vmatprep.mubr.msk.bf16.mxu1 %vm99_vm1, %v3575_v11  ;;  %v1460_v27 = vrot.slane %v1459_v24, 4  ;;  %v442_v46 = vshll.u32 %v391_v38, 16  ;;  %v448_v47 = vshll.u32 %v392_v40, 16  ;;  %v427_v49 = vrot.slane %v425_v41, 4  ;;  %v397_v17 = vld [vmem:[%s4722_s0 + $0x20] sm:$0xf] }
  0x30   :  { %3360 = vmatprep.mubr.msk.bf16.mxu0 %vm99_vm1, %v2953_v23  ;;  %v1451_v29 = vsel %vm3734_vm4, %v1446_v26, %v1450_v21  ;;  %v430_v50 = vrot.slane %v428_v42, 5  ;;  %v436_v51 = vrot.slane %v434_v43, 5  ;;  %v441_v52 = vrot.slane %v439_v44, 4  ;;  %v3582_v18 = vld [vmem:[%s4722_s0 + $0x38] ss:$8 sps:$4 sm:$0xff]  }
  0x31   :  { %v1465_v31 = vsel %vm3734_vm4, %v1460_v27, %v1464_v22  ;;  %v444_v53 = vrot.slane %v442_v46, 5  ;;  %v450_v54 = vrot.slane %v448_v47, 5  ;;  %v453_v60 = vshrl.u32 %v393_v55, 16  ;;  %v398_v21 = vld [vmem:[%s4722_s0 + $0x24] sm:$0x1] }
  0x32   :  { %v2954_v33 = vcombine.low %v1451_v29, %v1465_v31  ;;  %v431_v57 = vor.u32 %v430_v50, %v427_v49  ;;  %v456_v61 = vshll.u32 %v393_v55, 16  ;;  %v462_v63 = vshll.u32 %v394_v56, 16  ;;  %v399_v22 = vld [vmem:[%s4722_s0 + $0x28] sm:$0xf]  ;;  %v400_v23 = vld [vmem:[%s4722_s0 + $0x2c] sm:$0x1] }
  0x33   :  { %v445_v62 = vor.u32 %v444_v53, %v441_v52  ;;  %v467_v0 = vshrl.u32 %v395_v58, 16  ;;  %v470_v2 = vshll.u32 %v395_v58, 16  ;;  %v455_v6 = vrot.slane %v453_v60, 4  ;;  %v401_v42 = vld [vmem:[%s4722_s0 + $0x30] sm:$0xf] }
  0x34   :  { %3361 = vmatmul.mubr.msk.bf16.gmra.mrb[12].mxu0 %vm99_vm1, %v2954_v33  ;;  %v432_v5 = vrot.slane %v431_v57, 4  ;;  %v458_v7 = vrot.slane %v456_v61, 5  ;;  %v476_v8 = vshll.u32 %v396_v59, 16  ;;  %v464_v10 = vrot.slane %v462_v63, 5  ;;  %v402_v46 = vld [vmem:[%s4722_s0 + $0x34] sm:$0x1] }
  0x35   :  { %3366 = vmatprep.mubr.msk.bf16.mxu0 %vm99_vm1, %v3576_v32  ;;  %v446_v9 = vrot.slane %v445_v62, 4  ;;  %v469_v11 = vrot.slane %v467_v0, 4  ;;  %v472_v12 = vrot.slane %v470_v2, 5  ;;  %v897_v16 = vsel %vm124_vm0, %v2912_v4, 0  ;;  %v3583_v32 = vld [vmem:[%s4722_s0 + $0x50] ss:$8 sps:$4 sm:$0xff]  }
  0x36   :  { %3285 = vmatmul.mubr.msk.bf16.gmra.mrb[8].mxu1 %vm99_vm1, %v3577_v25  ;;  %v437_v13 = vsel %vm3734_vm4, %v432_v5, %v436_v51  ;;  %v459_v14 = vor.u32 %v458_v7, %v455_v6  ;;  %v478_v15 = vrot.slane %v476_v8, 5  ;;  %v481_v26 = vshrl.u32 %v397_v17, 16  ;;  %v403_v47 = vld [vmem:[%s4722_s0 + $0x38] sm:$0xf]  ;;  %v404_v50 = vld [vmem:[%s4722_s0 + $0x3c] sm:$0x1] }
  0x37   :  { %3288 = vmatprep.mubr.msk.bf16.mxu1 %vm99_vm1, %v3579_v30  ;;  %v451_v19 = vsel %vm3734_vm4, %v446_v9, %v450_v54  ;;  %v473_v20 = vor.u32 %v472_v12, %v469_v11  ;;  %v484_v27 = vshll.u32 %v397_v17, 16  ;;  %v490_v29 = vshll.u32 %v398_v21, 16  ;;  %v3584_v58 = vld [vmem:[%s4722_s0 + $0x60] ss:$8 sps:$4 sm:$0xff]   ;;  %v3585_v63 = vld [vmem:[%s4722_s0 + $0x70] ss:$8 sps:$4 sm:$0xff]  }
  0x38   :  { %v2896_v24 = vcombine.low %v437_v13, %v451_v19  ;;  %v460_v25 = vrot.slane %v459_v14, 4  ;;  %v495_v30 = vshrl.u32 %v399_v22, 16  ;;  %v498_v31 = vshll.u32 %v399_v22, 16  ;;  %v405_v5 = vld [vmem:[%s4722_s0 + $0x48] sm:$0xf] }
  0x39   :  { %v474_v28 = vrot.slane %v473_v20, 4  ;;  %v504_v36 = vshll.u32 %v400_v23, 16  ;;  %v492_v38 = vrot.slane %v490_v29, 5  ;;  %v512_v51 = vshll.u32 %v401_v42, 16  ;;  %v406_v8 = vld [vmem:[%s4722_s0 + $0x4c] sm:$0x1] }
  0x3a   :  { %v465_v33 = vsel %vm3734_vm4, %v460_v25, %v464_v10  ;;  %v497_v40 = vrot.slane %v495_v30, 4  ;;  %v500_v41 = vrot.slane %v498_v31, 5  ;;  %v518_v52 = vshll.u32 %v402_v46, 16  ;;  %v407_v9 = vld [vmem:[%s4722_s0 + $0x50] sm:$0xf] }
  0x3b   :  { %v479_v37 = vsel %vm3734_vm4, %v474_v28, %v478_v15  ;;  %v523_v53 = vshrl.u32 %v403_v47, 16  ;;  %v526_v56 = vshll.u32 %v403_v47, 16  ;;  %v532_v57 = vshll.u32 %v404_v50, 16  ;;  %v408_v10 = vld [vmem:[%s4722_s0 + $0x54] sm:$0x1] }
  0x3c   :  { %3367 = vmatmul.mubr.msk.bf16.vlgmr.msra.gmra.mrb[0].mxu0 %vm99_vm1, %v3578_v45  ;;  %v2897_v43 = vcombine.low %v465_v33, %v479_v37  ;;  %v506_v45 = vrot.slane %v504_v36, 5  ;;  %v501_v49 = vor.u32 %v500_v41, %v497_v40  ;;  %v514_v60 = vrot.slane %v512_v51, 5  ;;  %v409_v22 = vld [vmem:[%s4722_s0 + $0x58] sm:$0xf]  ;;  %v411_v31 = vld [vmem:[%s4722_s0 + $0x60] sm:$0xf] }
  0x3d   :  { %3383 = vmatpush3.bf16.msra.mxu0 %v1915_v34  ;;  %3370 = vmatprep.mubr.msk.bf16.mxu0 %vm99_vm1, %v3580_v48  ;;  %v483_v34 = vrot.slane %v481_v26, 4  ;;  %v509_v48 = vshrl.u32 %v401_v42, 16  ;;  %v525_v61 = vrot.slane %v523_v53, 4  ;;  %v520_v0 = vrot.slane %v518_v52, 5  ;;  %v3587_v41 = vld [vmem:[%s4719_s1 + $0x8] ss:$8 sps:$4 sm:$0xff]  }
  0x3e   :  { %3289 = vmatmul.mubr.msk.bf16.gmra.mrb[12].mxu1 %vm99_vm1, %v3581_v35  ;;  %v486_v35 = vrot.slane %v484_v27, 5  ;;  %v502_v59 = vrot.slane %v501_v49, 4  ;;  %v528_v2 = vrot.slane %v526_v56, 5  ;;  %v534_v4 = vrot.slane %v532_v57, 5  ;;  %v410_v27 = vld [vmem:[%s4722_s0 + $0x5c] sm:$0x1] }
  0x3f   :  { %3294 = vmatprep.mubr.msk.bf16.mxu1 %vm99_vm1, %v2896_v24  ;;  %v511_v55 = vrot.slane %v509_v48, 4  ;;  %v537_v13 = vshrl.u32 %v405_v5, 16  ;;  %v546_v15 = vshll.u32 %v406_v8, 16  ;;  %v554_v17 = vshll.u32 %v407_v9, 16  ;;  %v3061_v48 = vld [vmem:[%s4718_s4 + $0x10] sm:$0x3] }
  0x40   :  { %v487_v44 = vor.u32 %v486_v35, %v483_v34  ;;  %v507_v6 = vsel %vm3734_vm4, %v502_v59, %v506_v45  ;;  %v529_v12 = vor.u32 %v528_v2, %v525_v61  ;;  %v560_v21 = vshll.u32 %v408_v10, 16  ;;  %v3586_v35 = vld [vmem:[%s4722_s0 + $0x80] ss:$8 sps:$4 sm:$0xff]   ;;  %3557 = vmatprep.subr.msk.bf16.mxu0 %vm124_vm0, %v3061_v48  ;;  %v414_v57 = vld [vmem:[%s4722_s0 + $0x6c] sm:$0x1] }
  0x41   :  { %v515_v7 = vor.u32 %v514_v60, %v511_v55  ;;  %v539_v19 = vrot.slane %v537_v13, 4  ;;  %v548_v24 = vrot.slane %v546_v15, 5  ;;  %v556_v26 = vrot.slane %v554_v17, 5  ;;  %v413_v53 = vld [vmem:[%s4722_s0 + $0x68] sm:$0xf] }
  0x42   :  { %v488_v54 = vrot.slane %v487_v44, 4  ;;  %v562_v30 = vrot.slane %v560_v21, 5  ;;  %v565_v33 = vshrl.u32 %v409_v22, 16  ;;  %v568_v37 = vshll.u32 %v409_v22, 16  ;;  %v418_v15 = vld [vmem:[%s4722_s0 + $0x7c] sm:$0x1] }
  0x43   :  { %v516_v14 = vrot.slane %v515_v7, 4  ;;  %v582_v44 = vshll.u32 %v411_v31, 16  ;;  %v593_v59 = vshrl.u32 %v413_v53, 16  ;;  %vm2756_vm5 = vcmask 1043456  }
  0x44   :  { %3371 = vmatmul.mubr.msk.bf16.gmra.mrb[4].mxu0 %vm99_vm1, %v3582_v18  ;;  %v493_v62 = vsel %vm3734_vm4, %v488_v54, %v492_v38  ;;  %v530_v18 = vrot.slane %v529_v12, 4  ;;  %v574_v38 = vshll.u32 %v410_v27, 16  ;;  %v567_v42 = vrot.slane %v565_v33, 4  ;;  %v3588_v12 = vld [vmem:[%s4719_s1 + $0x18] ss:$8 sps:$4 sm:$0xff]  }
  0x45   :  { %3374 = vmatprep.mubr.msk.bf16.mxu0 %vm99_vm1, %v3583_v32  ;;  %v2898_v11 = vcombine.low %v493_v62, %v507_v6  ;;  %v521_v23 = vsel %vm3734_vm4, %v516_v14, %v520_v0  ;;  %v412_v32 = vld [vmem:[%s4722_s0 + $0x64] sm:$0x1]  ;;  %v570_v46 = vrot.slane %v568_v37, 5  ;;  %v584_v52 = vrot.slane %v582_v44, 5  ;;  %v416_v62 = vld [vmem:[%s4722_s0 + $0x74] sm:$0x1] }
  0x46   :  { %3295 = vmatmul.mubr.msk.bf16.vlgmr.msra.gmra.mrb[0].mxu1 %vm99_vm1, %v2897_v43  ;;  %v535_v28 = vsel %vm3734_vm4, %v530_v18, %v534_v4  ;;  %v579_v43 = vshrl.u32 %v411_v31, 16  ;;  %v588_v47 = vshll.u32 %v412_v32, 16  ;;  %v576_v50 = vrot.slane %v574_v38, 5  ;;  %v417_v14 = vld [vmem:[%s4722_s0 + $0x78] sm:$0xf] }
  0x47   :  { %3311 = vmatpush3.bf16.msra.mxu1 %v897_v16  ;;  %v551_v16 = vshrl.u32 %v407_v9, 16  ;;  %3298 = vmatprep.mubr.msk.bf16.mxu1 %vm99_vm1, %v2898_v11  ;;  %v2899_v34 = vcombine.low %v521_v23, %v535_v28  ;;  %v571_v55 = vor.u32 %v570_v46, %v567_v42  ;;  %v602_v0 = vshll.u32 %v414_v57, 16  ;;  %v3589_v27 = vld [vmem:[%s4719_s1 + $0x28] ss:$8 sps:$4 sm:$0xff]  }
  0x48   :  { %3553 = vmatprep.subr.msk.bf16.mxu1 %vm124_vm0, %v3649_v1  ;;  %v540_v1 = vshll.u32 %v405_v5, 16  ;;  %v581_v51 = vrot.slane %v579_v43, 4  ;;  %v590_v56 = vrot.slane %v588_v47, 5  ;;  %v595_v4 = vrot.slane %v593_v59, 4  ;;  %v3590_v47 = vld [vmem:[%s4719_s1 + $0x38] ss:$8 sps:$4 sm:$0xff]  }
  0x49   :  { %v553_v25 = vrot.slane %v551_v16, 4  ;;  %v572_v2 = vrot.slane %v571_v55, 4  ;;  %v604_v9 = vrot.slane %v602_v0, 5  ;;  %v616_v10 = vshll.u32 %v416_v62, 16  ;;  %v3031_v55 = vld [vmem:[%s4722_s0 + $0x10] sm:$0xf] }
  0x4a   :  { %v542_v20 = vrot.slane %v540_v1, 5  ;;  %v585_v61 = vor.u32 %v584_v52, %v581_v51  ;;  %v621_v21 = vshrl.u32 %v417_v14, 16  ;;  %v2337_v31 = vsel %vm124_vm0, %v3061_v48, 0  ;;  %v3592_v51 = vld [vmem:[%s4719_s1 + $0x50] ss:$8 sps:$4 sm:$0xff]  }
  0x4b   :  { %v557_v36 = vor.u32 %v556_v26, %v553_v25  ;;  %v577_v11 = vsel %vm3734_vm4, %v572_v2, %v576_v50  ;;  %v618_v18 = vrot.slane %v616_v10, 5  ;;  %v630_v25 = vshll.u32 %v418_v15, 16  ;;  %v3594_v57 = vld [vmem:[%s4719_s1 + $0x60] ss:$8 sps:$4 sm:$0xff]  }
  0x4c   :  { %3375 = vmatmul.mubr.msk.bf16.gmra.mrb[8].mxu0 %vm99_vm1, %v3584_v58  ;;  %v543_v29 = vor.u32 %v542_v20, %v539_v19  ;;  %v415_v58 = vld [vmem:[%s4722_s0 + $0x70] sm:$0xf]  ;;  %v586_v7 = vrot.slane %v585_v61, 4  ;;  %v419_v19 = vld [vmem:[%s4722_s0 + $0x80] sm:$0xf]  ;;  %v623_v28 = vrot.slane %v621_v21, 4 }
  0x4d   :  { %3378 = vmatprep.mubr.msk.bf16.mxu0 %vm99_vm1, %v3585_v63  ;;  %v558_v45 = vrot.slane %v557_v36, 4  ;;  %v596_v63 = vshll.u32 %v413_v53, 16  ;;  %v607_v5 = vshrl.u32 %v415_v58, 16  ;;  %v610_v6 = vshll.u32 %v415_v58, 16  ;;  %v420_v20 = vld [vmem:[%s4722_s0 + $0x84] sm:$0x1] }
  0x4e   :  { %v544_v40 = vrot.slane %v543_v29, 4  ;;  %3299 = vmatmul.mubr.msk.bf16.gmra.mrb[4].mxu1 %vm99_vm1, %v2899_v34  ;;  %v591_v16 = vsel %vm3734_vm4, %v586_v7, %v590_v56  ;;  %v635_v29 = vshrl.u32 %v419_v19, 16  ;;  %v644_v34 = vshll.u32 %v420_v20, 16  ;;  %v3029_v53 = vld [vmem:[%s4722_s0 + $0x8] sm:$0xf] }
  0x4f   :  { %v563_v54 = vsel %vm3734_vm4, %v558_v45, %v562_v30  ;;  %v598_v8 = vrot.slane %v596_v63, 5  ;;  %v609_v13 = vrot.slane %v607_v5, 4  ;;  %v612_v1 = vrot.slane %v610_v6, 5  ;;  %v3593_v56 = vld [vmem:[%s4721_s2 + $0x10] ss:$8 sps:$4 sm:$0xff]  }
  0x50   :  { %v549_v49 = vsel %vm3734_vm4, %v544_v40, %v548_v24  ;;  %v2901_v22 = vcombine.low %v577_v11, %v591_v16  ;;  %v624_v24 = vshll.u32 %v417_v14, 16  ;;  %v638_v30 = vshll.u32 %v419_v19, 16  ;;  %v3032_v58 = vld [vmem:[%s4722_s0 + $0x14] sm:$0x1]  ;;  %v3595_v63 = vld [vmem:[%s4721_s2 + $0x20] ss:$8 sps:$4 sm:$0xff]  }
  0x51   :  { %v2900_v60 = vcombine.low %v549_v49, %v563_v54  ;;  %v599_v17 = vor.u32 %v598_v8, %v595_v4  ;;  %v613_v23 = vor.u32 %v612_v1, %v609_v13  ;;  %v637_v36 = vrot.slane %v635_v29, 4  ;;  %v3591_v49 = vld [vmem:[%s4721_s2] ss:$8 sps:$4 sm:$0xff]   ;;  %v3030_v54 = vld [vmem:[%s4722_s0 + $0xc] sm:$0x1] }
  0x52   :  { %v626_v33 = vrot.slane %v624_v24, 5  ;;  %v640_v37 = vrot.slane %v638_v30, 5  ;;  %v646_v44 = vrot.slane %v644_v34, 5  ;;  %v2063_v59 = vshrl.u32 %v3029_v53, 16  ;;  %v3596_v4 = vld [vmem:[%s4719_s1 + $0x70] ss:$8 sps:$4 sm:$0xff]  }
  0x53   :  { %3302 = vmatprep.mubr.msk.bf16.mxu1 %vm99_vm1, %v2900_v60  ;;  %v600_v26 = vrot.slane %v599_v17, 4  ;;  %v614_v32 = vrot.slane %v613_v23, 4  ;;  %v2066_v60 = vshll.u32 %v3029_v53, 16  ;;  %v2072_v61 = vshll.u32 %v3030_v54, 16  ;;  %v3033_v11 = vld [vmem:[%s4722_s0 + $0x18] sm:$0xf] }
  0x54   :  { %3379 = vmatmul.mubr.msk.bf16.gmra.mrb[12].mxu0 %vm99_vm1, %v3586_v35  ;;  %v627_v40 = vor.u32 %v626_v33, %v623_v28  ;;  %v641_v43 = vor.u32 %v640_v37, %v637_v36  ;;  %v2077_v62 = vshrl.u32 %v3031_v55, 16  ;;  %v2080_v0 = vshll.u32 %v3031_v55, 16  ;;  %v3035_v1 = vld [vmem:[%s4722_s0 + $0x20] sm:$0xf]  ;;  %v3036_v14 = vld [vmem:[%s4722_s0 + $0x24] sm:$0x1] }
  0x55   :  { %3384 = vmatprep.mubr.msk.bf16.mxu0 %vm99_vm1, %v3587_v41  ;;  %v605_v35 = vsel %vm3734_vm4, %v600_v26, %v604_v9  ;;  %v619_v38 = vsel %vm3734_vm4, %v614_v32, %v618_v18  ;;  %v632_v41 = vrot.slane %v630_v25, 5  ;;  %v2086_v2 = vshll.u32 %v3032_v58, 16  ;;  %v3597_v28 = vld [vmem:[%s4721_s2 + $0x30] ss:$8 sps:$4 sm:$0xff]   ;;  %v3598_v29 = vld [vmem:[%s4719_s1 + $0x80] ss:$8 sps:$4 sm:$0xff]  }
  0x56   :  { %3303 = vmatmul.mubr.msk.bf16.gmra.mrb[8].mxu1 %vm99_vm1, %v2901_v22  ;;  %v2902_v42 = vcombine.low %v605_v35, %v619_v38  ;;  %v628_v45 = vrot.slane %v627_v40, 4  ;;  %v642_v46 = vrot.slane %v641_v43, 4  ;;  %v2065_v5 = vrot.slane %v2063_v59, 4  ;;  %v3037_v33 = vld [vmem:[%s4722_s0 + $0x28] sm:$0xf] }
  0x57   :  { %v2068_v6 = vrot.slane %v2066_v60, 5  ;;  %v2074_v7 = vrot.slane %v2072_v61, 5  ;;  %v2079_v8 = vrot.slane %v2077_v62, 4  ;;  %v2082_v9 = vrot.slane %v2080_v0, 5  ;;  %v3038_v34 = vld [vmem:[%s4722_s0 + $0x2c] sm:$0x1] }
  0x58   :  { %3306 = vmatprep.mubr.msk.bf16.mxu1 %vm99_vm1, %v2902_v42  ;;  %v633_v48 = vsel %vm3734_vm4, %v628_v45, %v632_v41  ;;  %v647_v50 = vsel %vm3734_vm4, %v642_v46, %v646_v44  ;;  %v2088_v10 = vrot.slane %v2086_v2, 5  ;;  %v2091_v15 = vshrl.u32 %v3033_v11, 16  ;;  %v3599_v35 = vld [vmem:[%s4721_s2 + $0x48] ss:$8 sps:$4 sm:$0xff]   ;;  %v3040_v40 = vld [vmem:[%s4722_s0 + $0x34] sm:$0x1] }
  0x59   :  { %v2903_v52 = vcombine.low %v633_v48, %v647_v50  ;;  %v2069_v13 = vor.u32 %v2068_v6, %v2065_v5  ;;  %v2094_v16 = vshll.u32 %v3033_v11, 16  ;;  %v2083_v17 = vor.u32 %v2082_v9, %v2079_v8  ;;  %v3039_v38 = vld [vmem:[%s4722_s0 + $0x30] sm:$0xf]  ;;  %v3043_v61 = vld [vmem:[%s4722_s0 + $0x40] sm:$0xf] }
  0x5a   :  { %v2105_v19 = vshrl.u32 %v3035_v1, 16  ;;  %v2108_v20 = vshll.u32 %v3035_v1, 16  ;;  %v2093_v22 = vrot.slane %v2091_v15, 4  ;;  %v2114_v24 = vshll.u32 %v3036_v14, 16  ;;  %v3044_v62 = vld [vmem:[%s4722_s0 + $0x44] sm:$0x1] }
  0x5b   :  { %v2070_v21 = vrot.slane %v2069_v13, 4  ;;  %v2096_v23 = vrot.slane %v2094_v16, 5  ;;  %v2084_v25 = vrot.slane %v2083_v17, 4  ;;  %v2119_v41 = vshrl.u32 %v3037_v33, 16 }
  0x5c   :  { %3385 = vmatmul.mubr.msk.bf16.vlgmr.msra.gmra.mrb[0].mxu0 %vm99_vm1, %v3588_v12  ;;  %v3034_v12 = vld [vmem:[%s4722_s0 + $0x1c] sm:$0x1]  ;;  %v2107_v26 = vrot.slane %v2105_v19, 4  ;;  %v2116_v32 = vrot.slane %v2114_v24, 5  ;;  %v2122_v42 = vshll.u32 %v3037_v33, 16  ;;  %v2128_v45 = vshll.u32 %v3038_v34, 16 }
  0x5d   :  { %3401 = vmatpush3.bf16.msra.mxu0 %v2337_v31  ;;  %3388 = vmatprep.mubr.msk.bf16.mxu0 %vm99_vm1, %v3589_v27  ;;  %v2100_v18 = vshll.u32 %v3034_v12, 16  ;;  %v2110_v27 = vrot.slane %v2108_v20, 5  ;;  %v2075_v30 = vsel %vm3734_vm4, %v2070_v21, %v2074_v7  ;;  %v2097_v31 = vor.u32 %v2096_v23, %v2093_v22  ;;  %v3601_v12 = vld [vmem:[%s4721_s2 + $0x68] ss:$8 sps:$4 sm:$0xff]   ;;  %v3046_v22 = vld [vmem:[%s4722_s0 + $0x54] sm:$0x1] }
  0x5e   :  { %3307 = vmatmul.mubr.msk.bf16.gmra.mrb[12].mxu1 %vm99_vm1, %v2903_v52  ;;  %v2089_v36 = vsel %vm3734_vm4, %v2084_v25, %v2088_v10  ;;  %v2133_v46 = vshrl.u32 %v3039_v38, 16  ;;  %v2121_v48 = vrot.slane %v2119_v41, 4  ;;  %v2136_v50 = vshll.u32 %v3039_v38, 16  ;;  %v3600_v10 = vld [vmem:[%s4721_s2 + $0x58] ss:$8 sps:$4 sm:$0xff]  }
  0x5f   :  { %3312 = vmatprep.mubr.msk.bf16.mxu1 %vm99_vm1, %v3591_v49  ;;  %v2111_v37 = vor.u32 %v2110_v27, %v2107_v26  ;;  %v3062_v43 = vcombine.low %v2075_v30, %v2089_v36  ;;  %v2098_v44 = vrot.slane %v2097_v31, 4  ;;  %v2124_v49 = vrot.slane %v2122_v42, 5  ;;  %v3045_v19 = vld [vmem:[%s4722_s0 + $0x50] sm:$0xf]  ;;  %v3047_v23 = vld [vmem:[%s4722_s0 + $0x58] sm:$0xf] }
  0x60   :  { %v2142_v52 = vshll.u32 %v3040_v40, 16  ;;  %v2130_v54 = vrot.slane %v2128_v45, 5  ;;  %v2138_v55 = vrot.slane %v2136_v50, 5  ;;  %v2161_v7 = vshrl.u32 %v3043_v61, 16  ;;  %v3048_v24 = vld [vmem:[%s4722_s0 + $0x5c] sm:$0x1] }
  0x61   :  { %v2125_v53 = vor.u32 %v2124_v49, %v2121_v48  ;;  %v2164_v8 = vshll.u32 %v3043_v61, 16  ;;  %v2170_v9 = vshll.u32 %v3044_v62, 16  ;;  %v2175_v27 = vshrl.u32 %v3045_v19, 16  ;;  %v3049_v36 = vld [vmem:[%s4722_s0 + $0x60] sm:$0xf] }
  0x62   :  { %v2144_v60 = vrot.slane %v2142_v52, 5  ;;  %v2163_v16 = vrot.slane %v2161_v7, 4  ;;  %v2184_v30 = vshll.u32 %v3046_v22, 16  ;;  %v2189_v31 = vshrl.u32 %v3047_v23, 16  ;;  %v3050_v42 = vld [vmem:[%s4722_s0 + $0x64] sm:$0x1] }
  0x63   :  { %v2126_v0 = vrot.slane %v2125_v53, 4  ;;  %v2166_v17 = vrot.slane %v2164_v8, 5  ;;  %v2177_v33 = vrot.slane %v2175_v27, 4  ;;  %v3052_v48 = vld [vmem:[%s4722_s0 + $0x6c] sm:$0x1]  ;;  %v2203_v49 = vshrl.u32 %v3049_v36, 16 }
  0x64   :  { %3389 = vmatmul.mubr.msk.bf16.gmra.mrb[4].mxu0 %vm99_vm1, %v3590_v47  ;;  %v2112_v47 = vrot.slane %v2111_v37, 4  ;;  %v2186_v38 = vrot.slane %v2184_v30, 5  ;;  %v2191_v40 = vrot.slane %v2189_v31, 4  ;;  %v2206_v52 = vshll.u32 %v3049_v36, 16 }
  0x65   :  { %3392 = vmatprep.mubr.msk.bf16.mxu0 %vm99_vm1, %v3592_v51  ;;  %v2135_v51 = vrot.slane %v2133_v46, 4  ;;  %v2131_v13 = vsel %vm3734_vm4, %v2126_v0, %v2130_v54  ;;  %v2167_v26 = vor.u32 %v2166_v17, %v2163_v16  ;;  %v2212_v53 = vshll.u32 %v3050_v42, 16  ;;  %v3603_v54 = vld [vmem:[%s4720_s3 + $0x48] ss:$8 sps:$4 sm:$0xff]  }
  0x66   :  { %3313 = vmatmul.mubr.msk.bf16.vlgmr.msra.gmra.mrb[0].mxu1 %vm99_vm1, %v3593_v56  ;;  %v3041_v56 = vld [vmem:[%s4722_s0 + $0x38] sm:$0xf]  ;;  %v2117_v59 = vsel %vm3734_vm4, %v2112_v47, %v2116_v32  ;;  %v3051_v47 = vld [vmem:[%s4722_s0 + $0x68] sm:$0xf]  ;;  %v2226_v62 = vshll.u32 %v3052_v48, 16  ;;  %vm2762_vm7 = vcmask 1040384  }
  0x67   :  { %3419 = vmatpush3.bf16.msra.mxu1 %v3657_v3  ;;  %3316 = vmatprep.mubr.msk.bf16.mxu1 %vm99_vm1, %v3595_v63  ;;  %v2102_v3 = vrot.slane %v2100_v18, 5  ;;  %v2147_v63 = vshrl.u32 %v3041_v56, 16  ;;  %v2139_v2 = vor.u32 %v2138_v55, %v2135_v51  ;;  %v2172_v18 = vrot.slane %v2170_v9, 5 }
  0x68   :  { %v2168_v32 = vrot.slane %v2167_v26, 4  ;;  %v2214_v61 = vrot.slane %v2212_v53, 5  ;;  %v2228_v9 = vrot.slane %v2226_v62, 5  ;;  %v3607_v62 = vmov 0  }
  0x69   :  { %v2103_v58 = vsel %vm3734_vm4, %v2098_v44, %v2102_v3  ;;  %v2149_v6 = vrot.slane %v2147_v63, 4  ;;  %v2140_v1 = vrot.slane %v2139_v2, 4  ;;  %v2192_v3 = vshll.u32 %v3047_v23, 16  ;;  %v3053_v63 = vld [vmem:[%s4722_s0 + $0x70] sm:$0xf]  ;;  %2507 = vst [vmem:[%s4723_s6] sm:$0xf] %v3607_v62 }
  0x6a   :  { %v3063_v11 = vcombine.low %v2103_v58, %v2117_v59  ;;  %v2173_v44 = vsel %vm3734_vm4, %v2168_v32, %v2172_v18  ;;  %v2220_v58 = vshll.u32 %v3051_v47, 16  ;;  %v3058_v23 = vld [vmem:[%s4722_s0 + $0x84] sm:$0x1]  ;;  %v3060_v32 = vld [vmem:[%s4722_s0 + $0x8c] sm:$0x1] }
  0x6b   :  { %v2145_v20 = vsel %vm3734_vm4, %v2140_v1, %v2144_v60  ;;  %v2194_v41 = vrot.slane %v2192_v3, 5  ;;  %v2208_v60 = vrot.slane %v2206_v52, 5  ;;  %v2234_v1 = vshll.u32 %v3053_v63, 16  ;;  %2513 = vst [vmem:[%s4723_s6 + $0x18] sm:$0xf] %v3607_v62 }
  0x6c   :  { %3393 = vmatmul.mubr.msk.bf16.gmra.mrb[8].mxu0 %vm99_vm1, %v3594_v57  ;;  %v3042_v57 = vld [vmem:[%s4722_s0 + $0x3c] sm:$0x1]  ;;  %v3064_v25 = vcombine.low %v2131_v13, %v2145_v20  ;;  %2514 = vst [vmem:[%s4723_s6 + $0x1c] sm:$0x1] %v3607_v62  ;;  %2508 = vst [vmem:[%s4723_s6 + $0x4] sm:$0x1] %v3607_v62 }
  0x6d   :  { %3396 = vmatprep.mubr.msk.bf16.mxu0 %vm99_vm1, %v3596_v4  ;;  %v2150_v4 = vshll.u32 %v3041_v56, 16  ;;  %v2156_v5 = vshll.u32 %v3042_v57, 16  ;;  %v2195_v51 = vor.u32 %v2194_v41, %v2191_v40  ;;  %v2205_v56 = vrot.slane %v2203_v49, 4  ;;  %2509 = vst [vmem:[%s4723_s6 + $0x8] sm:$0xf] %v3607_v62 }
  0x6e   :  { %3317 = vmatmul.mubr.msk.bf16.gmra.mrb[4].mxu1 %vm99_vm1, %v3597_v28  ;;  %v2178_v28 = vshll.u32 %v3045_v19, 16  ;;  %v2217_v57 = vshrl.u32 %v3051_v47, 16  ;;  %v3057_v19 = vld [vmem:[%s4722_s0 + $0x80] sm:$0xf]  ;;  %2510 = vst [vmem:[%s4723_s6 + $0xc] sm:$0x1] %v3607_v62 }
  0x6f   :  { %3320 = vmatprep.mubr.msk.bf16.mxu1 %vm99_vm1, %v3599_v35  ;;  %v2152_v14 = vrot.slane %v2150_v4, 5  ;;  %v2158_v15 = vrot.slane %v2156_v5, 5  ;;  %v2198_v35 = vshll.u32 %v3048_v24, 16  ;;  %v2196_v59 = vrot.slane %v2195_v51, 4  ;;  %v3054_v5 = vld [vmem:[%s4722_s0 + $0x74] sm:$0x1] }
  0x70   :  { %v2180_v34 = vrot.slane %v2178_v28, 5  ;;  %v2219_v2 = vrot.slane %v2217_v57, 4  ;;  %v2222_v4 = vrot.slane %v2220_v58, 5  ;;  %v2209_v8 = vor.u32 %v2208_v60, %v2205_v56  ;;  %v3059_v28 = vld [vmem:[%s4722_s0 + $0x88] sm:$0xf] }
  0x71   :  { %v2153_v21 = vor.u32 %v2152_v14, %v2149_v6  ;;  %v2200_v46 = vrot.slane %v2198_v35, 5  ;;  %v3055_v6 = vld [vmem:[%s4722_s0 + $0x78] sm:$0xf]  ;;  %v2240_v14 = vshll.u32 %v3054_v5, 16  ;;  %v3605_v35 = vld [vmem:[%s4720_s3 + $0x68] ss:$8 sps:$4 sm:$0xff]  }
  0x72   :  { %v2181_v45 = vor.u32 %v2180_v34, %v2177_v33  ;;  %v2223_v13 = vor.u32 %v2222_v4, %v2219_v2  ;;  %v2245_v17 = vshrl.u32 %v3055_v6, 16  ;;  %v2248_v18 = vshll.u32 %v3055_v6, 16  ;;  %v3606_v57 = vld [vmem:[%s4720_s3 + $0x78] ss:$8 sps:$4 sm:$0xff]   ;;  %2511 = vst [vmem:[%s4723_s6 + $0x10] sm:$0xf] %v3607_v62 }
  0x73   :  { %v2201_v7 = vsel %vm3734_vm4, %v2196_v59, %v2200_v46  ;;  %v2259_v33 = vshrl.u32 %v3057_v19, 16  ;;  %v2273_v42 = vshrl.u32 %v3059_v28, 16  ;;  %v2282_v46 = vshll.u32 %v3060_v32, 16  ;;  %2512 = vst [vmem:[%s4723_s6 + $0x14] sm:$0x1] %v3607_v62 }
  0x74   :  { %3397 = vmatmul.mubr.msk.bf16.gmra.mrb[12].mxu0 %vm99_vm1, %v3598_v29  ;;  %v2154_v29 = vrot.slane %v2153_v21, 4  ;;  %v2182_v55 = vrot.slane %v2181_v45, 4  ;;  %v2224_v20 = vrot.slane %v2223_v13, 4  ;;  %v2236_v21 = vrot.slane %v2234_v1, 5  ;;  %2515 = vst [vmem:[%s4723_s6 + $0x20] sm:$0xf] %v3607_v62 }
  0x75   :  { %3402 = vmatprep.mubr.msk.bf16.mxu0 %vm99_vm1, %v3062_v43  ;;  %v3602_v43 = vld [vmem:[%s4721_s2 + $0x78] ss:$8 sps:$4 sm:$0xff]   ;;  %v2247_v26 = vrot.slane %v2245_v17, 4  ;;  %v2250_v27 = vrot.slane %v2248_v18, 5  ;;  %v2261_v41 = vrot.slane %v2259_v33, 4  ;;  %v2275_v48 = vrot.slane %v2273_v42, 4 }
  0x76   :  { %3321 = vmatmul.mubr.msk.bf16.gmra.mrb[8].mxu1 %vm99_vm1, %v3600_v10  ;;  %v2159_v37 = vsel %vm3734_vm4, %v2154_v29, %v2158_v15  ;;  %v2187_v0 = vsel %vm3734_vm4, %v2182_v55, %v2186_v38  ;;  %v3056_v10 = vld [vmem:[%s4722_s0 + $0x7c] sm:$0x1]  ;;  %v2210_v15 = vrot.slane %v2209_v8, 4  ;;  %v3604_v29 = vld [vmem:[%s4720_s3 + $0x58] ss:$8 sps:$4 sm:$0xff]   ;;  %v2229_v30 = vsel %vm3734_vm4, %v2224_v20, %v2228_v9 }
  0x77   :  { %3324 = vmatprep.mubr.msk.bf16.mxu1 %vm99_vm1, %v3601_v12  ;;  %v3065_v50 = vcombine.low %v2159_v37, %v2173_v44  ;;  %v3066_v12 = vcombine.low %v2187_v0, %v2201_v7  ;;  %v2254_v22 = vshll.u32 %v3056_v10, 16  ;;  %v2251_v36 = vor.u32 %v2250_v27, %v2247_v26  ;;  %2516 = vst [vmem:[%s4723_s6 + $0x24] sm:$0x1] %v3607_v62  ;;  %v4430_v9 = vld [vmem:[%s4724_s5] ss:$0 sm:$0xff] }
  0x78   :  { %v2215_v24 = vsel %vm3734_vm4, %v2210_v15, %v2214_v61  ;;  %v2262_v37 = vshll.u32 %v3057_v19, 16  ;;  %v2268_v38 = vshll.u32 %v3058_v23, 16  ;;  %v2284_v55 = vrot.slane %v2282_v46, 5  ;;  %2517 = vst [vmem:[%s4723_s6 + $0x28] sm:$0xf] %v3607_v62 }
  0x79   :  { %v2256_v3 = vrot.slane %v2254_v22, 5  ;;  %v3067_v34 = vcombine.low %v2215_v24, %v2229_v30  ;;  %v2252_v44 = vrot.slane %v2251_v36, 4  ;;  %2518 = vst [vmem:[%s4723_s6 + $0x2c] sm:$0x1] %v3607_v62  ;;  %2519 = vst [vmem:[%s4723_s6 + $0x30] sm:$0xf] %v3607_v62 }
  0x7a   :  { %v2264_v45 = vrot.slane %v2262_v37, 5  ;;  %v2270_v52 = vrot.slane %v2268_v38, 5  ;;  %2520 = vst [vmem:[%s4723_s6 + $0x34] sm:$0x1] %v3607_v62  ;;  %2521 = vst [vmem:[%s4723_s6 + $0x38] sm:$0xf] %v3607_v62 }
  0x7b   :  { %2522 = vst [vmem:[%s4723_s6 + $0x3c] sm:$0x1] %v3607_v62  ;;  %2523 = vst [vmem:[%s4723_s6 + $0x40] sm:$0xf] %v3607_v62  ;;  %vm2757_vm6 = vsmask.f32 7938 }
  0x7c   :  { %3403 = vmatmul.mubr.msk.bf16.vlgmr.msra.gmra.mrb[0].mxu0 %vm99_vm1, %v3063_v11  ;;  %v2231_v11 = vshrl.u32 %v3053_v63, 16  ;;  %v2265_v51 = vor.u32 %v2264_v45, %v2261_v41  ;;  %2524 = vst [vmem:[%s4723_s6 + $0x44] sm:$0x1] %v3607_v62  ;;  %2525 = vst [vmem:[%s4723_s6 + $0x48] sm:$0xf] %v3607_v62 }
  0x7d   :  { %3406 = vmatprep.mubr.msk.bf16.mxu0 %vm99_vm1, %v3064_v25  ;;  %v2242_v25 = vrot.slane %v2240_v14, 5  ;;  %2526 = vst [vmem:[%s4723_s6 + $0x4c] sm:$0x1] %v3607_v62  ;;  %2527 = vst [vmem:[%s4723_s6 + $0x50] sm:$0xf] %v3607_v62 }
  0x7e   :  { %3325 = vmatmul.mubr.msk.bf16.gmra.mrb[12].mxu1 %vm99_vm1, %v3602_v43  ;;  %v2233_v16 = vrot.slane %v2231_v11, 4  ;;  %v2276_v43 = vshll.u32 %v3059_v28, 16  ;;  %v2266_v56 = vrot.slane %v2265_v51, 4  ;;  %2528 = vst [vmem:[%s4723_s6 + $0x54] sm:$0x1] %v3607_v62  ;;  %vm4444_vm9 = vmand %vm2756_vm5, %vm2757_vm6 }
  0x7f   :  { %3338 = vmatprep.mubr.msk.bf16.mxu1 %vm99_vm1, %v3603_v54  ;;  %2529 = vst [vmem:[%s4723_s6 + $0x58] sm:$0xf] %v3607_v62  ;;  %2530 = vst [vmem:[%s4723_s6 + $0x5c] sm:$0x1] %v3607_v62  ;;  %vm2763_vm8 = vsmask.f32 256 }
  0x80   :  { %v2237_v31 = vor.u32 %v2236_v21, %v2233_v16  ;;  %v2278_v49 = vrot.slane %v2276_v43, 5  ;;  %v2271_v59 = vsel %vm3734_vm4, %v2266_v56, %v2270_v52  ;;  %2531 = vst [vmem:[%s4723_s6 + $0x60] sm:$0xf] %v3607_v62  ;;  %2532 = vst [vmem:[%s4723_s6 + $0x64] sm:$0x1] %v3607_v62 }
  0x81   :  { %2533 = vst [vmem:[%s4723_s6 + $0x68] sm:$0xf] %v3607_v62  ;;  %2534 = vst [vmem:[%s4723_s6 + $0x6c] sm:$0x1] %v3607_v62  ;;  %v3105_v32 = vld [vmem:[%s4723_s6 + $0x1c] sm:$0x1] }
  0x82   :  { %v2238_v40 = vrot.slane %v2237_v31, 4  ;;  %v2279_v54 = vor.u32 %v2278_v49, %v2275_v48  ;;  %2535 = vst [vmem:[%s4723_s6 + $0x70] sm:$0xf] %v3607_v62  ;;  %2536 = vst [vmem:[%s4723_s6 + $0x74] sm:$0x1] %v3607_v62 }
  0x83   :  { %2537 = vst [vmem:[%s4723_s6 + $0x78] sm:$0xf] %v3607_v62  ;;  %2538 = vst [vmem:[%s4723_s6 + $0x7c] sm:$0x1] %v3607_v62  ;;  %v3095_v41 = vld [vmem:[%s4723_s6 + $0x8] sm:$0xf] }
  0x84   :  { %3407 = vmatmul.mubr.msk.bf16.gmra.mrb[4].mxu0 %vm99_vm1, %v3065_v50  ;;  %v2243_v47 = vsel %vm3734_vm4, %v2238_v40, %v2242_v25  ;;  %v2257_v50 = vsel %vm3734_vm4, %v2252_v44, %v2256_v3  ;;  %v2280_v58 = vrot.slane %v2279_v54, 4  ;;  %2539 = vst [vmem:[%s4723_s6 + $0x80] sm:$0xf] %v3607_v62  ;;  %2540 = vst [vmem:[%s4723_s6 + $0x84] sm:$0x1] %v3607_v62 }
  0x85   :  { %3410 = vmatprep.mubr.msk.bf16.mxu0 %vm99_vm1, %v3066_v12  ;;  %v3068_v53 = vcombine.low %v2243_v47, %v2257_v50  ;;  %2541 = vst [vmem:[%s4723_s6 + $0x88] sm:$0xf] %v3607_v62  ;;  %2542 = vst [vmem:[%s4723_s6 + $0x8c] sm:$0x1] %v3607_v62  ;;  %v3103_v3 = vld [vmem:[%s4723_s6 + $0x18] sm:$0xf] }
  0x86   :  { %3339 = vmatmul.mubr.msk.bf16.vlgmr.msra.gmra.mrb[8].mxu1 %vm99_vm1, %v3604_v29  ;;  %v2285_v60 = vsel %vm3734_vm4, %v2280_v58, %v2284_v55  ;;  %2543 = vst [vmem:[%s4723_s6 + $0x90] sm:$0xf] %v3607_v62  ;;  %2544 = vst [vmem:[%s4723_s6 + $0x94] sm:$0x1] %v3607_v62  ;;  %v3097_v48 = vld [vmem:[%s4723_s6 + $0xc] sm:$0x1] }
  0x87   :  { %3342 = vmatprep.mubr.msk.bf16.mxu1 %vm99_vm1, %v3605_v35  ;;  %v3069_v61 = vcombine.low %v2271_v59, %v2285_v60  ;;  %2545 = vst [vmem:[%s4723_s6 + $0x98] sm:$0xf] %v3607_v62  ;;  %2546 = vst [vmem:[%s4723_s6 + $0x9c] sm:$0x1] %v3607_v62  ;;  %v3107_v55 = vld [vmem:[%s4723_s6 + $0x20] sm:$0xf] }
  0x88   :  { %vm4454_vm10 = vmand %vm2762_vm7, %vm2763_vm8  ;;  %v3109_v59 = vld [vmem:[%s4723_s6 + $0x24] sm:$0x1] }
  0x8c   :  { %3411 = vmatmul.mubr.msk.bf16.gmra.mrb[8].mxu0 %vm99_vm1, %v3067_v34 }
  0x8d   :  { %3414 = vmatprep.mubr.msk.bf16.mxu0 %vm99_vm1, %v3068_v53 }
  0x8e   :  { %3343 = vmatmul.mubr.msk.bf16.gmra.mrb[12].mxu1 %vm99_vm1, %v3606_v57 }
  0x94   :  { %3415 = vmatmul.mubr.msk.bf16.gmra.mrb[12].mxu0 %vm99_vm1, %v3069_v61 }
 0x139   :  { %v3314_v39 = vpop.f32.mrb[0].mxu1 }
 0x13a   :  { %v933_v63 = vpop.f32.mrb[1].mxu1 }
 0x13b   :  { %v3315_v0 = vpop.f32.mrb[2].mxu1 }
 0x13c   :  { %v936_v2 = vpop.f32.mrb[3].mxu1 }
 0x141   :  { %v3318_v4 = vpop.f32.mrb[4].mxu1 }
 0x142   :  { %v949_v5 = vpop.f32.mrb[5].mxu1 }
 0x143   :  { %v4423_v6 = vpop.f32.mrb[6].mxu1 }
 0x144   :  { %v4425_v7 = vpop.f32.mrb[7].mxu1 }
 0x14f   :  { %v3404_v8 = vpop.f32.mrb[0].mxu0 }
 0x150   :  { %v3420_v10 = vadd.f32 %v3404_v8, %v3314_v39  ;;  %v2373_v11 = vpop.f32.mrb[1].mxu0 }
 0x151   :  { %v3421_v12 = vadd.f32 %v2373_v11, %v933_v63  ;;  %v3405_v13 = vpop.f32.mrb[2].mxu0 }
 0x152   :  { %v2461_v1 = vadd.f32 %v3420_v10, %v4430_v9  ;;  %v3422_v14 = vadd.f32 %v3405_v13, %v3315_v0  ;;  %v2376_v15 = vpop.f32.mrb[3].mxu0 }
 0x153   :  { %v2459_v16 = vadd.f32 %v3421_v12, %v4430_v9  ;;  %v3423_v17 = vadd.f32 %v2376_v15, %v936_v2  ;;  %v3099_v2 = vld [vmem:[%s4723_s6 + $0x10] sm:$0xf] }
 0x154   :  { %v2477_v18 = vmax.f32 %v2461_v1, 0.0  ;;  %v2462_v19 = vadd.f32 %v3422_v14, %v4430_v9 }
 0x155   :  { %v2475_v20 = vmax.f32 %v2459_v16, 0.0  ;;  %v2460_v21 = vadd.f32 %v3423_v17, %v4430_v9 }
 0x156   :  { %v3161_v22 = vpack.c.bf16 %v2477_v18, %v2477_v18  ;;  %v2478_v23 = vmax.f32 %v2462_v19, 0.0 }
 0x157   :  { %v3159_v24 = vpack.c.bf16 %v2475_v20, %v2475_v20  ;;  %v2476_v25 = vmax.f32 %v2460_v21, 0.0  ;;  %v3408_v26 = vpop.f32.mrb[4].mxu0 }
 0x158   :  { %v2612_v27 = vshrl.u32 %v3161_v22, 16  ;;  %v2615_v28 = vshll.u32 %v3161_v22, 16  ;;  %v3162_v29 = vpack.c.bf16 %v2478_v23, %v2478_v23  ;;  %v3424_v30 = vadd.f32 %v3408_v26, %v3318_v4  ;;  %v2389_v31 = vpop.f32.mrb[5].mxu0  ;;  %v3101_v4 = vld [vmem:[%s4723_s6 + $0x14] sm:$0x1] }
 0x159   :  { %v2596_v33 = vshrl.u32 %v3159_v24, 16  ;;  %v2599_v34 = vshll.u32 %v3159_v24, 16  ;;  %v3160_v35 = vpack.c.bf16 %v2476_v25, %v2476_v25  ;;  %v3425_v36 = vadd.f32 %v2389_v31, %v949_v5  ;;  %v3409_v37 = vpop.f32.mrb[6].mxu0  ;;  %v3340_v12 = vpop.f32.mrb[8].mxu1 }
 0x15a   :  { %v2614_v38 = vrot.slane %v2612_v27, 7  ;;  %v2620_v42 = vshrl.u32 %v3162_v29, 16  ;;  %v2623_v43 = vshll.u32 %v3162_v29, 16  ;;  %v2465_v44 = vadd.f32 %v3424_v30, %v4430_v9  ;;  %v2392_v45 = vpop.f32.mrb[7].mxu0  ;;  %v1163_v17 = vpop.f32.mrb[9].mxu1 }
 0x15b   :  { %v2598_v47 = vrot.slane %v2596_v33, 7  ;;  %v2604_v49 = vshrl.u32 %v3160_v35, 16  ;;  %v2607_v50 = vshll.u32 %v3160_v35, 16  ;;  %v2463_v51 = vadd.f32 %v3425_v36, %v4430_v9  ;;  %v3341_v23 = vpop.f32.mrb[10].mxu1  ;;  %v3119_v33 = vld [vmem:[%s4723_s6 + $0x38] sm:$0xf] }
 0x15c   :  { %v2617_v52 = vor.u32 %v2615_v28, %v2614_v38  ;;  %v2618_v53 = vrot.slane %v2614_v38, 4  ;;  %v2622_v54 = vrot.slane %v2620_v42, 7  ;;  %v2481_v56 = vmax.f32 %v2465_v44, 0.0  ;;  %v1166_v29 = vpop.f32.mrb[11].mxu1  ;;  %v3111_v38 = vld [vmem:[%s4723_s6 + $0x28] sm:$0xf] }
 0x15d   :  { %v2601_v57 = vor.u32 %v2599_v34, %v2598_v47  ;;  %v2602_v58 = vrot.slane %v2598_v47, 4  ;;  %v2606_v60 = vrot.slane %v2604_v49, 7  ;;  %v2479_v61 = vmax.f32 %v2463_v51, 0.0  ;;  %v3121_v34 = vld [vmem:[%s4723_s6 + $0x3c] sm:$0x1] }
 0x15e   :  { %v2775_v62 = vsel %vm4444_vm9, %v2617_v52, %v3103_v3  ;;  %v2778_v39 = vsel %vm4454_vm10, %v2618_v53, %v3105_v32  ;;  %v2625_v63 = vor.u32 %v2623_v43, %v2622_v54  ;;  %v2626_v0 = vrot.slane %v2622_v54, 4 }
 0x15f   :  { %3104 = vst [vmem:[%s4723_s6 + $0x18] sm:$0xf] %v2775_v62  ;;  %3106 = vst [vmem:[%s4723_s6 + $0x1c] sm:$0x1] %v2778_v39  ;;  %v2760_v5 = vsel %vm4444_vm9, %v2601_v57, %v3095_v41  ;;  %v2766_v8 = vsel %vm4454_vm10, %v2602_v58, %v3097_v48  ;;  %v2609_v10 = vor.u32 %v2607_v50, %v2606_v60  ;;  %v2610_v11 = vrot.slane %v2606_v60, 4  ;;  %v3412_v13 = vpop.f32.mrb[8].mxu0 }
 0x160   :  { %3096 = vst [vmem:[%s4723_s6 + $0x8] sm:$0xf] %v2760_v5  ;;  %3098 = vst [vmem:[%s4723_s6 + $0xc] sm:$0x1] %v2766_v8  ;;  %v2781_v1 = vsel %vm4444_vm9, %v2625_v63, %v3107_v55  ;;  %v2784_v14 = vsel %vm4454_vm10, %v2626_v0, %v3109_v59  ;;  %v3165_v15 = vpack.c.bf16 %v2481_v56, %v2481_v56  ;;  %v2405_v18 = vpop.f32.mrb[9].mxu0 }
 0x161   :  { %v3163_v16 = vpack.c.bf16 %v2479_v61, %v2479_v61  ;;  %3108 = vst [vmem:[%s4723_s6 + $0x20] sm:$0xf] %v2781_v1  ;;  %3110 = vst [vmem:[%s4723_s6 + $0x24] sm:$0x1] %v2784_v14  ;;  %v2769_v19 = vsel %vm4444_vm9, %v2609_v10, %v3099_v2  ;;  %v2772_v20 = vsel %vm4454_vm10, %v2610_v11, %v3101_v4  ;;  %v3413_v24 = vpop.f32.mrb[10].mxu0  ;;  %v3344_v55 = vpop.f32.mrb[12].mxu1 }
 0x162   :  { %v3426_v21 = vadd.f32 %v3409_v37, %v4423_v6  ;;  %v3427_v22 = vadd.f32 %v2392_v45, %v4425_v7  ;;  %3100 = vst [vmem:[%s4723_s6 + $0x10] sm:$0xf] %v2769_v19  ;;  %3102 = vst [vmem:[%s4723_s6 + $0x14] sm:$0x1] %v2772_v20  ;;  %v2644_v25 = vshrl.u32 %v3165_v15, 16  ;;  %v2647_v26 = vshll.u32 %v3165_v15, 16 }
 0x163   :  { %v2628_v27 = vshrl.u32 %v3163_v16, 16  ;;  %v2631_v28 = vshll.u32 %v3163_v16, 16  ;;  %v2408_v30 = vpop.f32.mrb[11].mxu0  ;;  %v3428_v31 = vadd.f32 %v3412_v13, %v3340_v12  ;;  %v3429_v3 = vadd.f32 %v2405_v18, %v1163_v17  ;;  %v3113_v41 = vld [vmem:[%s4723_s6 + $0x2c] sm:$0x1]  ;;  %v1179_v61 = vpop.f32.mrb[13].mxu1 }
 0x164   :  { %v2466_v6 = vadd.f32 %v3426_v21, %v4430_v9  ;;  %v2464_v7 = vadd.f32 %v3427_v22, %v4430_v9  ;;  %v2646_v32 = vrot.slane %v2644_v25, 7  ;;  %v3430_v36 = vadd.f32 %v3413_v24, %v3341_v23  ;;  %v3345_v4 = vpop.f32.mrb[14].mxu1  ;;  %v3123_v5 = vld [vmem:[%s4723_s6 + $0x40] sm:$0xf]  ;;  %v3125_v8 = vld [vmem:[%s4723_s6 + $0x44] sm:$0x1] }
 0x165   :  { %v2630_v35 = vrot.slane %v2628_v27, 7  ;;  %v3431_v37 = vadd.f32 %v2408_v30, %v1166_v29  ;;  %v2469_v44 = vadd.f32 %v3428_v31, %v4430_v9  ;;  %v2467_v45 = vadd.f32 %v3429_v3, %v4430_v9  ;;  %v1182_v14 = vpop.f32.mrb[15].mxu1  ;;  %v3115_v17 = vld [vmem:[%s4723_s6 + $0x30] sm:$0xf]  ;;  %v3117_v21 = vld [vmem:[%s4723_s6 + $0x34] sm:$0x1] }
 0x166   :  { %v2482_v42 = vmax.f32 %v2466_v6, 0.0  ;;  %v2480_v43 = vmax.f32 %v2464_v7, 0.0  ;;  %v2649_v47 = vor.u32 %v2647_v26, %v2646_v32  ;;  %v2650_v48 = vrot.slane %v2646_v32, 4  ;;  %v3135_v6 = vld [vmem:[%s4723_s6 + $0x68] sm:$0xf] }
 0x167   :  { %v2633_v49 = vor.u32 %v2631_v28, %v2630_v35  ;;  %v2634_v50 = vrot.slane %v2630_v35, 4  ;;  %v2485_v53 = vmax.f32 %v2469_v44, 0.0  ;;  %v2483_v54 = vmax.f32 %v2467_v45, 0.0  ;;  %v3416_v60 = vpop.f32.mrb[12].mxu0 }
 0x168   :  { %v3166_v51 = vpack.c.bf16 %v2482_v42, %v2482_v42  ;;  %v3164_v52 = vpack.c.bf16 %v2480_v43, %v2480_v43  ;;  %v2799_v56 = vsel %vm4444_vm9, %v2649_v47, %v3119_v33  ;;  %v2802_v57 = vsel %vm4454_vm10, %v2650_v48, %v3121_v34  ;;  %v2421_v2 = vpop.f32.mrb[13].mxu0 }
 0x169   :  { %v2787_v58 = vsel %vm4444_vm9, %v2633_v49, %v3111_v38  ;;  %v2790_v59 = vsel %vm4454_vm10, %v2634_v50, %v3113_v41  ;;  %3120 = vst [vmem:[%s4723_s6 + $0x38] sm:$0xf] %v2799_v56  ;;  %3122 = vst [vmem:[%s4723_s6 + $0x3c] sm:$0x1] %v2802_v57  ;;  %v3169_v10 = vpack.c.bf16 %v2485_v53, %v2485_v53  ;;  %v3417_v1 = vpop.f32.mrb[14].mxu0 }
 0x16a   :  { %3112 = vst [vmem:[%s4723_s6 + $0x28] sm:$0xf] %v2787_v58  ;;  %3114 = vst [vmem:[%s4723_s6 + $0x2c] sm:$0x1] %v2790_v59  ;;  %v2652_v62 = vshrl.u32 %v3166_v51, 16  ;;  %v2655_v39 = vshll.u32 %v3166_v51, 16  ;;  %v3167_v11 = vpack.c.bf16 %v2483_v54, %v2483_v54  ;;  %v2470_v12 = vadd.f32 %v3430_v36, %v4430_v9 }
 0x16b   :  { %v2636_v63 = vshrl.u32 %v3164_v52, 16  ;;  %v2639_v0 = vshll.u32 %v3164_v52, 16  ;;  %v2468_v13 = vadd.f32 %v3431_v37, %v4430_v9  ;;  %v3432_v18 = vadd.f32 %v3416_v60, %v3344_v55  ;;  %v2424_v20 = vpop.f32.mrb[15].mxu0  ;;  %v3137_v36 = vld [vmem:[%s4723_s6 + $0x6c] sm:$0x1] }
 0x16c   :  { %v2654_v15 = vrot.slane %v2652_v62, 7  ;;  %v3433_v19 = vadd.f32 %v2421_v2, %v1179_v61  ;;  %v2676_v22 = vshrl.u32 %v3169_v10, 16  ;;  %v2679_v23 = vshll.u32 %v3169_v10, 16  ;;  %v3127_v37 = vld [vmem:[%s4723_s6 + $0x58] sm:$0xf] }
 0x16d   :  { %v2638_v16 = vrot.slane %v2636_v63, 7  ;;  %v2660_v24 = vshrl.u32 %v3167_v11, 16  ;;  %v2663_v25 = vshll.u32 %v3167_v11, 16  ;;  %v2486_v31 = vmax.f32 %v2470_v12, 0.0  ;;  %v3129_v38 = vld [vmem:[%s4723_s6 + $0x5c] sm:$0x1] }
 0x16e   :  { %v2657_v26 = vor.u32 %v2655_v39, %v2654_v15  ;;  %v2658_v27 = vrot.slane %v2654_v15, 4  ;;  %v2678_v30 = vrot.slane %v2676_v22, 7  ;;  %v2484_v3 = vmax.f32 %v2468_v13, 0.0  ;;  %v3139_v62 = vld [vmem:[%s4723_s6 + $0x70] sm:$0xf] }
 0x16f   :  { %v2641_v28 = vor.u32 %v2639_v0, %v2638_v16  ;;  %v2642_v29 = vrot.slane %v2638_v16, 4  ;;  %v2662_v7 = vrot.slane %v2660_v24, 7  ;;  %v3170_v45 = vpack.c.bf16 %v2486_v31, %v2486_v31  ;;  %v3141_v0 = vld [vmem:[%s4723_s6 + $0x74] sm:$0x1]  ;;  %v3131_v2 = vld [vmem:[%s4723_s6 + $0x60] sm:$0xf] }
 0x170   :  { %v2805_v32 = vsel %vm4444_vm9, %v2657_v26, %v3123_v5  ;;  %v2808_v33 = vsel %vm4454_vm10, %v2658_v27, %v3125_v8  ;;  %v2681_v41 = vor.u32 %v2679_v23, %v2678_v30  ;;  %v2682_v42 = vrot.slane %v2678_v30, 4  ;;  %v3151_v23 = vld [vmem:[%s4723_s6 + $0x88] sm:$0xf]  ;;  %v3153_v27 = vld [vmem:[%s4723_s6 + $0x8c] sm:$0x1] }
 0x171   :  { %v2793_v34 = vsel %vm4444_vm9, %v2641_v28, %v3115_v17  ;;  %v2796_v35 = vsel %vm4454_vm10, %v2642_v29, %v3117_v21  ;;  %3124 = vst [vmem:[%s4723_s6 + $0x40] sm:$0xf] %v2805_v32  ;;  %3126 = vst [vmem:[%s4723_s6 + $0x44] sm:$0x1] %v2808_v33  ;;  %v2665_v43 = vor.u32 %v2663_v25, %v2662_v7  ;;  %v2666_v44 = vrot.slane %v2662_v7, 4 }
 0x172   :  { %3116 = vst [vmem:[%s4723_s6 + $0x30] sm:$0xf] %v2793_v34  ;;  %3118 = vst [vmem:[%s4723_s6 + $0x34] sm:$0x1] %v2796_v35  ;;  %v3168_v47 = vpack.c.bf16 %v2484_v3, %v2484_v3  ;;  %v2473_v48 = vadd.f32 %v3432_v18, %v4430_v9  ;;  %v2471_v49 = vadd.f32 %v3433_v19, %v4430_v9  ;;  %v2684_v54 = vshrl.u32 %v3170_v45, 16 }
 0x173   :  { %v2823_v50 = vsel %vm4444_vm9, %v2681_v41, %v3135_v6  ;;  %v2826_v51 = vsel %vm4454_vm10, %v2682_v42, %v3137_v36  ;;  %v2811_v52 = vsel %vm4444_vm9, %v2665_v43, %v3127_v37  ;;  %v2814_v53 = vsel %vm4454_vm10, %v2666_v44, %v3129_v38  ;;  %v3143_v28 = vld [vmem:[%s4723_s6 + $0x78] sm:$0xf]  ;;  %v3145_v29 = vld [vmem:[%s4723_s6 + $0x7c] sm:$0x1]  ;;  %v3155_v43 = vld [vmem:[%s4723_s6 + $0x90] sm:$0xf] }
 0x174   :  { %3136 = vst [vmem:[%s4723_s6 + $0x68] sm:$0xf] %v2823_v50  ;;  %3138 = vst [vmem:[%s4723_s6 + $0x6c] sm:$0x1] %v2826_v51  ;;  %v2668_v55 = vshrl.u32 %v3168_v47, 16  ;;  %v2489_v56 = vmax.f32 %v2473_v48, 0.0  ;;  %v3434_v58 = vadd.f32 %v3417_v1, %v3345_v4  ;;  %v3435_v59 = vadd.f32 %v2424_v20, %v1182_v14 }
 0x175   :  { %3128 = vst [vmem:[%s4723_s6 + $0x58] sm:$0xf] %v2811_v52  ;;  %3130 = vst [vmem:[%s4723_s6 + $0x5c] sm:$0x1] %v2814_v53  ;;  %v2487_v57 = vmax.f32 %v2471_v49, 0.0  ;;  %v2686_v60 = vrot.slane %v2684_v54, 7 }
 0x176   :  { %v2687_v61 = vshll.u32 %v3170_v45, 16  ;;  %v2670_v39 = vrot.slane %v2668_v55, 7  ;;  %v2671_v63 = vshll.u32 %v3168_v47, 16  ;;  %v3133_v4 = vld [vmem:[%s4723_s6 + $0x64] sm:$0x1]  ;;  %v3173_v5 = vpack.c.bf16 %v2489_v56, %v2489_v56 }
 0x177   :  { %v3171_v8 = vpack.c.bf16 %v2487_v57, %v2487_v57  ;;  %v2474_v10 = vadd.f32 %v3434_v58, %v4430_v9  ;;  %v2472_v11 = vadd.f32 %v3435_v59, %v4430_v9  ;;  %v2690_v13 = vrot.slane %v2686_v60, 4  ;;  %v3157_v47 = vld [vmem:[%s4723_s6 + $0x94] sm:$0x1]  ;;  %v3147_v48 = vld [vmem:[%s4723_s6 + $0x80] sm:$0xf] }
 0x178   :  { %v2689_v12 = vor.u32 %v2687_v61, %v2686_v60  ;;  %v2673_v1 = vor.u32 %v2671_v63, %v2670_v39  ;;  %v2674_v14 = vrot.slane %v2670_v39, 4  ;;  %v2708_v15 = vshrl.u32 %v3173_v5, 16  ;;  %v3149_v49 = vld [vmem:[%s4723_s6 + $0x84] sm:$0x1] }
 0x179   :  { %v2711_v16 = vshll.u32 %v3173_v5, 16  ;;  %v2692_v17 = vshrl.u32 %v3171_v8, 16  ;;  %v2695_v18 = vshll.u32 %v3171_v8, 16  ;;  %v2832_v20 = vsel %vm4454_vm10, %v2690_v13, %v3141_v0 }
 0x17a   :  { %v2829_v19 = vsel %vm4444_vm9, %v2689_v12, %v3139_v62  ;;  %v2817_v21 = vsel %vm4444_vm9, %v2673_v1, %v3131_v2  ;;  %v2820_v9 = vsel %vm4454_vm10, %v2674_v14, %v3133_v4  ;;  %3142 = vst [vmem:[%s4723_s6 + $0x74] sm:$0x1] %v2832_v20  ;;  %v2710_v22 = vrot.slane %v2708_v15, 7 }
 0x17b   :  { %3140 = vst [vmem:[%s4723_s6 + $0x70] sm:$0xf] %v2829_v19  ;;  %3132 = vst [vmem:[%s4723_s6 + $0x60] sm:$0xf] %v2817_v21  ;;  %v2694_v24 = vrot.slane %v2692_v17, 7  ;;  %v2490_v25 = vmax.f32 %v2474_v10, 0.0 }
 0x17c   :  { %3134 = vst [vmem:[%s4723_s6 + $0x64] sm:$0x1] %v2820_v9  ;;  %v2488_v26 = vmax.f32 %v2472_v11, 0.0  ;;  %v2713_v30 = vor.u32 %v2711_v16, %v2710_v22  ;;  %v2714_v6 = vrot.slane %v2710_v22, 4 }
 0x17d   :  { %v2697_v7 = vor.u32 %v2695_v18, %v2694_v24  ;;  %v2698_v31 = vrot.slane %v2694_v24, 4  ;;  %v3174_v3 = vpack.c.bf16 %v2490_v25, %v2490_v25 }
 0x17e   :  { %v3172_v32 = vpack.c.bf16 %v2488_v26, %v2488_v26  ;;  %v2847_v33 = vsel %vm4444_vm9, %v2713_v30, %v3151_v23  ;;  %v2850_v34 = vsel %vm4454_vm10, %v2714_v6, %v3153_v27 }
 0x17f   :  { %v2835_v35 = vsel %vm4444_vm9, %v2697_v7, %v3143_v28  ;;  %v2838_v36 = vsel %vm4454_vm10, %v2698_v31, %v3145_v29  ;;  %3152 = vst [vmem:[%s4723_s6 + $0x88] sm:$0xf] %v2847_v33  ;;  %3154 = vst [vmem:[%s4723_s6 + $0x8c] sm:$0x1] %v2850_v34  ;;  %v2716_v37 = vshrl.u32 %v3174_v3, 16  ;;  %v2719_v42 = vshll.u32 %v3174_v3, 16 }
 0x180   :  { %3144 = vst [vmem:[%s4723_s6 + $0x78] sm:$0xf] %v2835_v35  ;;  %3146 = vst [vmem:[%s4723_s6 + $0x7c] sm:$0x1] %v2838_v36  ;;  %v2700_v38 = vshrl.u32 %v3172_v32, 16  ;;  %v2703_v45 = vshll.u32 %v3172_v32, 16 }
 0x181   :  { %v2718_v41 = vrot.slane %v2716_v37, 7 }
 0x182   :  { %v2702_v44 = vrot.slane %v2700_v38, 7 }
 0x183   :  { %v2721_v50 = vor.u32 %v2719_v42, %v2718_v41  ;;  %v2722_v51 = vrot.slane %v2718_v41, 4 }
 0x184   :  { %v2705_v52 = vor.u32 %v2703_v45, %v2702_v44  ;;  %v2706_v53 = vrot.slane %v2702_v44, 4 }
 0x185   :  { %v2853_v54 = vsel %vm4444_vm9, %v2721_v50, %v3155_v43  ;;  %v2856_v55 = vsel %vm4454_vm10, %v2722_v51, %v3157_v47 }
 0x186   :  { %v2841_v56 = vsel %vm4444_vm9, %v2705_v52, %v3147_v48  ;;  %v2844_v57 = vsel %vm4454_vm10, %v2706_v53, %v3149_v49  ;;  %3156 = vst [vmem:[%s4723_s6 + $0x90] sm:$0xf] %v2853_v54  ;;  %3158 = vst [vmem:[%s4723_s6 + $0x94] sm:$0x1] %v2856_v55 }
 0x187   :  { %3148 = vst [vmem:[%s4723_s6 + $0x80] sm:$0xf] %v2841_v56  ;;  %3150 = vst [vmem:[%s4723_s6 + $0x84] sm:$0x1] %v2844_v57 }

// kernel: res_block_forward.3
= control target key start
LH: loop header
LB: loop body
LE: loop exit
PB: predicated region body
PF: predicated region fallthrough
CT: control target
= control target key end

     0   :  { %vm735_vm0 = vcmask 1042432   ;;  %vm736_vm1 = vcmask 1046532   ;;  %vm73_vm2 = vsmask.f32 3328  ;;  %vm74_vm3 = vsmask.f32 7440  ;;  %s5949_s0 = inlined_call_operand.vmem [shape: bf16[1,2,10,10,128], index: 0, kind: input, shape index: {}]   ;;  %s5950_s1 = inlined_call_operand.vmem [shape: bf16[1,2,9,9,4], index: 1, kind: input, shape index: {}]   ;;  %s5951_s2 = inlined_call_operand.vmem [shape: bf16[4,128], index: 2, kind: input, shape index: {}]   ;;  %s5952_s3 = inlined_call_operand.vmem [shape: f32[1,128], index: 3, kind: input, shape index: {}]   ;;  %s5953_s4 = inlined_call_operand.vmem [shape: bf16[9,128,128], index: 4, kind: input, shape index: {}]   ;;  %s5954_s5 = inlined_call_operand.vmem [shape: f32[1,128], index: 5, kind: input, shape index: {}]   ;;  %s5955_s6 = inlined_call_operand.hbm [shape: f32[2,8,8,128], index: 6, kind: output, shape index: {}]  }
   0x1   :  { %v4456_v0 = vld [vmem:[%s5953_s4 + $0x40] sm:$0xff]   ;;  %v4458_v2 = vld [vmem:[%s5953_s4 + $0x48] sm:$0xff]   ;;  %v4460_v4 = vld [vmem:[%s5953_s4 + $0x50] sm:$0xff]   ;;  %vm3179_vm6 = vcmask 1041408   ;;  %vm3154_vm7 = vcmask 31744  }
   0x2   :  { %v4457_v1 = vld [vmem:[%s5953_s4 + $0x140] sm:$0xff]   ;;  %3986 = vmatprep.subr.bf16.mxu1 %v4456_v0  ;;  %v4459_v3 = vld [vmem:[%s5953_s4 + $0x148] sm:$0xff]   ;;  %v4461_v5 = vld [vmem:[%s5953_s4 + $0x150] sm:$0xff]  }
   0x3   :  { %4146 = vmatprep.subr.bf16.mxu0 %v4457_v1  ;;  %3987 = vmatpush3.bf16.msra.mxu1 %v4456_v0  ;;  %v4462_v6 = vld [vmem:[%s5953_s4 + $0x58] sm:$0xff]   ;;  %v4464_v8 = vld [vmem:[%s5953_s4 + $0x60] sm:$0xff]   ;;  %v4466_v10 = vld [vmem:[%s5953_s4 + $0x68] sm:$0xff]  }
   0x4   :  { %4147 = vmatpush3.bf16.msra.mxu0 %v4457_v1  ;;  %3988 = vmatprep.subr.bf16.mxu1 %v4458_v2  ;;  %v4463_v7 = vld [vmem:[%s5953_s4 + $0x158] sm:$0xff]   ;;  %v4465_v9 = vld [vmem:[%s5953_s4 + $0x160] sm:$0xff]   ;;  %v4467_v11 = vld [vmem:[%s5953_s4 + $0x168] sm:$0xff]  }
   0x5   :  { %4148 = vmatprep.subr.bf16.mxu0 %v4459_v3  ;;  %v4675_v12 = vld [vmem:[%s5949_s0] sm:$0xf]  ;;  %v4680_v13 = vld [vmem:[%s5949_s0 + $0x8] sm:$0xf]  ;;  %v4685_v14 = vld [vmem:[%s5949_s0 + $0x4] sm:$0x1] }
   0x6   :  { %v4690_v15 = vld [vmem:[%s5949_s0 + $0xc] sm:$0x1]  ;;  %v3399_v16 = vcombine.low %v4675_v12, %v4680_v13  ;;  %v77_v17 = vshrl.u32 %v4675_v12, 16  ;;  %v80_v18 = vshll.u32 %v4675_v12, 16  ;;  %v86_v19 = vshll.u32 %v4685_v14, 16  ;;  %v4468_v25 = vld [vmem:[%s5953_s4 + $0x70] sm:$0xff]   ;;  %vm4721_vm4 = vmor %vm735_vm0, %vm736_vm1 }
   0x7   :  { %3989 = vmatpush3.bf16.msra.mxu1 %v4458_v2  ;;  %v91_v20 = vshrl.u32 %v4680_v13, 16  ;;  %v94_v21 = vshll.u32 %v4680_v13, 16  ;;  %v100_v22 = vshll.u32 %v4690_v15, 16  ;;  %v4703_v23 = vld [vmem:[%s5949_s0 + $0xc] sm:$0x1]  ;;  %v4469_v30 = vld [vmem:[%s5953_s4 + $0x170] sm:$0xff]   ;;  %vm4739_vm5 = vmor %vm73_vm2, %vm74_vm3 }
   0x8   :  { %4149 = vmatpush3.bf16.msra.mxu0 %v4459_v3  ;;  %3990 = vmatprep.subr.bf16.mxu1 %v4460_v4  ;;  %v4708_v24 = vld [vmem:[%s5949_s0 + $0x14] sm:$0x1]  ;;  %v79_v26 = vrot.slane %v77_v17, 4  ;;  %v82_v27 = vrot.slane %v80_v18, 5  ;;  %v3575_v29 = vld [vmem:[%s5949_s0 + $0x8] sm:$0xe] }
   0x9   :  { %4150 = vmatprep.subr.bf16.mxu0 %v4461_v5  ;;  %v93_v28 = vrot.slane %v91_v20, 4  ;;  %v88_v31 = vrot.slane %v86_v19, 5  ;;  %v96_v32 = vrot.slane %v94_v21, 5  ;;  %v3576_v34 = vld [vmem:[%s5949_s0 + $0x10] sm:$0xe]  ;;  %v3591_v36 = vrot.slane %v3575_v29, 9 }
   0xa   :  { %v83_v35 = vor.u32 %v82_v27, %v79_v26  ;;  %v1771_v37 = vrot.slane %v4703_v23, 5  ;;  %v3592_v38 = vrot.slane %v3576_v34, 9  ;;  %v4732_v39 = vld [vmem:[%s5949_s0 + $0x10] sm:$0xf]  ;;  %v4470_v40 = vld [vmem:[%s5953_s4 + $0x78] sm:$0xff]   ;;  %v102_v43 = vrot.slane %v100_v22, 5 }
   0xb   :  { %3991 = vmatpush3.bf16.msra.mxu1 %v4460_v4  ;;  %v97_v42 = vor.u32 %v96_v32, %v93_v28  ;;  %v1775_v44 = vrot.slane %v4708_v24, 5  ;;  %v4747_v45 = vld [vmem:[%s5949_s0 + $0x18] sm:$0xf]  ;;  %v4754_v48 = vld [vmem:[%s5949_s0 + $0x14] sm:$0x1]  ;;  %v105_v50 = vshrl.u32 %v4732_v39, 16 }
   0xc   :  { %4151 = vmatpush3.bf16.msra.mxu0 %v4461_v5  ;;  %3992 = vmatprep.subr.bf16.mxu1 %v4462_v6  ;;  %v84_v46 = vrot.slane %v83_v35, 4  ;;  %v1772_v47 = vsel %vm4721_vm4, %v3591_v36, %v1771_v37  ;;  %v4759_v49 = vld [vmem:[%s5949_s0 + $0x1c] sm:$0x1]  ;;  %v3400_v51 = vcombine.low %v4732_v39, %v4747_v45  ;;  %v108_v55 = vshll.u32 %v4732_v39, 16  ;;  %v4472_v4 = vld [vmem:[%s5953_s4] sm:$0xff]   ;;  %v4475_v29 = vld [vmem:[%s5953_s4 + $0x188] sm:$0xff]  }
   0xd   :  { %4152 = vmatprep.subr.bf16.mxu0 %v4463_v7  ;;  %v4471_v52 = vld [vmem:[%s5953_s4 + $0x178] sm:$0xff]   ;;  %v98_v53 = vrot.slane %v97_v42, 4  ;;  %v1776_v54 = vsel %vm4721_vm4, %v3592_v38, %v1775_v44  ;;  %v114_v56 = vshll.u32 %v4754_v48, 16  ;;  %v107_v59 = vrot.slane %v105_v50, 4  ;;  %v4813_v32 = vld [vmem:[%s5949_s0 + $0x28] sm:$0xf] }
   0xe   :  { %v89_v57 = vsel %vm4739_vm5, %v84_v46, %v88_v31  ;;  %v3623_v58 = vcombine.low %v1772_v47, %v1776_v54  ;;  %v119_v60 = vshrl.u32 %v4747_v45, 16  ;;  %v110_v62 = vrot.slane %v108_v55, 5  ;;  %v3516_v0 = vld [vmem:[%s5949_s0 + $0x1c] sm:$0x1]  ;;  %v3577_v5 = vld [vmem:[%s5949_s0 + $0x18] sm:$0xe] }
   0xf   :  { %3993 = vmatpush3.bf16.msra.mxu1 %v4462_v6  ;;  %v103_v61 = vsel %vm4739_vm5, %v98_v53, %v102_v43  ;;  %v122_v63 = vshll.u32 %v4747_v45, 16  ;;  %v128_v3 = vshll.u32 %v4759_v49, 16  ;;  %v4473_v6 = vld [vmem:[%s5953_s4 + $0x180] sm:$0xff]   ;;  %v3593_v17 = vrot.slane %v3577_v5, 9  ;;  %v4825_v37 = vld [vmem:[%s5949_s0 + $0x2c] sm:$0x1] }
  0x10   :  { %4153 = vmatpush3.bf16.msra.mxu0 %v4463_v7  ;;  %3994 = vmatprep.subr.bf16.mxu1 %v4464_v8  ;;  %v3383_v1 = vcombine.low %v89_v57, %v103_v61  ;;  %v121_v2 = vrot.slane %v119_v60, 4  ;;  %v111_v7 = vor.u32 %v110_v62, %v107_v59  ;;  %v1779_v18 = vrot.slane %v3516_v0, 5  ;;  %v4808_v31 = vld [vmem:[%s5949_s0 + $0x20] sm:$0xf]  ;;  %v4818_v34 = vld [vmem:[%s5949_s0 + $0x24] sm:$0x1] }
  0x11   :  { %4154 = vmatprep.subr.bf16.mxu0 %v4465_v9  ;;  %4162 = vmatprep.mubr.bf16.mxu0 %v3623_v58  ;;  %v130_v21 = vrot.slane %v128_v3, 5  ;;  %v133_v38 = vshrl.u32 %v4808_v31, 16  ;;  %v3520_v42 = vld [vmem:[%s5949_s0 + $0x2c] sm:$0x1]  ;;  %v142_v46 = vshll.u32 %v4818_v34, 16  ;;  %v147_v47 = vshrl.u32 %v4813_v32, 16 }
  0x12   :  { %4002 = vmatprep.mubr.bf16.mxu1 %v3383_v1  ;;  %v112_v19 = vrot.slane %v111_v7, 4  ;;  %v4474_v44 = vld [vmem:[%s5953_s4 + $0x8] sm:$0xff]   ;;  %v150_v50 = vshll.u32 %v4813_v32, 16  ;;  %v156_v55 = vshll.u32 %v4825_v37, 16  ;;  %v1787_v57 = vrot.slane %v3520_v42, 5  ;;  %v4501_v13 = vld [vmem:[%s5953_s4 + $0x1d0] sm:$0xff]  }
  0x13   :  { %3995 = vmatpush3.bf16.msra.mxu1 %v4464_v8  ;;  %v116_v8 = vrot.slane %v114_v56, 5  ;;  %v135_v53 = vrot.slane %v133_v38, 4  ;;  %v3579_v56 = vld [vmem:[%s5949_s0 + $0x28] sm:$0xe]  ;;  %v144_v58 = vrot.slane %v142_v46, 5  ;;  %v149_v59 = vrot.slane %v147_v47, 4 }
  0x14   :  { %4155 = vmatpush3.bf16.msra.mxu0 %v4465_v9  ;;  %3996 = vmatprep.subr.bf16.mxu1 %v4466_v10  ;;  %v124_v9 = vrot.slane %v122_v63, 5  ;;  %v152_v60 = vrot.slane %v150_v50, 5  ;;  %v3580_v61 = vld [vmem:[%s5949_s0 + $0x30] sm:$0xe]  ;;  %v3595_v62 = vrot.slane %v3579_v56, 9  ;;  %v158_v1 = vrot.slane %v156_v55, 5 }
  0x15   :  { %4156 = vmatprep.subr.bf16.mxu0 %v4467_v11  ;;  %v117_v27 = vsel %vm4739_vm5, %v112_v19, %v116_v8  ;;  %v4476_v63 = vld [vmem:[%s5953_s4 + $0x10] sm:$0xff]   ;;  %v752_v12 = vrot.slane %v4759_v49, 5  ;;  %v4505_v39 = vld [vmem:[%s5949_s0 + $0x60] ss:$8 sps:$4 sm:$0xff]   ;;  %v4551_v33 = vld [vmem:[%s5953_s4 + $0x138] sm:$0xff]  }
  0x16   :  { %v125_v20 = vor.u32 %v124_v9, %v121_v2  ;;  %v3596_v2 = vrot.slane %v3580_v61, 9  ;;  %v4854_v5 = vld [vmem:[%s5949_s0 + $0x30] sm:$0xf]  ;;  %v153_v7 = vor.u32 %v152_v60, %v149_v59  ;;  %v1788_v8 = vsel %vm4721_vm4, %v3595_v62, %v1787_v57  ;;  %v4869_v9 = vld [vmem:[%s5949_s0 + $0x34] sm:$0x1]  ;;  %v4481_v59 = vld [vmem:[%s5953_s4 + $0x1a0] sm:$0xff]  }
  0x17   :  { %3997 = vmatpush3.bf16.msra.mxu1 %v4466_v10  ;;  %v3518_v10 = vld [vmem:[%s5949_s0 + $0x24] sm:$0x1]  ;;  %v164_v19 = vshll.u32 %v4854_v5, 16  ;;  %v4517_v49 = vld [vmem:[%s5953_s4 + $0x1f0] sm:$0xff]  }
  0x18   :  { %4157 = vmatpush3.bf16.msra.mxu0 %v4467_v11  ;;  %3998 = vmatprep.subr.bf16.mxu1 %v4468_v25  ;;  %v3578_v11 = vld [vmem:[%s5949_s0 + $0x20] sm:$0xe]  ;;  %v1783_v26 = vrot.slane %v3518_v10, 5  ;;  %v126_v28 = vrot.slane %v125_v20, 4  ;;  %v4874_v10 = vld [vmem:[%s5949_s0 + $0x3c] sm:$0x1] }
  0x19   :  { %4158 = vmatprep.subr.bf16.mxu0 %v4469_v30  ;;  %v3594_v22 = vrot.slane %v3578_v11, 9  ;;  %v154_v20 = vrot.slane %v153_v7, 4  ;;  %v184_v42 = vshll.u32 %v4874_v10, 16 }
  0x1a   :  { %v131_v35 = vsel %vm4739_vm5, %v126_v28, %v130_v21  ;;  %v166_v28 = vrot.slane %v164_v19, 5 }
  0x1b   :  { %3999 = vmatpush3.bf16.msra.mxu1 %v4468_v25  ;;  %v1780_v25 = vsel %vm4721_vm4, %v3593_v17, %v1779_v18  ;;  %v3384_v43 = vcombine.low %v117_v27, %v131_v35  ;;  %v161_v18 = vshrl.u32 %v4854_v5, 16  ;;  %v3524_v35 = vld [vmem:[%s5949_s0 + $0x3c] sm:$0x1]  ;;  %v186_v62 = vrot.slane %v184_v42, 5 }
  0x1c   :  { %4159 = vmatpush3.bf16.msra.mxu0 %v4469_v30  ;;  %4000 = vmatprep.subr.bf16.mxu1 %v4470_v40  ;;  %v1784_v30 = vsel %vm4721_vm4, %v3594_v22, %v1783_v26  ;;  %v170_v22 = vshll.u32 %v4869_v9, 16 }
  0x1d   :  { %4160 = vmatprep.subr.bf16.mxu0 %v4471_v52  ;;  %v3624_v36 = vcombine.low %v1780_v25, %v1784_v30  ;;  %v163_v27 = vrot.slane %v161_v18, 4 }
  0x1e   :  { %v172_v38 = vrot.slane %v170_v22, 5 }
  0x1f   :  { %4001 = vmatpush3.bf16.msra.mxu1 %v4470_v40  ;;  %v136_v40 = vshll.u32 %v4808_v31, 16  ;;  %v167_v47 = vor.u32 %v166_v28, %v163_v27  ;;  %v4483_v27 = vld [vmem:[%s5953_s4 + $0x1a8] sm:$0xff]  }
  0x20   :  { %4161 = vmatpush3.bf16.msra.mxu0 %v4471_v52  ;;  %4018 = vmatprep.subr.bf16.mxu1 %v4472_v4  ;;  %v3522_v52 = vld [vmem:[%s5949_s0 + $0x34] sm:$0x1] }
  0x21   :  { %4178 = vmatprep.subr.bf16.mxu0 %v4473_v6  ;;  %v138_v54 = vrot.slane %v136_v40, 5  ;;  %v1791_v3 = vrot.slane %v3522_v52, 5  ;;  %v3581_v52 = vld [vmem:[%s5949_s0 + $0x38] sm:$0xe]  ;;  %v168_v60 = vrot.slane %v167_v47, 4 }
  0x22   :  { %4003 = vmatmul.mubr.bf16.vlgmr.msra.gmra.mrb[0].mxu1 %v3384_v43  ;;  %v3526_v43 = vld [vmem:[%s5949_s0 + $0x44] sm:$0x1]  ;;  %v3597_v55 = vrot.slane %v3581_v52, 9  ;;  %v3584_v52 = vld [vmem:[%s5949_s0 + $0x60] sm:$0xe] }
  0x23   :  { %4163 = vmatmul.mubr.bf16.vlgmr.msra.gmra.mrb[0].mxu0 %v3624_v36  ;;  %4019 = vmatpush3.bf16.msra.mxu1 %v4472_v4  ;;  %v139_v0 = vor.u32 %v138_v54, %v135_v53  ;;  %v4864_v4 = vld [vmem:[%s5949_s0 + $0x38] sm:$0xf]  ;;  %v1792_v17 = vsel %vm4721_vm4, %v3596_v2, %v1791_v3  ;;  %v159_v36 = vsel %vm4739_vm5, %v154_v20, %v158_v1  ;;  %v3582_v53 = vld [vmem:[%s5949_s0 + $0x40] sm:$0xe]  ;;  %v1795_v54 = vrot.slane %v3524_v35, 5 }
  0x24   :  { %4179 = vmatpush3.bf16.msra.mxu0 %v4473_v6  ;;  %v4477_v6 = vld [vmem:[%s5953_s4 + $0x190] sm:$0xff]   ;;  %4020 = vmatprep.subr.bf16.mxu1 %v4474_v44  ;;  %v3625_v21 = vcombine.low %v1788_v8, %v1792_v17  ;;  %v175_v25 = vshrl.u32 %v4864_v4, 16  ;;  %v178_v30 = vshll.u32 %v4864_v4, 16  ;;  %v3598_v56 = vrot.slane %v3582_v53, 9  ;;  %v4937_v17 = vld [vmem:[%s5949_s0 + $0x5c] sm:$0x1] }
  0x25   :  { %4180 = vmatprep.subr.bf16.mxu0 %v4475_v29  ;;  %v140_v11 = vrot.slane %v139_v0, 4  ;;  %v1799_v57 = vrot.slane %v3526_v43, 5  ;;  %v1796_v0 = vsel %vm4721_vm4, %v3597_v55, %v1795_v54  ;;  %v740_v2 = vrot.slane %v4685_v14, 5  ;;  %v4922_v8 = vld [vmem:[%s5949_s0 + $0x50] sm:$0xf] }
  0x26   :  { %4166 = vmatprep.mubr.bf16.mxu0 %v3625_v21  ;;  %v177_v40 = vrot.slane %v175_v25, 4  ;;  %v180_v50 = vrot.slane %v178_v30, 5  ;;  %v173_v3 = vsel %vm4739_vm5, %v168_v60, %v172_v38  ;;  %v189_v18 = vshrl.u32 %v4922_v8, 16  ;;  %v4482_v38 = vld [vmem:[%s5953_s4 + $0x28] sm:$0xff]   ;;  %v4484_v55 = vld [vmem:[%s5953_s4 + $0x30] sm:$0xff]  }
  0x27   :  { %4021 = vmatpush3.bf16.msra.mxu1 %v4474_v44  ;;  %v145_v26 = vsel %vm4739_vm5, %v140_v11, %v144_v58  ;;  %v4479_v44 = vld [vmem:[%s5953_s4 + $0x198] sm:$0xff]   ;;  %v4480_v58 = vld [vmem:[%s5953_s4 + $0x20] sm:$0xff]   ;;  %v1800_v1 = vsel %vm4721_vm4, %v3598_v56, %v1799_v57  ;;  %v4932_v11 = vld [vmem:[%s5949_s0 + $0x54] sm:$0x1]  ;;  %v192_v19 = vshll.u32 %v4922_v8, 16  ;;  %v3402_v45 = vcombine.low %v4854_v5, %v4864_v4 }
  0x28   :  { %4181 = vmatpush3.bf16.msra.mxu0 %v4475_v29  ;;  %v4478_v29 = vld [vmem:[%s5953_s4 + $0x18] sm:$0xff]   ;;  %4022 = vmatprep.subr.bf16.mxu1 %v4476_v63  ;;  %v3385_v46 = vcombine.low %v145_v26, %v159_v36  ;;  %v181_v61 = vor.u32 %v180_v50, %v177_v40  ;;  %v3626_v7 = vcombine.low %v1796_v0, %v1800_v1  ;;  %v198_v21 = vshll.u32 %v4932_v11, 16  ;;  %v4485_v56 = vld [vmem:[%s5953_s4 + $0x1b0] sm:$0xff]   ;;  %v688_v5 = vld [vmem:[%s5949_s0 + $0x8] sm:$0xe] }
  0x29   :  { %4182 = vmatprep.subr.bf16.mxu0 %v4477_v6  ;;  %v3528_v26 = vld [vmem:[%s5949_s0 + $0x5c] sm:$0x1]  ;;  %v191_v30 = vrot.slane %v189_v18, 4  ;;  %v194_v35 = vrot.slane %v192_v19, 5  ;;  %v212_v36 = vshll.u32 %v4937_v17, 16  ;;  %v1297_v40 = vshll.u32 %v4703_v23, 16 }
  0x2a   :  { %4006 = vmatprep.mubr.bf16.mxu1 %v3385_v46  ;;  %v1803_v46 = vrot.slane %v3528_v26, 5  ;;  %v200_v50 = vrot.slane %v198_v21, 5  ;;  %v4495_v23 = vld [vmem:[%s5953_s4 + $0x1c8] sm:$0xff]  }
  0x2b   :  { %4023 = vmatpush3.bf16.msra.mxu1 %v4476_v63  ;;  %v4927_v63 = vld [vmem:[%s5949_s0 + $0x58] sm:$0xf]  ;;  %4167 = vmatmul.mubr.bf16.gmra.mrb[4].mxu0 %v3626_v7  ;;  %v195_v47 = vor.u32 %v194_v35, %v191_v30  ;;  %v214_v60 = vrot.slane %v212_v36, 5  ;;  %v4513_v14 = vld [vmem:[%s5949_s0 + $0x80] ss:$8 sps:$4 sm:$0xff]  }
  0x2c   :  { %4183 = vmatpush3.bf16.msra.mxu0 %v4477_v6  ;;  %4024 = vmatprep.subr.bf16.mxu1 %v4478_v29  ;;  %v182_v6 = vrot.slane %v181_v61, 4  ;;  %v203_v22 = vshrl.u32 %v4927_v63, 16  ;;  %v206_v25 = vshll.u32 %v4927_v63, 16  ;;  %v3600_v61 = vrot.slane %v3584_v52, 9  ;;  %v4486_v30 = vld [vmem:[%s5953_s4 + $0x38] sm:$0xff]  }
  0x2d   :  { %4184 = vmatprep.subr.bf16.mxu0 %v4479_v44  ;;  %v196_v0 = vrot.slane %v195_v47, 4  ;;  %v3586_v52 = vld [vmem:[%s5949_s0 + $0x70] sm:$0xe] }
  0x2e   :  { %v187_v20 = vsel %vm4739_vm5, %v182_v6, %v186_v62  ;;  %v205_v42 = vrot.slane %v203_v22, 4  ;;  %v208_v43 = vrot.slane %v206_v25, 5  ;;  %v4975_v62 = vld [vmem:[%s5949_s0 + $0x60] sm:$0xf]  ;;  %v4992_v6 = vld [vmem:[%s5949_s0 + $0x6c] sm:$0x1] }
  0x2f   :  { %4025 = vmatpush3.bf16.msra.mxu1 %v4478_v29  ;;  %v3386_v28 = vcombine.low %v173_v3, %v187_v20  ;;  %v3530_v29 = vld [vmem:[%s5949_s0 + $0x64] sm:$0x1]  ;;  %v217_v7 = vshrl.u32 %v4975_v62, 16  ;;  %v220_v19 = vshll.u32 %v4975_v62, 16  ;;  %v201_v21 = vsel %vm4739_vm5, %v196_v0, %v200_v50  ;;  %v3585_v50 = vld [vmem:[%s5949_s0 + $0x68] sm:$0xe] }
  0x30   :  { %4185 = vmatpush3.bf16.msra.mxu0 %v4479_v44  ;;  %4026 = vmatprep.subr.bf16.mxu1 %v4480_v58  ;;  %v3583_v44 = vld [vmem:[%s5949_s0 + $0x58] sm:$0xe]  ;;  %v1807_v54 = vrot.slane %v3530_v29, 5  ;;  %v209_v57 = vor.u32 %v208_v43, %v205_v42  ;;  %v4987_v3 = vld [vmem:[%s5949_s0 + $0x64] sm:$0x1]  ;;  %v240_v47 = vshll.u32 %v4992_v6, 16 }
  0x31   :  { %4186 = vmatprep.subr.bf16.mxu0 %v4481_v59  ;;  %4007 = vmatmul.mubr.bf16.gmra.mrb[4].mxu1 %v3386_v28  ;;  %v3599_v53 = vrot.slane %v3583_v44, 9  ;;  %v226_v20 = vshll.u32 %v4987_v3, 16  ;;  %v219_v25 = vrot.slane %v217_v7, 4  ;;  %v3532_v28 = vld [vmem:[%s5949_s0 + $0x6c] sm:$0x1]  ;;  %v222_v36 = vrot.slane %v220_v19, 5 }
  0x32   :  { %v210_v18 = vrot.slane %v209_v57, 4  ;;  %v3534_v43 = vld [vmem:[%s5949_s0 + $0x74] sm:$0x1]  ;;  %v1811_v57 = vrot.slane %v3532_v28, 5  ;;  %v5027_v0 = vld [vmem:[%s5953_s4 + $0x80] sm:$0xff]  }
  0x33   :  { %4027 = vmatpush3.bf16.msra.mxu1 %v4480_v58  ;;  %v1804_v1 = vsel %vm4721_vm4, %v3599_v53, %v1803_v46  ;;  %v1808_v58 = vsel %vm4721_vm4, %v3600_v61, %v1807_v54  ;;  %v228_v29 = vrot.slane %v226_v20, 5  ;;  %v3601_v54 = vrot.slane %v3585_v50, 9  ;;  %v5041_v20 = vld [vmem:[%s5949_s0 + $0x70] sm:$0xf]  ;;  %v3536_v50 = vld [vmem:[%s5949_s0 + $0x7c] sm:$0x1] }
  0x34   :  { %4187 = vmatpush3.bf16.msra.mxu0 %v4481_v59  ;;  %v4980_v59 = vld [vmem:[%s5949_s0 + $0x68] sm:$0xf]  ;;  %4028 = vmatprep.subr.bf16.mxu1 %v4482_v38  ;;  %v3627_v22 = vcombine.low %v1804_v1, %v1808_v58  ;;  %v215_v35 = vsel %vm4739_vm5, %v210_v18, %v214_v60  ;;  %v3602_v60 = vrot.slane %v3586_v52, 9  ;;  %v1815_v61 = vrot.slane %v3534_v43, 5  ;;  %v5032_v1 = vld [vmem:[%s5953_s4 + $0x1c0] sm:$0xff]  }
  0x35   :  { %4188 = vmatprep.subr.bf16.mxu0 %v4483_v27  ;;  %v231_v26 = vshrl.u32 %v4980_v59, 16  ;;  %v234_v42 = vshll.u32 %v4980_v59, 16  ;;  %v3387_v44 = vcombine.low %v201_v21, %v215_v35  ;;  %v242_v58 = vrot.slane %v240_v47, 5  ;;  %v5059_v35 = vld [vmem:[%s5949_s0 + $0x7c] sm:$0x1] }
  0x36   :  { %4170 = vmatprep.mubr.bf16.mxu0 %v3627_v22  ;;  %v1812_v19 = vsel %vm4721_vm4, %v3601_v54, %v1811_v57  ;;  %v245_v28 = vshrl.u32 %v5041_v20, 16  ;;  %v268_v47 = vshll.u32 %v5059_v35, 16  ;;  %v3538_v52 = vld [vmem:[%s5949_s0 + $0x84] sm:$0x1]  ;;  %v3587_v57 = vld [vmem:[%s5949_s0 + $0x78] sm:$0xe] }
  0x37   :  { %4029 = vmatpush3.bf16.msra.mxu1 %v4482_v38  ;;  %v233_v46 = vrot.slane %v231_v26, 4  ;;  %v223_v38 = vor.u32 %v222_v36, %v219_v25  ;;  %v236_v53 = vrot.slane %v234_v42, 5  ;;  %4010 = vmatprep.mubr.bf16.mxu1 %v3387_v44  ;;  %v5048_v26 = vld [vmem:[%s5949_s0 + $0x78] sm:$0xf]  ;;  %v248_v36 = vshll.u32 %v5041_v20, 16 }
  0x38   :  { %4189 = vmatpush3.bf16.msra.mxu0 %v4483_v27  ;;  %v4487_v27 = vld [vmem:[%s5953_s4 + $0x1b8] sm:$0xff]   ;;  %4030 = vmatprep.subr.bf16.mxu1 %v4484_v55  ;;  %v259_v42 = vshrl.u32 %v5048_v26, 16  ;;  %v262_v43 = vshll.u32 %v5048_v26, 16 }
  0x39   :  { %4190 = vmatprep.subr.bf16.mxu0 %v4485_v56  ;;  %v224_v7 = vrot.slane %v223_v38, 4  ;;  %v237_v18 = vor.u32 %v236_v53, %v233_v46  ;;  %v247_v46 = vrot.slane %v245_v28, 4  ;;  %v250_v53 = vrot.slane %v248_v36, 5  ;;  %v5097_v36 = vld [vmem:[%s5949_s0 + $0x84] sm:$0x1] }
  0x3b   :  { %4031 = vmatpush3.bf16.msra.mxu1 %v4484_v55  ;;  %v229_v21 = vsel %vm4739_vm5, %v224_v7, %v228_v29  ;;  %v238_v22 = vrot.slane %v237_v18, 4  ;;  %v5053_v55 = vld [vmem:[%s5949_s0 + $0x74] sm:$0x1]  ;;  %v3588_v7 = vld [vmem:[%s5949_s0 + $0x80] sm:$0xe]  ;;  %v3603_v18 = vrot.slane %v3587_v57, 9 }
  0x3c   :  { %4191 = vmatpush3.bf16.msra.mxu0 %v4485_v56  ;;  %v1816_v56 = vsel %vm4721_vm4, %v3602_v60, %v1815_v61  ;;  %4032 = vmatprep.subr.bf16.mxu1 %v4486_v30  ;;  %v254_v29 = vshll.u32 %v5053_v55, 16  ;;  %v264_v60 = vrot.slane %v262_v43, 5  ;;  %v270_v61 = vrot.slane %v268_v47, 5 }
  0x3d   :  { %4192 = vmatprep.subr.bf16.mxu0 %v4487_v27  ;;  %v3628_v25 = vcombine.low %v1812_v19, %v1816_v56  ;;  %v243_v44 = vsel %vm4739_vm5, %v238_v22, %v242_v58  ;;  %v251_v58 = vor.u32 %v250_v53, %v247_v46  ;;  %v3604_v19 = vrot.slane %v3588_v7, 9  ;;  %v5090_v22 = vld [vmem:[%s5949_s0 + $0x88] sm:$0xf] }
  0x3e   :  { %v3388_v38 = vcombine.low %v229_v21, %v243_v44  ;;  %v256_v54 = vrot.slane %v254_v29, 5  ;;  %v1823_v56 = vrot.slane %v3538_v52, 5  ;;  %v5085_v21 = vld [vmem:[%s5949_s0 + $0x80] sm:$0xf]  ;;  %v5102_v29 = vld [vmem:[%s5949_s0 + $0x8c] sm:$0x1] }
  0x3f   :  { %4171 = vmatmul.mubr.bf16.gmra.mrb[8].mxu0 %v3628_v25  ;;  %4033 = vmatpush3.bf16.msra.mxu1 %v4486_v30  ;;  %v1819_v30 = vrot.slane %v3536_v50, 5  ;;  %v276_v43 = vshll.u32 %v5085_v21, 16  ;;  %v252_v44 = vrot.slane %v251_v58, 4  ;;  %v282_v47 = vshll.u32 %v5097_v36, 16 }
  0x40   :  { %4193 = vmatpush3.bf16.msra.mxu0 %v4487_v27  ;;  %v261_v27 = vrot.slane %v259_v42, 4  ;;  %4050 = vmatprep.subr.bf16.mxu1 %v5027_v0  ;;  %v273_v42 = vshrl.u32 %v5085_v21, 16  ;;  %v1824_v46 = vsel %vm4721_vm4, %v3604_v19, %v1823_v56  ;;  %v287_v50 = vshrl.u32 %v5090_v22, 16 }
  0x41   :  { %4210 = vmatprep.subr.bf16.mxu0 %v5032_v1  ;;  %4011 = vmatmul.mubr.bf16.gmra.mrb[8].mxu1 %v3388_v38  ;;  %v1820_v28 = vsel %vm4721_vm4, %v3603_v18, %v1819_v30  ;;  %v257_v57 = vsel %vm4739_vm5, %v252_v44, %v256_v54  ;;  %v290_v18 = vshll.u32 %v5090_v22, 16  ;;  %v3540_v30 = vld [vmem:[%s5949_s0 + $0x8c] sm:$0x1]  ;;  %v296_v56 = vshll.u32 %v5102_v29, 16  ;;  %v3589_v54 = vld [vmem:[%s5949_s0 + $0x88] sm:$0xe] }
  0x42   :  { %v265_v25 = vor.u32 %v264_v60, %v261_v27  ;;  %v3629_v38 = vcombine.low %v1820_v28, %v1824_v46  ;;  %v275_v53 = vrot.slane %v273_v42, 4  ;;  %v278_v27 = vrot.slane %v276_v43, 5  ;;  %v3590_v44 = vld [vmem:[%s5949_s0 + $0x90] sm:$0xe] }
  0x43   :  { %v284_v60 = vrot.slane %v282_v47, 5  ;;  %v289_v7 = vrot.slane %v287_v50, 4  ;;  %v1827_v28 = vrot.slane %v3540_v30, 5  ;;  %v292_v43 = vrot.slane %v290_v18, 5 }
  0x44   :  { %v266_v52 = vrot.slane %v265_v25, 4  ;;  %4174 = vmatprep.mubr.bf16.mxu0 %v3629_v38  ;;  %v279_v19 = vor.u32 %v278_v27, %v275_v53  ;;  %v3542_v25 = vld [vmem:[%s5949_s0 + $0x94] sm:$0x1]  ;;  %v1311_v47 = vshll.u32 %v4708_v24, 16  ;;  %v3606_v38 = vrot.slane %v3590_v44, 9  ;;  %v4509_v44 = vld [vmem:[%s5953_s4 + $0x1e0] sm:$0xff]  }
  0x45   :  { %v1831_v46 = vrot.slane %v3542_v25, 5  ;;  %v293_v53 = vor.u32 %v292_v43, %v289_v7  ;;  %v744_v18 = vrot.slane %v4690_v15, 5  ;;  %v4489_v24 = vld [vmem:[%s5949_s0 + $0x10] ss:$8 sps:$4 sm:$0xff]   ;;  %v5141_v7 = vrot.slane %v1297_v40, 5 }
  0x46   :  { %v271_v58 = vsel %vm4739_vm5, %v266_v52, %v270_v61  ;;  %v3605_v61 = vrot.slane %v3589_v54, 9  ;;  %v280_v50 = vrot.slane %v279_v19, 4  ;;  %v298_v52 = vrot.slane %v296_v56, 5  ;;  %v4497_v40 = vld [vmem:[%s5949_s0 + $0x30] ss:$8 sps:$4 sm:$0xff]  }
  0x47   :  { %v3389_v42 = vcombine.low %v257_v57, %v271_v58  ;;  %v1832_v57 = vsel %vm4721_vm4, %v3606_v38, %v1831_v46  ;;  %v294_v58 = vrot.slane %v293_v53, 4  ;;  %v5143_v19 = vrot.slane %v1311_v47, 5  ;;  %v5211_v46 = vld [vmem:[%s5949_s0 + $0x14] sm:$0x1]  ;;  %v3689_v47 = vld [vmem:[%s5949_s0 + $0x18] sm:$0xf] }
  0x48   :  { %v1828_v27 = vsel %vm4721_vm4, %v3605_v61, %v1827_v28  ;;  %v285_v30 = vsel %vm4739_vm5, %v280_v50, %v284_v60  ;;  %v4492_v60 = vld [vmem:[%s5949_s0 + $0x20] ss:$8 sps:$4 sm:$0xff]   ;;  %v748_v28 = vrot.slane %v4754_v48, 5  ;;  %v3401_v43 = vcombine.low %v4808_v31, %v4813_v32  ;;  %v4503_v32 = vld [vmem:[%s5953_s4 + $0x1d8] sm:$0xff]   ;;  %v3687_v61 = vld [vmem:[%s5949_s0 + $0x10] sm:$0xf] }
  0x49   :  { %4014 = vmatprep.mubr.bf16.mxu1 %v3389_v42  ;;  %v3630_v25 = vcombine.low %v1828_v27, %v1832_v57  ;;  %v299_v56 = vsel %vm4739_vm5, %v294_v58, %v298_v52  ;;  %v4494_v42 = vld [vmem:[%s5953_s4 + $0x88] sm:$0xff]   ;;  %v2319_v50 = vshrl.u32 %v3687_v61, 16  ;;  %v5225_v38 = vld [vmem:[%s5949_s0 + $0x1c] sm:$0x1]  ;;  %v2322_v53 = vshll.u32 %v3687_v61, 16 }
  0x4a   :  { %v3390_v54 = vcombine.low %v285_v30, %v299_v56  ;;  %v4500_v31 = vld [vmem:[%s5949_s0 + $0x40] ss:$8 sps:$4 sm:$0xff]   ;;  %v2328_v27 = vshll.u32 %v5211_v46, 16  ;;  %v2333_v57 = vshrl.u32 %v3689_v47, 16  ;;  %v689_v56 = vld [vmem:[%s5949_s0 + $0x10] sm:$0xe] }
  0x4b   :  { %4175 = vmatmul.mubr.bf16.gmra.mrb[12].mxu0 %v3630_v25  ;;  %v4507_v30 = vld [vmem:[%s5953_s4 + $0xa0] sm:$0xff]   ;;  %v2321_v58 = vrot.slane %v2319_v50, 4  ;;  %v2336_v25 = vshll.u32 %v3689_v47, 16  ;;  %v4516_v61 = vld [vmem:[%s5949_s0 + $0x90] ss:$8 sps:$4 sm:$0xff]  }
  0x4c   :  { %4194 = vmatprep.mubr.bf16.mxu0 %v4489_v24  ;;  %4015 = vmatmul.mubr.bf16.gmra.mrb[12].mxu1 %v3390_v54  ;;  %v2342_v24 = vshll.u32 %v5225_v38, 16  ;;  %v4511_v54 = vld [vmem:[%s5953_s4 + $0x1e8] sm:$0xff]   ;;  %v4515_v50 = vld [vmem:[%s5953_s4 + $0xb0] sm:$0xff]  }
  0x4d   :  { %4034 = vmatprep.mubr.bf16.mxu1 %v3399_v16  ;;  %v4499_v16 = vld [vmem:[%s5953_s4 + $0x90] sm:$0xff]  }
  0x53   :  { %4195 = vmatmul.mubr.bf16.vlgmr.msra.gmra.mrb[0].mxu0 %v4492_v60  ;;  %v2324_v60 = vrot.slane %v2322_v53, 5 }
  0x54   :  { %4211 = vmatpush3.bf16.msra.mxu0 %v5032_v1  ;;  %4198 = vmatprep.mubr.bf16.mxu0 %v4497_v40  ;;  %v687_v1 = vld [vmem:[%s5949_s0] sm:$0xe]  ;;  %v690_v40 = vld [vmem:[%s5949_s0 + $0x18] sm:$0xe] }
  0x55   :  { %4212 = vmatprep.subr.bf16.mxu0 %v4495_v23  ;;  %4035 = vmatmul.mubr.bf16.vlgmr.msra.gmra.mrb[0].mxu1 %v3400_v51  ;;  %v4502_v51 = vld [vmem:[%s5953_s4 + $0x98] sm:$0xff]   ;;  %v3415_v4 = vrot.slane %v687_v1, 9  ;;  %v4510_v1 = vld [vmem:[%s5953_s4 + $0xa8] sm:$0xff]  }
  0x56   :  { %4051 = vmatpush3.bf16.msra.mxu1 %v5027_v0  ;;  %4038 = vmatprep.mubr.bf16.mxu1 %v3401_v43  ;;  %v3403_v0 = vcombine.low %v4922_v8, %v4927_v63  ;;  %v4508_v8 = vld [vmem:[%s5949_s0 + $0x70] ss:$8 sps:$4 sm:$0xff]   ;;  %v3416_v63 = vrot.slane %v688_v5, 9  ;;  %v2344_v43 = vrot.slane %v2342_v24, 5 }
  0x57   :  { %4052 = vmatprep.subr.bf16.mxu1 %v4494_v42  ;;  %v5220_v52 = vsel %vm4721_vm4, %v3415_v4, %v740_v2 }
  0x58   :  { %4213 = vmatpush3.bf16.msra.mxu0 %v4495_v23  ;;  %v5238_v2 = vsel %vm4721_vm4, %v3416_v63, %v744_v18  ;;  %v2330_v18 = vrot.slane %v2328_v27, 5  ;;  %v2335_v23 = vrot.slane %v2333_v57, 4 }
  0x59   :  { %4214 = vmatprep.subr.bf16.mxu0 %v4501_v13  ;;  %v3447_v15 = vcombine.low %v5220_v52, %v5238_v2  ;;  %v4523_v52 = vld [vmem:[%s5953_s4 + $0x208] sm:$0xff]  }
  0x5a   :  { %4053 = vmatpush3.bf16.msra.mxu1 %v4494_v42  ;;  %v2338_v42 = vrot.slane %v2336_v25, 5 }
  0x5b   :  { %4199 = vmatmul.mubr.bf16.gmra.mrb[4].mxu0 %v4500_v31  ;;  %4054 = vmatprep.subr.bf16.mxu1 %v4499_v16  ;;  %v3404_v31 = vcombine.low %v4975_v62, %v4980_v59 }
  0x5c   :  { %4215 = vmatpush3.bf16.msra.mxu0 %v4501_v13  ;;  %4202 = vmatprep.mubr.bf16.mxu0 %v4505_v39  ;;  %v3417_v13 = vrot.slane %v689_v56, 9  ;;  %v2325_v39 = vor.u32 %v2324_v60, %v2321_v58  ;;  %v2339_v62 = vor.u32 %v2338_v42, %v2335_v23  ;;  %v4519_v58 = vld [vmem:[%s5953_s4 + $0x1f8] sm:$0xff]  }
  0x5d   :  { %4216 = vmatprep.subr.bf16.mxu0 %v4503_v32  ;;  %4039 = vmatmul.mubr.bf16.gmra.mrb[4].mxu1 %v3402_v45  ;;  %v3691_v45 = vld [vmem:[%s5949_s0 + $0x20] sm:$0xf] }
  0x5e   :  { %4055 = vmatpush3.bf16.msra.mxu1 %v4499_v16  ;;  %4042 = vmatprep.mubr.bf16.mxu1 %v3403_v0  ;;  %v3418_v16 = vrot.slane %v690_v40, 9  ;;  %v5262_v0 = vld [vmem:[%s5949_s0 + $0x24] sm:$0x1]  ;;  %v5271_v59 = vsel %vm4721_vm4, %v3417_v13, %v748_v28  ;;  %v2347_v48 = vshrl.u32 %v3691_v45, 16  ;;  %v2326_v28 = vrot.slane %v2325_v39, 4 }
  0x5f   :  { %4056 = vmatprep.subr.bf16.mxu1 %v4502_v51  ;;  %v2350_v5 = vshll.u32 %v3691_v45, 16  ;;  %v2356_v4 = vshll.u32 %v5262_v0, 16  ;;  %v692_v13 = vld [vmem:[%s5949_s0 + $0x28] sm:$0xe]  ;;  %v5326_v45 = vld [vmem:[%s5949_s0 + $0x34] sm:$0x1] }
  0x60   :  { %4217 = vmatpush3.bf16.msra.mxu0 %v4503_v32  ;;  %v3405_v32 = vcombine.low %v5041_v20, %v5048_v26  ;;  %v5277_v20 = vsel %vm4721_vm4, %v3418_v16, %v752_v12  ;;  %v3693_v26 = vld [vmem:[%s5949_s0 + $0x28] sm:$0xf]  ;;  %v2349_v63 = vrot.slane %v2347_v48, 4  ;;  %v2331_v53 = vsel %vm4739_vm5, %v2326_v28, %v2330_v18  ;;  %v691_v18 = vld [vmem:[%s5949_s0 + $0x20] sm:$0xe] }
  0x61   :  { %4218 = vmatprep.subr.bf16.mxu0 %v4509_v44  ;;  %v3448_v12 = vcombine.low %v5271_v59, %v5277_v20  ;;  %v2364_v47 = vshll.u32 %v3693_v26, 16  ;;  %v2352_v27 = vrot.slane %v2350_v5, 5  ;;  %v2358_v57 = vrot.slane %v2356_v4, 5  ;;  %v4527_v59 = vld [vmem:[%s5953_s4 + $0x218] sm:$0xff]  }
  0x62   :  { %4057 = vmatpush3.bf16.msra.mxu1 %v4502_v51  ;;  %v5285_v51 = vld [vmem:[%s5949_s0 + $0x2c] sm:$0x1]  ;;  %v760_v16 = vrot.slane %v4825_v37, 5  ;;  %v3420_v39 = vrot.slane %v692_v13, 9  ;;  %v3697_v37 = vld [vmem:[%s5949_s0 + $0x38] sm:$0xf] }
  0x63   :  { %4203 = vmatmul.mubr.bf16.gmra.mrb[8].mxu0 %v4508_v8  ;;  %4058 = vmatprep.subr.bf16.mxu1 %v4507_v30  ;;  %v2340_v8 = vrot.slane %v2339_v62, 4  ;;  %v2366_v56 = vrot.slane %v2364_v47, 5  ;;  %v2353_v60 = vor.u32 %v2352_v27, %v2349_v63  ;;  %v2384_v5 = vshll.u32 %v5326_v45, 16 }
  0x64   :  { %4219 = vmatpush3.bf16.msra.mxu0 %v4509_v44  ;;  %4206 = vmatprep.mubr.bf16.mxu0 %v4513_v14  ;;  %v2361_v44 = vshrl.u32 %v3693_v26, 16  ;;  %v2370_v14 = vshll.u32 %v5285_v51, 16  ;;  %v2389_v4 = vshrl.u32 %v3697_v37, 16  ;;  %v761_v63 = vsel %vm4721_vm4, %v3420_v39, %v760_v16  ;;  %v4522_v16 = vld [vmem:[%s5953_s4 + $0xc8] sm:$0xff]  }
  0x65   :  { %4220 = vmatprep.subr.bf16.mxu0 %v4511_v54  ;;  %4043 = vmatmul.mubr.bf16.gmra.mrb[8].mxu1 %v3404_v31  ;;  %v2345_v25 = vsel %vm4739_vm5, %v2340_v8, %v2344_v43  ;;  %v3419_v43 = vrot.slane %v691_v18, 9  ;;  %v3406_v31 = vcombine.low %v5085_v21, %v5090_v22  ;;  %v4521_v21 = vld [vmem:[%s5953_s4 + $0x200] sm:$0xff]   ;;  %v5337_v22 = vld [vmem:[%s5949_s0 + $0x3c] sm:$0x1]  ;;  %v694_v8 = vld [vmem:[%s5949_s0 + $0x38] sm:$0xe] }
  0x66   :  { %4059 = vmatpush3.bf16.msra.mxu1 %v4507_v30  ;;  %4046 = vmatprep.mubr.bf16.mxu1 %v3405_v32  ;;  %v2363_v24 = vrot.slane %v2361_v44, 4  ;;  %v2372_v23 = vrot.slane %v2370_v14, 5  ;;  %v756_v30 = vrot.slane %v4818_v34, 5  ;;  %v3735_v40 = vcombine.low %v2331_v53, %v2345_v25  ;;  %v4518_v34 = vld [vmem:[%s5953_s4 + $0xb8] sm:$0xff]   ;;  %v3699_v25 = vld [vmem:[%s5949_s0 + $0x40] sm:$0xf] }
  0x67   :  { %4060 = vmatprep.subr.bf16.mxu1 %v4510_v1  ;;  %v2354_v32 = vrot.slane %v2353_v60, 4  ;;  %v2386_v27 = vrot.slane %v2384_v5, 5  ;;  %v2392_v14 = vshll.u32 %v3697_v37, 16  ;;  %v2398_v60 = vshll.u32 %v5337_v22, 16 }
  0x68   :  { %4221 = vmatpush3.bf16.msra.mxu0 %v4511_v54  ;;  %v2367_v42 = vor.u32 %v2366_v56, %v2363_v24  ;;  %v3695_v54 = vld [vmem:[%s5949_s0 + $0x30] sm:$0xf]  ;;  %v4520_v24 = vld [vmem:[%s5953_s4 + $0xc0] sm:$0xff]   ;;  %v764_v18 = vrot.slane %v4869_v9, 5  ;;  %v768_v13 = vrot.slane %v4874_v10, 5 }
  0x69   :  { %4222 = vmatprep.subr.bf16.mxu0 %v4517_v49  ;;  %v2375_v26 = vshrl.u32 %v3695_v54, 16  ;;  %v2378_v48 = vshll.u32 %v3695_v54, 16  ;;  %v2359_v28 = vsel %vm4739_vm5, %v2354_v32, %v2358_v57  ;;  %v2391_v57 = vrot.slane %v2389_v4, 4 }
  0x6a   :  { %4061 = vmatpush3.bf16.msra.mxu1 %v4510_v1  ;;  %v2368_v62 = vrot.slane %v2367_v42, 4  ;;  %v5343_v1 = vsel %vm4721_vm4, %v3419_v43, %v756_v30  ;;  %v5370_v30 = vld [vmem:[%s5949_s0 + $0x44] sm:$0x1]  ;;  %v2394_v2 = vrot.slane %v2392_v14, 5  ;;  %v2400_v42 = vrot.slane %v2398_v60, 5 }
  0x6b   :  { %4207 = vmatmul.mubr.bf16.gmra.mrb[12].mxu0 %v4516_v61  ;;  %4062 = vmatprep.subr.bf16.mxu1 %v4515_v50  ;;  %v693_v61 = vld [vmem:[%s5949_s0 + $0x30] sm:$0xe]  ;;  %v2377_v44 = vrot.slane %v2375_v26, 4  ;;  %v2380_v47 = vrot.slane %v2378_v48, 5  ;;  %v2406_v43 = vshll.u32 %v3699_v25, 16  ;;  %v3449_v54 = vcombine.low %v5343_v1, %v761_v63 }
  0x6c   :  { %4223 = vmatpush3.bf16.msra.mxu0 %v4517_v49  ;;  %4226 = vmatprep.mubr.bf16.mxu0 %v3735_v40  ;;  %v2373_v49 = vsel %vm4739_vm5, %v2368_v62, %v2372_v23  ;;  %v3421_v23 = vrot.slane %v693_v61, 9  ;;  %v2403_v40 = vshrl.u32 %v3699_v25, 16  ;;  %v2412_v39 = vshll.u32 %v5370_v30, 16  ;;  %v4525_v48 = vld [vmem:[%s5953_s4 + $0x210] sm:$0xff]   ;;  %v3703_v25 = vld [vmem:[%s5949_s0 + $0x60] sm:$0xf] }
  0x6d   :  { %4224 = vmatprep.subr.bf16.mxu0 %v4519_v58  ;;  %4047 = vmatmul.mubr.bf16.gmra.mrb[12].mxu1 %v3406_v31  ;;  %v3736_v53 = vcombine.low %v2359_v28, %v2373_v49  ;;  %v2381_v56 = vor.u32 %v2380_v47, %v2377_v44  ;;  %v2395_v31 = vor.u32 %v2394_v2, %v2391_v57  ;;  %v2408_v62 = vrot.slane %v2406_v43, 5  ;;  %v695_v49 = vld [vmem:[%s5949_s0 + $0x50] sm:$0xe] }
  0x6e   :  { %4063 = vmatpush3.bf16.msra.mxu1 %v4515_v50  ;;  %4066 = vmatprep.mubr.bf16.mxu1 %v3447_v15  ;;  %v3422_v15 = vrot.slane %v694_v8, 9  ;;  %v3701_v50 = vld [vmem:[%s5949_s0 + $0x48] sm:$0xf]  ;;  %v2405_v32 = vrot.slane %v2403_v40, 4  ;;  %v5393_v37 = vsel %vm4721_vm4, %v3421_v23, %v764_v18  ;;  %v2414_v1 = vrot.slane %v2412_v39, 5  ;;  %v4524_v44 = vld [vmem:[%s5953_s4 + $0xd0] sm:$0xff]  }
  0x6f   :  { %4064 = vmatprep.subr.bf16.mxu1 %v4518_v34  ;;  %v2382_v9 = vrot.slane %v2381_v56, 4  ;;  %v2417_v26 = vshrl.u32 %v3701_v50, 16  ;;  %v2396_v28 = vrot.slane %v2395_v31, 4  ;;  %v2420_v5 = vshll.u32 %v3701_v50, 16  ;;  %v5429_v23 = vld [vmem:[%s5949_s0 + $0x64] sm:$0x1] }
  0x70   :  { %4225 = vmatpush3.bf16.msra.mxu0 %v4519_v58  ;;  %v5382_v58 = vld [vmem:[%s5949_s0 + $0x4c] sm:$0x1]  ;;  %v769_v4 = vsel %vm4721_vm4, %v3422_v15, %v768_v13  ;;  %v2409_v61 = vor.u32 %v2408_v62, %v2405_v32  ;;  %v772_v63 = vrot.slane %v4932_v11, 5  ;;  %v3423_v57 = vrot.slane %v695_v49, 9  ;;  %v697_v40 = vld [vmem:[%s5949_s0 + $0x60] sm:$0xe] }
  0x71   :  { %4242 = vmatprep.subr.bf16.mxu0 %v4521_v21  ;;  %v2387_v10 = vsel %vm4739_vm5, %v2382_v9, %v2386_v27  ;;  %v2419_v8 = vrot.slane %v2417_v26, 4  ;;  %v2422_v47 = vrot.slane %v2420_v5, 5  ;;  %v696_v27 = vld [vmem:[%s5949_s0 + $0x58] sm:$0xe]  ;;  %v3450_v56 = vcombine.low %v5393_v37, %v769_v4  ;;  %v5437_v18 = vld [vmem:[%s5949_s0 + $0x6c] sm:$0x1] }
  0x72   :  { %4065 = vmatpush3.bf16.msra.mxu1 %v4518_v34  ;;  %v2426_v34 = vshll.u32 %v5382_v58, 16  ;;  %v2410_v14 = vrot.slane %v2409_v61, 4  ;;  %v3424_v20 = vrot.slane %v696_v27, 9  ;;  %v2431_v15 = vshrl.u32 %v3703_v25, 16  ;;  %v698_v9 = vld [vmem:[%s5949_s0 + $0x68] sm:$0xe] }
  0x73   :  { %4227 = vmatmul.mubr.bf16.vlgmr.msra.gmra.mrb[0].mxu0 %v3736_v53  ;;  %4082 = vmatprep.subr.bf16.mxu1 %v4520_v24  ;;  %v2423_v60 = vor.u32 %v2422_v47, %v2419_v8  ;;  %v2434_v50 = vshll.u32 %v3703_v25, 16  ;;  %v4526_v13 = vld [vmem:[%s5953_s4 + $0xd8] sm:$0xff]   ;;  %v2454_v37 = vshll.u32 %v5437_v18, 16  ;;  %v3707_v5 = vld [vmem:[%s5949_s0 + $0x70] sm:$0xf]  ;;  %v784_v47 = vrot.slane %v4992_v6, 5 }
  0x74   :  { %4243 = vmatpush3.bf16.msra.mxu0 %v4521_v21  ;;  %v2401_v21 = vsel %vm4739_vm5, %v2396_v28, %v2400_v42  ;;  %v2428_v53 = vrot.slane %v2426_v34, 5  ;;  %v2433_v32 = vrot.slane %v2431_v15, 4  ;;  %v3709_v49 = vld [vmem:[%s5949_s0 + $0x78] sm:$0xf]  ;;  %v5478_v27 = vld [vmem:[%s5949_s0 + $0x7c] sm:$0x1] }
  0x75   :  { %4244 = vmatprep.subr.bf16.mxu0 %v4523_v52  ;;  %4067 = vmatmul.mubr.bf16.vlgmr.msra.gmra.mrb[0].mxu1 %v3448_v12  ;;  %v3737_v11 = vcombine.low %v2387_v10, %v2401_v21  ;;  %v776_v12 = vrot.slane %v4937_v17, 5  ;;  %v3705_v17 = vld [vmem:[%s5949_s0 + $0x68] sm:$0xf]  ;;  %v2424_v42 = vrot.slane %v2423_v60, 4  ;;  %v2436_v39 = vrot.slane %v2434_v50, 5 }
  0x76   :  { %4083 = vmatpush3.bf16.msra.mxu1 %v4520_v24  ;;  %4070 = vmatprep.mubr.bf16.mxu1 %v3449_v54  ;;  %v773_v24 = vsel %vm4721_vm4, %v3423_v57, %v772_v63  ;;  %v2440_v54 = vshll.u32 %v5429_v23, 16  ;;  %v2445_v31 = vshrl.u32 %v3705_v17, 16  ;;  %v2448_v10 = vshll.u32 %v3705_v17, 16  ;;  %v4531_v6 = vld [vmem:[%s5953_s4 + $0x228] sm:$0xff]  }
  0x77   :  { %4084 = vmatprep.subr.bf16.mxu1 %v4522_v16  ;;  %4230 = vmatprep.mubr.bf16.mxu0 %v3737_v11  ;;  %v777_v2 = vsel %vm4721_vm4, %v3424_v20, %v776_v12  ;;  %v2429_v62 = vsel %vm4739_vm5, %v2424_v42, %v2428_v53  ;;  %v2437_v4 = vor.u32 %v2436_v39, %v2433_v32  ;;  %v2456_v8 = vrot.slane %v2454_v37, 5  ;;  %v4528_v53 = vld [vmem:[%s5953_s4 + $0xe0] sm:$0xff]  }
  0x78   :  { %4245 = vmatpush3.bf16.msra.mxu0 %v4523_v52  ;;  %v2415_v52 = vsel %vm4739_vm5, %v2410_v14, %v2414_v1  ;;  %v3451_v43 = vcombine.low %v773_v24, %v777_v2  ;;  %v2442_v26 = vrot.slane %v2440_v54, 5  ;;  %v2447_v28 = vrot.slane %v2445_v31, 4  ;;  %v700_v54 = vld [vmem:[%s5949_s0 + $0x78] sm:$0xe] }
  0x79   :  { %4246 = vmatprep.subr.bf16.mxu0 %v4525_v48  ;;  %v3425_v1 = vrot.slane %v697_v40, 9  ;;  %v3738_v34 = vcombine.low %v2415_v52, %v2429_v62  ;;  %v2450_v61 = vrot.slane %v2448_v10, 5  ;;  %v780_v63 = vrot.slane %v4987_v3, 5  ;;  %v4530_v40 = vld [vmem:[%s5953_s4 + $0xe8] sm:$0xff]   ;;  %v3711_v62 = vld [vmem:[%s5949_s0 + $0x80] sm:$0xf] }
  0x7a   :  { %4085 = vmatpush3.bf16.msra.mxu1 %v4522_v16  ;;  %v4529_v16 = vld [vmem:[%s5953_s4 + $0x220] sm:$0xff]   ;;  %v3426_v21 = vrot.slane %v698_v9, 9  ;;  %v2459_v57 = vshrl.u32 %v3707_v5, 16  ;;  %v2438_v11 = vrot.slane %v2437_v4, 4  ;;  %v2462_v20 = vshll.u32 %v3707_v5, 16 }
  0x7b   :  { %4086 = vmatprep.subr.bf16.mxu1 %v4524_v44  ;;  %4231 = vmatmul.mubr.bf16.gmra.mrb[4].mxu0 %v3738_v34  ;;  %v2451_v14 = vor.u32 %v2450_v61, %v2447_v28  ;;  %v781_v12 = vsel %vm4721_vm4, %v3425_v1, %v780_v63  ;;  %v2473_v60 = vshrl.u32 %v3709_v49, 16  ;;  %v2476_v50 = vshll.u32 %v3709_v49, 16  ;;  %v5523_v34 = vld [vmem:[%s5949_s0 + $0x8c] sm:$0x1]  ;;  %v4532_v49 = vld [vmem:[%s5953_s4 + $0xf0] sm:$0xff]  }
  0x7c   :  { %4247 = vmatpush3.bf16.msra.mxu0 %v4525_v48  ;;  %v5465_v48 = vld [vmem:[%s5949_s0 + $0x74] sm:$0x1]  ;;  %v785_v25 = vsel %vm4721_vm4, %v3426_v21, %v784_v47  ;;  %v2464_v52 = vrot.slane %v2462_v20, 5  ;;  %v788_v31 = vrot.slane %v5053_v55, 5  ;;  %v792_v32 = vrot.slane %v5059_v35, 5 }
  0x7d   :  { %4248 = vmatprep.subr.bf16.mxu0 %v4527_v59  ;;  %4071 = vmatmul.mubr.bf16.gmra.mrb[4].mxu1 %v3450_v56  ;;  %v2468_v3 = vshll.u32 %v5465_v48, 16  ;;  %v2461_v56 = vrot.slane %v2459_v57, 4  ;;  %v2452_v24 = vrot.slane %v2451_v14, 4  ;;  %v3452_v17 = vcombine.low %v781_v12, %v785_v25  ;;  %v5513_v55 = vld [vmem:[%s5949_s0 + $0x84] sm:$0x1] }
  0x7e   :  { %4087 = vmatpush3.bf16.msra.mxu1 %v4524_v44  ;;  %4074 = vmatprep.mubr.bf16.mxu1 %v3451_v43  ;;  %v2443_v44 = vsel %vm4739_vm5, %v2438_v11, %v2442_v26  ;;  %v2475_v15 = vrot.slane %v2473_v60, 4  ;;  %v699_v43 = vld [vmem:[%s5949_s0 + $0x70] sm:$0xe]  ;;  %v2478_v10 = vrot.slane %v2476_v50, 5  ;;  %v3428_v1 = vrot.slane %v700_v54, 9 }
  0x7f   :  { %4088 = vmatprep.subr.bf16.mxu1 %v4526_v13  ;;  %v2470_v2 = vrot.slane %v2468_v3, 5  ;;  %v2457_v9 = vsel %vm4739_vm5, %v2452_v24, %v2456_v8  ;;  %v2465_v42 = vor.u32 %v2464_v52, %v2461_v56  ;;  %v3427_v37 = vrot.slane %v699_v43, 9  ;;  %v4533_v26 = vld [vmem:[%s5953_s4 + $0x230] sm:$0xff]   ;;  %v3713_v35 = vld [vmem:[%s5949_s0 + $0x88] sm:$0xf] }
  0x80   :  { %4249 = vmatpush3.bf16.msra.mxu0 %v4527_v59  ;;  %v2482_v59 = vshll.u32 %v5478_v27, 16  ;;  %v3739_v39 = vcombine.low %v2443_v44, %v2457_v9  ;;  %v2479_v5 = vor.u32 %v2478_v10, %v2475_v15  ;;  %v2487_v4 = vshrl.u32 %v3711_v62, 16  ;;  %v701_v8 = vld [vmem:[%s5949_s0 + $0x80] sm:$0xe]  ;;  %v702_v11 = vld [vmem:[%s5949_s0 + $0x88] sm:$0xe] }
  0x81   :  { %4250 = vmatprep.subr.bf16.mxu0 %v4529_v16  ;;  %v2466_v28 = vrot.slane %v2465_v42, 4  ;;  %v2490_v61 = vshll.u32 %v3711_v62, 16  ;;  %v793_v21 = vsel %vm4721_vm4, %v3428_v1, %v792_v32  ;;  %v2496_v47 = vshll.u32 %v5513_v55, 16  ;;  %v3715_v24 = vld [vmem:[%s5949_s0 + $0x90] sm:$0xf] }
  0x82   :  { %4089 = vmatpush3.bf16.msra.mxu1 %v4526_v13  ;;  %v2484_v13 = vrot.slane %v2482_v59, 5  ;;  %4234 = vmatprep.mubr.bf16.mxu0 %v3739_v39  ;;  %v2501_v57 = vshrl.u32 %v3713_v35, 16  ;;  %v2480_v14 = vrot.slane %v2479_v5, 4  ;;  %v2489_v3 = vrot.slane %v2487_v4, 4  ;;  %v5552_v15 = vld [vmem:[%s5949_s0 + $0x94] sm:$0x1] }
  0x83   :  { %4090 = vmatprep.subr.bf16.mxu1 %v4528_v53  ;;  %v2471_v63 = vsel %vm4739_vm5, %v2466_v28, %v2470_v2  ;;  %v2492_v12 = vrot.slane %v2490_v61, 5  ;;  %v2498_v25 = vrot.slane %v2496_v47, 5  ;;  %v2504_v60 = vshll.u32 %v3713_v35, 16  ;;  %v3717_v50 = vld [vmem:[%s5949_s0 + $0x98] sm:$0xf]  ;;  %v4538_v61 = vld [vmem:[%s5953_s4 + $0x100] sm:$0xff]  }
  0x84   :  { %4251 = vmatpush3.bf16.msra.mxu0 %v4529_v16  ;;  %v789_v16 = vsel %vm4721_vm4, %v3427_v37, %v788_v31  ;;  %v2503_v56 = vrot.slane %v2501_v57, 4  ;;  %v2510_v44 = vshll.u32 %v5523_v34, 16  ;;  %v3429_v52 = vrot.slane %v701_v8, 9  ;;  %v5560_v54 = vld [vmem:[%s5949_s0 + $0x9c] sm:$0x1] }
  0x85   :  { %4252 = vmatprep.subr.bf16.mxu0 %v4531_v6  ;;  %4075 = vmatmul.mubr.bf16.gmra.mrb[8].mxu1 %v3452_v17  ;;  %v3453_v20 = vcombine.low %v789_v16, %v793_v21  ;;  %v2493_v17 = vor.u32 %v2492_v12, %v2489_v3  ;;  %v796_v2 = vrot.slane %v5097_v36, 5  ;;  %v2506_v9 = vrot.slane %v2504_v60, 5  ;;  %v3751_v12 = vld [vmem:[%s5949_s0 + $0x10] sm:$0xe] }
  0x86   :  { %4091 = vmatpush3.bf16.msra.mxu1 %v4528_v53  ;;  %v4535_v53 = vld [vmem:[%s5953_s4 + $0x238] sm:$0xff]   ;;  %v2512_v42 = vrot.slane %v2510_v44, 5  ;;  %v3430_v43 = vrot.slane %v702_v11, 9  ;;  %v800_v32 = vrot.slane %v5102_v29, 5  ;;  %v2515_v39 = vshrl.u32 %v3715_v24, 16 }
  0x87   :  { %4092 = vmatprep.subr.bf16.mxu1 %v4530_v40  ;;  %4078 = vmatprep.mubr.bf16.mxu1 %v3453_v20  ;;  %v2494_v36 = vrot.slane %v2493_v17, 4  ;;  %v797_v31 = vsel %vm4721_vm4, %v3429_v52, %v796_v2  ;;  %v2507_v10 = vor.u32 %v2506_v9, %v2503_v56  ;;  %v2524_v37 = vshll.u32 %v5552_v15, 16  ;;  %v3754_v9 = vld [vmem:[%s5949_s0 + $0x28] sm:$0xe] }
  0x88   :  { %4253 = vmatpush3.bf16.msra.mxu0 %v4531_v6  ;;  %v2485_v6 = vsel %vm4739_vm5, %v2480_v14, %v2484_v13  ;;  %v2518_v13 = vshll.u32 %v3715_v24, 16  ;;  %v2529_v62 = vshrl.u32 %v3717_v50, 16  ;;  %v801_v29 = vsel %vm4721_vm4, %v3430_v43, %v800_v32  ;;  %v3113_v43 = vld [vmem:[%s5951_s2] sm:$0x3] }
  0x89   :  { %4254 = vmatprep.subr.bf16.mxu0 %v4533_v26  ;;  %v3740_v59 = vcombine.low %v2471_v63, %v2485_v6  ;;  %v2499_v28 = vsel %vm4739_vm5, %v2494_v36, %v2498_v25  ;;  %v2517_v1 = vrot.slane %v2515_v39, 4  ;;  %v2532_v35 = vshll.u32 %v3717_v50, 16  ;;  %v4537_v6 = vld [vmem:[%s5949_s0 + $0x18] ss:$8 sps:$4 sm:$0xff]   ;;  %v4539_v50 = vld [vmem:[%s5953_s4 + $0x108] sm:$0xff]  }
  0x8a   :  { %4093 = vmatpush3.bf16.msra.mxu1 %v4530_v40  ;;  %v4534_v40 = vld [vmem:[%s5953_s4 + $0xf8] sm:$0xff]   ;;  %v3454_v5 = vcombine.low %v797_v31, %v801_v29  ;;  %v2520_v16 = vrot.slane %v2518_v13, 5  ;;  %v2526_v4 = vrot.slane %v2524_v37, 5  ;;  %v2531_v8 = vrot.slane %v2529_v62, 4  ;;  %v4540_v39 = vld [vmem:[%s5949_s0 + $0x28] ss:$8 sps:$4 sm:$0xff]  }
  0x8b   :  { %4094 = vmatprep.subr.bf16.mxu1 %v4532_v49  ;;  %4235 = vmatmul.mubr.bf16.gmra.mrb[8].mxu0 %v3740_v59  ;;  %v2534_v63 = vrot.slane %v2532_v35, 5  ;;  %v2538_v21 = vshll.u32 %v5560_v54, 16  ;;  %v2802_v47 = vrot.slane %v5211_v46, 5  ;;  %v3752_v46 = vld [vmem:[%s5949_s0 + $0x18] sm:$0xe]  ;;  %v3767_v56 = vrot.slane %v3751_v12, 9 }
  0x8c   :  { %4255 = vmatpush3.bf16.msra.mxu0 %v4533_v26  ;;  %v2508_v26 = vrot.slane %v2507_v10, 4  ;;  %v2521_v11 = vor.u32 %v2520_v16, %v2517_v1  ;;  %v3768_v60 = vrot.slane %v3752_v46, 9  ;;  %v2810_v44 = vrot.slane %v5262_v0, 5  ;;  %v3753_v0 = vld [vmem:[%s5949_s0 + $0x20] sm:$0xe]  ;;  %v4542_v62 = vld [vmem:[%s5953_s4 + $0x110] sm:$0xff]  }
  0x8d   :  { %4256 = vmatprep.subr.bf16.mxu0 %v4535_v53  ;;  %4079 = vmatmul.mubr.bf16.gmra.mrb[12].mxu1 %v3454_v5  ;;  %v2535_v20 = vor.u32 %v2534_v63, %v2531_v8  ;;  %v2540_v3 = vrot.slane %v2538_v21, 5  ;;  %v2814_v17 = vrot.slane %v5285_v51, 5  ;;  %v3770_v31 = vrot.slane %v3754_v9, 9  ;;  %v3756_v10 = vld [vmem:[%s5949_s0 + $0x38] sm:$0xe] }
  0x8e   :  { %4095 = vmatpush3.bf16.msra.mxu1 %v4532_v49  ;;  %v2513_v57 = vsel %vm4739_vm5, %v2508_v26, %v2512_v42  ;;  %v4536_v49 = vld [vmem:[%s5949_s0 + $0x8] ss:$8 sps:$4 sm:$0xff]   ;;  %v2522_v25 = vrot.slane %v2521_v11, 4  ;;  %v3769_v42 = vrot.slane %v3753_v0, 9  ;;  %v3181_v32 = vsel %vm3179_vm6, %v3113_v43, 0 }
  0x8f   :  { %4096 = vmatprep.subr.bf16.mxu1 %v4534_v40  ;;  %v3741_v14 = vcombine.low %v2499_v28, %v2513_v57  ;;  %4098 = vmatprep.mubr.bf16.mxu1 %v4536_v49  ;;  %v2536_v24 = vrot.slane %v2535_v20, 4  ;;  %v2818_v13 = vrot.slane %v5326_v45, 5  ;;  %v2822_v37 = vrot.slane %v5337_v22, 5  ;;  %v4541_v45 = vld [vmem:[%s5949_s0 + $0x38] ss:$8 sps:$4 sm:$0xff]  }
  0x90   :  { %4257 = vmatpush3.bf16.msra.mxu0 %v4535_v53  ;;  %v2806_v53 = vrot.slane %v5225_v38, 5  ;;  %v2527_v52 = vsel %vm4739_vm5, %v2522_v25, %v2526_v4  ;;  %v2803_v38 = vsel %vm4721_vm4, %v3767_v56, %v2802_v47  ;;  %v2811_v28 = vsel %vm4721_vm4, %v3769_v42, %v2810_v44  ;;  %v3757_v5 = vld [vmem:[%s5949_s0 + $0x40] sm:$0xe]  ;;  %v3758_v16 = vld [vmem:[%s5949_s0 + $0x48] sm:$0xe]  ;;  %v4543_v57 = vld [vmem:[%s5953_s4 + $0x118] sm:$0xff]  }
  0x91   :  { %4238 = vmatprep.mubr.bf16.mxu0 %v3741_v14  ;;  %v2541_v51 = vsel %vm4739_vm5, %v2536_v24, %v2540_v3  ;;  %4452 = vmatprep.subr.msk.bf16.mxu0 %vm3179_vm6, %v3113_v43  ;;  %v2815_v29 = vsel %vm4721_vm4, %v3770_v31, %v2814_v17  ;;  %v3772_v35 = vrot.slane %v3756_v10, 9  ;;  %v2826_v4 = vrot.slane %v5370_v30, 5  ;;  %v4544_v11 = vld [vmem:[%s5949_s0 + $0x58] ss:$8 sps:$4 sm:$0xff]   ;;  %v4560_v12 = vld [vmem:[%s5949_s0 + $0x1c] sm:$0x1] }
  0x92   :  { %4097 = vmatpush3.bf16.msra.mxu1 %v4534_v40  ;;  %v2807_v2 = vsel %vm4721_vm4, %v3768_v60, %v2806_v53  ;;  %v3742_v36 = vcombine.low %v2527_v52, %v2541_v51  ;;  %v3755_v40 = vld [vmem:[%s5949_s0 + $0x30] sm:$0xe]  ;;  %v3800_v8 = vcombine.low %v2811_v28, %v2815_v29  ;;  %v3773_v63 = vrot.slane %v3757_v5, 9  ;;  %v3759_v30 = vld [vmem:[%s5949_s0 + $0x60] sm:$0xe] }
  0x93   :  { %4114 = vmatprep.subr.bf16.mxu1 %v4538_v61  ;;  %v3799_v59 = vcombine.low %v2803_v38, %v2807_v2  ;;  %v3771_v1 = vrot.slane %v3755_v40, 9  ;;  %v2823_v26 = vsel %vm4721_vm4, %v3772_v35, %v2822_v37  ;;  %v3774_v21 = vrot.slane %v3758_v16, 9  ;;  %v4561_v53 = vld [vmem:[%s5949_s0 + $0x24] sm:$0x1]  ;;  %v3761_v60 = vld [vmem:[%s5949_s0 + $0x70] sm:$0xe] }
  0x94   :  { %4239 = vmatmul.mubr.bf16.gmra.mrb[12].mxu0 %v3742_v36  ;;  %v2834_v49 = vrot.slane %v5429_v23, 5  ;;  %v2838_v14 = vrot.slane %v5437_v18, 5  ;;  %v3775_v20 = vrot.slane %v3759_v30, 9  ;;  %v1325_v46 = vshll.u32 %v4560_v12, 16  ;;  %v4546_v56 = vld [vmem:[%s5953_s4 + $0x120] sm:$0xff]  }
  0x95   :  { %4099 = vmatmul.mubr.bf16.vlgmr.msra.gmra.mrb[0].mxu1 %v4537_v6  ;;  %4258 = vmatprep.mubr.bf16.mxu0 %v3799_v59  ;;  %v2819_v22 = vsel %vm4721_vm4, %v3771_v1, %v2818_v13  ;;  %v1339_v25 = vshll.u32 %v4561_v53, 16  ;;  %v2827_v23 = vsel %vm4721_vm4, %v3773_v63, %v2826_v4  ;;  %v3762_v44 = vld [vmem:[%s5949_s0 + $0x78] sm:$0xe]  ;;  %v2842_v24 = vrot.slane %v5465_v48, 5  ;;  %v4545_v38 = vld [vmem:[%s5949_s0 + $0x68] ss:$8 sps:$4 sm:$0xff]  }
  0x96   :  { %4115 = vmatpush3.bf16.msra.mxu1 %v4538_v61  ;;  %4102 = vmatprep.mubr.bf16.mxu1 %v4540_v39  ;;  %v2830_v61 = vrot.slane %v5382_v58, 5  ;;  %v3801_v47 = vcombine.low %v2819_v22, %v2823_v26  ;;  %v3760_v58 = vld [vmem:[%s5949_s0 + $0x68] sm:$0xe]  ;;  %v2846_v6 = vrot.slane %v5478_v27, 5  ;;  %v2835_v17 = vsel %vm4721_vm4, %v3775_v20, %v2834_v49  ;;  %v4548_v48 = vld [vmem:[%s5949_s0 + $0x78] ss:$8 sps:$4 sm:$0xff]  }
  0x97   :  { %4116 = vmatprep.subr.bf16.mxu1 %v4539_v50  ;;  %v3776_v3 = vrot.slane %v3760_v58, 9  ;;  %v3777_v2 = vrot.slane %v3761_v60, 9  ;;  %v3778_v0 = vrot.slane %v3762_v44, 9  ;;  %v3764_v51 = vld [vmem:[%s5949_s0 + $0x88] sm:$0xe]  ;;  %v2850_v59 = vrot.slane %v5513_v55, 5 }
  0x98   :  { %v2831_v18 = vsel %vm4721_vm4, %v3774_v21, %v2830_v61  ;;  %v2854_v9 = vrot.slane %v5523_v34, 5  ;;  %v3780_v36 = vrot.slane %v3764_v51, 9  ;;  %v5701_v31 = vrot.slane %v1325_v46, 5  ;;  %v4547_v55 = vld [vmem:[%s5953_s4 + $0x128] sm:$0xff]   ;;  %v3765_v13 = vld [vmem:[%s5949_s0 + $0x90] sm:$0xe] }
  0x99   :  { %v2839_v52 = vsel %vm4721_vm4, %v3776_v3, %v2838_v14  ;;  %v3802_v27 = vcombine.low %v2827_v23, %v2831_v18  ;;  %v2843_v39 = vsel %vm4721_vm4, %v3777_v2, %v2842_v24  ;;  %v2847_v40 = vsel %vm4721_vm4, %v3778_v0, %v2846_v6  ;;  %v3766_v37 = vld [vmem:[%s5949_s0 + $0x98] sm:$0xe]  ;;  %v3511_v35 = vld [vmem:[%s5949_s0 + $0x8] sm:$0xf]  ;;  %v4562_v2 = vld [vmem:[%s5949_s0 + $0x2c] sm:$0x1] }
  0x9a   :  { %4117 = vmatpush3.bf16.msra.mxu1 %v4539_v50  ;;  %v3763_v50 = vld [vmem:[%s5949_s0 + $0x80] sm:$0xe]  ;;  %v3803_v42 = vcombine.low %v2835_v17, %v2839_v52  ;;  %v2855_v10 = vsel %vm4721_vm4, %v3780_v36, %v2854_v9  ;;  %v2858_v28 = vrot.slane %v5552_v15, 5  ;;  %v3782_v29 = vrot.slane %v3766_v37, 9  ;;  %v4549_v15 = vld [vmem:[%s5949_s0 + $0x88] ss:$8 sps:$4 sm:$0xff]  }
  0x9b   :  { %4118 = vmatprep.subr.bf16.mxu1 %v4542_v62  ;;  %v3779_v43 = vrot.slane %v3763_v50, 9  ;;  %v2862_v1 = vrot.slane %v5560_v54, 5  ;;  %v1288_v22 = vshrl.u32 %v3511_v35, 16  ;;  %v1291_v26 = vshll.u32 %v3511_v35, 16  ;;  %v4550_v54 = vld [vmem:[%s5953_s4 + $0x130] sm:$0xff]  }
  0x9c   :  { %4259 = vmatmul.mubr.bf16.vlgmr.msra.gmra.mrb[0].mxu0 %v3800_v8  ;;  %v3804_v5 = vcombine.low %v2843_v39, %v2847_v40  ;;  %v3519_v18 = vld [vmem:[%s5949_s0 + $0x28] sm:$0xf]  ;;  %v1353_v0 = vshll.u32 %v4562_v2, 16 }
  0x9d   :  { %4103 = vmatmul.mubr.bf16.gmra.mrb[4].mxu1 %v4541_v45  ;;  %4275 = vmatpush3.bf16.msra.mxu0 %v3181_v32  ;;  %v5703_v32 = vrot.slane %v1339_v25, 5  ;;  %v2851_v34 = vsel %vm4721_vm4, %v3779_v43, %v2850_v59  ;;  %v3513_v45 = vld [vmem:[%s5949_s0 + $0x10] sm:$0xf]  ;;  %v5742_v63 = vsel %vm4721_vm4, %v3782_v29, %v2862_v1  ;;  %v1290_v21 = vrot.slane %v1288_v22, 4  ;;  %v3523_v59 = vld [vmem:[%s5949_s0 + $0x38] sm:$0xf] }
  0x9e   :  { %4262 = vmatprep.mubr.bf16.mxu0 %v3801_v47  ;;  %4119 = vmatpush3.bf16.msra.mxu1 %v4542_v62  ;;  %v3781_v62 = vrot.slane %v3765_v13, 9  ;;  %v3805_v16 = vcombine.low %v2851_v34, %v2855_v10  ;;  %v1302_v4 = vshrl.u32 %v3513_v45, 16  ;;  %v1305_v61 = vshll.u32 %v3513_v45, 16  ;;  %v3527_v22 = vld [vmem:[%s5949_s0 + $0x58] sm:$0xf] }
  0x9f   :  { %4106 = vmatprep.mubr.bf16.mxu1 %v4544_v11  ;;  %4120 = vmatprep.subr.bf16.mxu1 %v4543_v57  ;;  %v1293_v47 = vrot.slane %v1291_v26, 5  ;;  %v3517_v11 = vld [vmem:[%s5949_s0 + $0x20] sm:$0xf]  ;;  %v1344_v6 = vshrl.u32 %v3519_v18, 16  ;;  %v1355_v39 = vrot.slane %v1353_v0, 5  ;;  %v1375_v35 = vshll.u32 %v3523_v59, 16 }
  0xa0   :  { %v5738_v8 = vsel %vm4721_vm4, %v3781_v62, %v2858_v28  ;;  %v1304_v30 = vrot.slane %v1302_v4, 4  ;;  %v1307_v58 = vrot.slane %v1305_v61, 5  ;;  %v1330_v3 = vshrl.u32 %v3517_v11, 16  ;;  %v3525_v62 = vld [vmem:[%s5949_s0 + $0x40] sm:$0xf] }
  0xa1   :  { %v1294_v20 = vor.u32 %v1293_v47, %v1290_v21  ;;  %v1333_v12 = vshll.u32 %v3517_v11, 16  ;;  %v3806_v46 = vcombine.low %v5738_v8, %v5742_v63  ;;  %v1346_v50 = vrot.slane %v1344_v6, 4  ;;  %v4565_v47 = vld [vmem:[%s5949_s0 + $0x44] sm:$0x1] }
  0xa2   :  { %4121 = vmatpush3.bf16.msra.mxu1 %v4543_v57  ;;  %v3515_v57 = vld [vmem:[%s5949_s0 + $0x18] sm:$0xf]  ;;  %v1308_v53 = vor.u32 %v1307_v58, %v1304_v30  ;;  %v1332_v44 = vrot.slane %v1330_v3, 4  ;;  %v1372_v28 = vshrl.u32 %v3523_v59, 16  ;;  %v1377_v4 = vrot.slane %v1375_v35, 5 }
  0xa3   :  { %4122 = vmatprep.subr.bf16.mxu1 %v4546_v56  ;;  %v1316_v49 = vshrl.u32 %v3515_v57, 16  ;;  %v1319_v14 = vshll.u32 %v3515_v57, 16  ;;  %v1295_v60 = vrot.slane %v1294_v20, 4  ;;  %v1335_v24 = vrot.slane %v1333_v12, 5  ;;  %v4553_v30 = vld [vmem:[%s5950_s1 + $0x10] ss:$8 sps:$4 sm:$0xff]  }
  0xa4   :  { %4263 = vmatmul.mubr.bf16.gmra.mrb[4].mxu0 %v3802_v27  ;;  %v1309_v17 = vrot.slane %v1308_v53, 4  ;;  %v1386_v8 = vshrl.u32 %v3525_v62, 16  ;;  %v1389_v21 = vshll.u32 %v3525_v62, 16  ;;  %v1395_v57 = vshll.u32 %v4565_v47, 16  ;;  %v4554_v20 = vld [vmem:[%s5950_s1 + $0x20] ss:$8 sps:$4 sm:$0xff]  }
  0xa5   :  { %4107 = vmatmul.mubr.bf16.gmra.mrb[8].mxu1 %v4545_v38  ;;  %4266 = vmatprep.mubr.bf16.mxu0 %v3803_v42  ;;  %v1318_v25 = vrot.slane %v1316_v49, 4  ;;  %v1321_v23 = vrot.slane %v1319_v14, 5  ;;  %v1347_v38 = vshll.u32 %v3519_v18, 16  ;;  %v1336_v27 = vor.u32 %v1335_v24, %v1332_v44  ;;  %v4552_v42 = vld [vmem:[%s5950_s1] ss:$8 sps:$4 sm:$0xff]  }
  0xa6   :  { %4110 = vmatprep.mubr.bf16.mxu1 %v4548_v48  ;;  %4123 = vmatpush3.bf16.msra.mxu1 %v4546_v56  ;;  %v3521_v56 = vld [vmem:[%s5949_s0 + $0x30] sm:$0xf]  ;;  %v1300_v48 = vsel %vm4739_vm5, %v1295_v60, %v5141_v7  ;;  %v1314_v9 = vsel %vm4739_vm5, %v1309_v17, %v5143_v19  ;;  %v4563_v19 = vld [vmem:[%s5949_s0 + $0x34] sm:$0x1]  ;;  %v1400_v11 = vshrl.u32 %v3527_v22, 16  ;;  %v1388_v14 = vrot.slane %v1386_v8, 4 }
  0xa7   :  { %4124 = vmatprep.subr.bf16.mxu1 %v4547_v55  ;;  %v1322_v52 = vor.u32 %v1321_v23, %v1318_v25  ;;  %v1358_v51 = vshrl.u32 %v3521_v56, 16  ;;  %v1349_v36 = vrot.slane %v1347_v38, 5  ;;  %v3559_v7 = vcombine.low %v1300_v48, %v1314_v9  ;;  %v4566_v53 = vld [vmem:[%s5949_s0 + $0x5c] sm:$0x1]  ;;  %v3531_v23 = vld [vmem:[%s5949_s0 + $0x68] sm:$0xf] }
  0xa8   :  { %v1337_v40 = vrot.slane %v1336_v27, 4  ;;  %v1361_v34 = vshll.u32 %v3521_v56, 16  ;;  %v1367_v37 = vshll.u32 %v4563_v19, 16  ;;  %v1391_v3 = vrot.slane %v1389_v21, 5  ;;  %v3533_v24 = vld [vmem:[%s5949_s0 + $0x70] sm:$0xf] }
  0xa9   :  { %v1323_v43 = vrot.slane %v1322_v52, 4  ;;  %v1350_v13 = vor.u32 %v1349_v36, %v1346_v50  ;;  %v1397_v12 = vrot.slane %v1395_v57, 5  ;;  %v1409_v25 = vshll.u32 %v4566_v53, 16  ;;  %v4567_v27 = vld [vmem:[%s5949_s0 + $0x64] sm:$0x1] }
  0xaa   :  { %4125 = vmatpush3.bf16.msra.mxu1 %v4547_v55  ;;  %v1360_v55 = vrot.slane %v1358_v51, 4  ;;  %v1342_v29 = vsel %vm4739_vm5, %v1337_v40, %v5703_v32  ;;  %v1363_v1 = vrot.slane %v1361_v34, 5  ;;  %v1392_v17 = vor.u32 %v1391_v3, %v1388_v14  ;;  %v3539_v47 = vld [vmem:[%s5949_s0 + $0x88] sm:$0xf]  ;;  %v3541_v57 = vld [vmem:[%s5949_s0 + $0x90] sm:$0xf] }
  0xab   :  { %4126 = vmatprep.subr.bf16.mxu1 %v4550_v54  ;;  %v1328_v10 = vsel %vm4739_vm5, %v1323_v43, %v5701_v31  ;;  %v4564_v31 = vld [vmem:[%s5949_s0 + $0x3c] sm:$0x1]  ;;  %v1411_v52 = vrot.slane %v1409_v25, 5  ;;  %v1423_v50 = vshll.u32 %v4567_v27, 16  ;;  %v1428_v9 = vshrl.u32 %v3531_v23, 16 }
  0xac   :  { %4267 = vmatmul.mubr.bf16.gmra.mrb[8].mxu0 %v3804_v5  ;;  %v1381_v45 = vshll.u32 %v4564_v31, 16  ;;  %v3560_v26 = vcombine.low %v1328_v10, %v1342_v29  ;;  %v1351_v5 = vrot.slane %v1350_v13, 4  ;;  %v1364_v32 = vor.u32 %v1363_v1, %v1360_v55  ;;  %v3535_v43 = vld [vmem:[%s5949_s0 + $0x78] sm:$0xf] }
  0xad   :  { %4111 = vmatmul.mubr.bf16.gmra.mrb[12].mxu1 %v4549_v15  ;;  %4270 = vmatprep.mubr.bf16.mxu0 %v3805_v16  ;;  %v1369_v16 = vrot.slane %v1367_v37, 5  ;;  %v1374_v15 = vrot.slane %v1372_v28, 4  ;;  %v1393_v51 = vrot.slane %v1392_v17, 4  ;;  %v1442_v55 = vshrl.u32 %v3533_v24, 16  ;;  %v3537_v37 = vld [vmem:[%s5949_s0 + $0x80] sm:$0xf] }
  0xae   :  { %4127 = vmatpush3.bf16.msra.mxu1 %v4550_v54  ;;  %4130 = vmatprep.mubr.bf16.mxu1 %v3559_v7  ;;  %v3529_v54 = vld [vmem:[%s5949_s0 + $0x60] sm:$0xf]  ;;  %v1383_v61 = vrot.slane %v1381_v45, 5  ;;  %v1356_v63 = vsel %vm4739_vm5, %v1351_v5, %v1355_v39  ;;  %v1365_v58 = vrot.slane %v1364_v32, 4  ;;  %v1425_v39 = vrot.slane %v1423_v50, 5 }
  0xaf   :  { %4128 = vmatprep.subr.bf16.mxu1 %v4551_v33  ;;  %v1378_v49 = vor.u32 %v1377_v4, %v1374_v15  ;;  %v1414_v44 = vshrl.u32 %v3529_v54, 16  ;;  %v1417_v38 = vshll.u32 %v3529_v54, 16  ;;  %v4568_v7 = vld [vmem:[%s5949_s0 + $0x6c] sm:$0x1]  ;;  %v1398_v34 = vsel %vm4739_vm5, %v1393_v51, %v1397_v12  ;;  %v4555_v28 = vld [vmem:[%s5950_s1 + $0x30] ss:$8 sps:$4 sm:$0xff]  }
  0xb0   :  { %v1370_v18 = vsel %vm4739_vm5, %v1365_v58, %v1369_v16  ;;  %v1437_v40 = vshll.u32 %v4568_v7, 16  ;;  %v1430_v13 = vrot.slane %v1428_v9, 4  ;;  %v1444_v35 = vrot.slane %v1442_v55, 4  ;;  %v4556_v45 = vld [vmem:[%s5950_s1 + $0x48] ss:$8 sps:$4 sm:$0xff]  }
  0xb1   :  { %v1379_v56 = vrot.slane %v1378_v49, 4  ;;  %v3561_v6 = vcombine.low %v1356_v63, %v1370_v18  ;;  %v1416_v48 = vrot.slane %v1414_v44, 4  ;;  %v1419_v59 = vrot.slane %v1417_v38, 5  ;;  %v4569_v5 = vld [vmem:[%s5949_s0 + $0x74] sm:$0x1] }
  0xb2   :  { %4129 = vmatpush3.bf16.msra.mxu1 %v4551_v33  ;;  %v1403_v33 = vshll.u32 %v3527_v22, 16  ;;  %v1439_v1 = vrot.slane %v1437_v40, 5  ;;  %v1451_v16 = vshll.u32 %v4569_v5, 16  ;;  %v1456_v15 = vshrl.u32 %v3535_v43, 16  ;;  %v4570_v32 = vld [vmem:[%s5949_s0 + $0x7c] sm:$0x1] }
  0xb3   :  { %v1384_v2 = vsel %vm4739_vm5, %v1379_v56, %v1383_v61  ;;  %v1420_v10 = vor.u32 %v1419_v59, %v1416_v48  ;;  %v1459_v54 = vshll.u32 %v3535_v43, 16  ;;  %v1465_v4 = vshll.u32 %v4570_v32, 16 }
  0xb4   :  { %4271 = vmatmul.mubr.bf16.gmra.mrb[12].mxu0 %v3806_v46  ;;  %v1402_v46 = vrot.slane %v1400_v11, 4  ;;  %v1405_v60 = vrot.slane %v1403_v33, 5  ;;  %v3562_v62 = vcombine.low %v1384_v2, %v1398_v34  ;;  %v1470_v61 = vshrl.u32 %v3537_v37, 16 }
  0xb5   :  { %4276 = vmatprep.mubr.msk.bf16.mxu0 %vm3154_vm7, %v4552_v42  ;;  %4131 = vmatmul.mubr.bf16.vlgmr.msra.gmra.mrb[0].mxu1 %v3560_v26  ;;  %v1431_v42 = vshll.u32 %v3531_v23, 16  ;;  %v1421_v31 = vrot.slane %v1420_v10, 4  ;;  %v1445_v26 = vshll.u32 %v3533_v24, 16  ;;  %v1458_v58 = vrot.slane %v1456_v15, 4 }
  0xb6   :  { %v1406_v0 = vor.u32 %v1405_v60, %v1402_v46  ;;  %4134 = vmatprep.mubr.bf16.mxu1 %v3561_v6  ;;  %v1461_v49 = vrot.slane %v1459_v54, 5 }
  0xb7   :  { %v1433_v19 = vrot.slane %v1431_v42, 5  ;;  %v1426_v8 = vsel %vm4739_vm5, %v1421_v31, %v1425_v39  ;;  %v1447_v21 = vrot.slane %v1445_v26, 5 }
  0xb8   :  { %v1407_v36 = vrot.slane %v1406_v0, 4 }
  0xb9   :  { %v1434_v22 = vor.u32 %v1433_v19, %v1430_v13 }
  0xba   :  { %v1412_v29 = vsel %vm4739_vm5, %v1407_v36, %v1411_v52 }
  0xbb   :  { %v1435_v63 = vrot.slane %v1434_v22, 4  ;;  %v3563_v11 = vcombine.low %v1412_v29, %v1426_v8 }
  0xbc   :  { %4277 = vmatmul.mubr.msk.bf16.vlgmr.msra.gmra.mrb[0].mxu0 %vm3154_vm7, %v4553_v30  ;;  %v1453_v30 = vrot.slane %v1451_v16, 5 }
  0xbd   :  { %4280 = vmatprep.mubr.msk.bf16.mxu0 %vm3154_vm7, %v4554_v20  ;;  %4135 = vmatmul.mubr.bf16.gmra.mrb[4].mxu1 %v3562_v62 }
  0xbe   :  { %11 = vsyncpa [#allocation3], 0  ;;  %v1448_v14 = vor.u32 %v1447_v21, %v1444_v35  ;;  %v1467_v33 = vrot.slane %v1465_v4, 5  ;;  %v1472_v20 = vrot.slane %v1470_v61, 4  ;;  %v1473_v3 = vshll.u32 %v3537_v37, 16  ;;  %4138 = vmatprep.mubr.bf16.mxu1 %v3563_v11 }
  0xbf   :  { %v1462_v12 = vor.u32 %v1461_v49, %v1458_v58  ;;  %v4571_v46 = vld [vmem:[%s5949_s0 + $0x84] sm:$0x1]  ;;  %v1484_v25 = vshrl.u32 %v3539_v47, 16  ;;  %v1487_v23 = vshll.u32 %v3539_v47, 16  ;;  %v1440_v18 = vsel %vm4739_vm5, %v1435_v63, %v1439_v1  ;;  %v4572_v52 = vld [vmem:[%s5949_s0 + $0x8c] sm:$0x1] }
  0xc0   :  { %v1479_v53 = vshll.u32 %v4571_v46, 16  ;;  %v1449_v56 = vrot.slane %v1448_v14, 4  ;;  %v1475_v60 = vrot.slane %v1473_v3, 5  ;;  %v1498_v44 = vshrl.u32 %v3541_v57, 16  ;;  %v4557_v50 = vld [vmem:[%s5950_s1 + $0x58] ss:$8 sps:$4 sm:$0xff]  }
  0xc1   :  { %v1463_v24 = vrot.slane %v1462_v12, 4  ;;  %v1486_v6 = vrot.slane %v1484_v25, 4  ;;  %v1489_v17 = vrot.slane %v1487_v23, 5  ;;  %v1493_v38 = vshll.u32 %v4572_v52, 16  ;;  %v4558_v36 = vld [vmem:[%s5950_s1 + $0x68] ss:$8 sps:$4 sm:$0xff]  }
  0xc2   :  { %v1454_v2 = vsel %vm4739_vm5, %v1449_v56, %v1453_v30  ;;  %v1476_v0 = vor.u32 %v1475_v60, %v1472_v20  ;;  %v1481_v48 = vrot.slane %v1479_v53, 5  ;;  %v1500_v59 = vrot.slane %v1498_v44, 4  ;;  %v4573_v39 = vld [vmem:[%s5949_s0 + $0x94] sm:$0x1]  ;;  %v4559_v1 = vld [vmem:[%s5950_s1 + $0x78] ss:$8 sps:$4 sm:$0xff]  }
  0xc3   :  { %v3564_v27 = vcombine.low %v1440_v18, %v1454_v2  ;;  %v1490_v51 = vor.u32 %v1489_v17, %v1486_v6  ;;  %v1501_v9 = vshll.u32 %v3541_v57, 16  ;;  %v1468_v42 = vsel %vm4739_vm5, %v1463_v24, %v1467_v33  ;;  %v5906_v32 = vld [vmem:[%s5952_s3] ss:$0 sm:$0xff]  ;;  %s4598_s3 = smov [#allocation2]  }
  0xc4   :  { %4281 = vmatmul.mubr.msk.bf16.gmra.mrb[4].mxu0 %vm3154_vm7, %v4555_v28  ;;  %v1477_v43 = vrot.slane %v1476_v0, 4  ;;  %v1507_v7 = vshll.u32 %v4573_v39, 16  ;;  %v1495_v55 = vrot.slane %v1493_v38, 5 }
  0xc5   :  { %4284 = vmatprep.mubr.msk.bf16.mxu0 %vm3154_vm7, %v4556_v45  ;;  %4139 = vmatmul.mubr.bf16.gmra.mrb[8].mxu1 %v3564_v27  ;;  %v1491_v40 = vrot.slane %v1490_v51, 4  ;;  %v1503_v34 = vrot.slane %v1501_v9, 5  ;;  %v5898_v45 = vld [vmem:[%s5954_s5] ss:$0 sm:$0xff]  ;;  %s3356_s5 = sshll.u32 %s4598_s3, 4  ;;  %s3357_s5 = int_to_ptr.vmem [resolvable:$true] %s3356_s5 }
  0xc6   :  { %v1482_v10 = vsel %vm4739_vm5, %v1477_v43, %v1481_v48  ;;  %v1509_v37 = vrot.slane %v1507_v7, 5  ;;  %s4574_s21 = scalar_lea.vmem %s3357_s5, 2048  ;;  %p4579_p1 = scmp.lt.s32.totalorder %s3357_s5, %s3357_s5 }
  0xc7   :  { %v3565_v13 = vcombine.low %v1468_v42, %v1482_v10  ;;  %v1504_v19 = vor.u32 %v1503_v34, %v1500_v59  ;;  %v1496_v62 = vsel %vm4739_vm5, %v1491_v40, %v1495_v55  ;;  %p4575_p0 = scmp.ne.s32.totalorder %s3357_s5, %s4574_s21  ;;  %p4580_p2 = scmp.lt.s32.totalorder %s4574_s21, %s4574_s21 }
  0xc9   :  { %4142 = vmatprep.mubr.bf16.mxu1 %v3565_v13  ;;  %v1505_v28 = vrot.slane %v1504_v19, 4  ;;  %p4581_p3 = por %p4580_p2, %p4579_p1 }
  0xcb   :  { %v1510_v29 = vsel %vm4739_vm5, %v1505_v28, %v1509_v37  ;;  %p4582_p4 = pnand %p4581_p3, %p4575_p0 }
  0xcc   :  { %4285 = vmatmul.mubr.msk.bf16.gmra.mrb[8].mxu0 %vm3154_vm7, %v4557_v50  ;;  %v3566_v35 = vcombine.low %v1496_v62, %v1510_v29 }
  0xcd   :  { %4288 = vmatprep.mubr.msk.bf16.mxu0 %vm3154_vm7, %v4558_v36 }
  0xce   :  { %4143 = vmatmul.mubr.bf16.gmra.mrb[12].mxu1 %v3566_v35 }
  0xd4   :  { %4289 = vmatmul.mubr.msk.bf16.gmra.mrb[12].mxu0 %vm3154_vm7, %v4559_v1 }
 0x188   :  { %v4132_v31 = vpop.f32.mrb[0].mxu1 }
 0x189   :  { %v1642_v22 = vpop.f32.mrb[1].mxu1  ;;  %v4292_v41 = vadd.f32 %v4132_v31, %v5898_v45 }
 0x18a   :  { %v4133_v26 = vpop.f32.mrb[2].mxu1  ;;  %v4294_v16 = vadd.f32 %v5898_v45, %v1642_v22 }
 0x18b   :  { %v1645_v5 = vpop.f32.mrb[3].mxu1  ;;  %v4296_v15 = vadd.f32 %v4133_v26, %v5898_v45 }
 0x18c   :  { %v4298_v4 = vadd.f32 %v5898_v45, %v1645_v5 }
 0x18f   :  { %v4278_v54 = vpop.f32.mrb[0].mxu0 }
 0x190   :  { %v4293_v61 = vadd.f32 %v4292_v41, %v4278_v54  ;;  %v3217_v8 = vpop.f32.mrb[1].mxu0  ;;  %v4136_v49 = vpop.f32.mrb[4].mxu1 }
 0x191   :  { %v4295_v63 = vadd.f32 %v4294_v16, %v3217_v8  ;;  %v4279_v21 = vpop.f32.mrb[2].mxu0  ;;  %v4300_v20 = vadd.f32 %v4136_v49, %v5898_v45  ;;  %v1658_v3 = vpop.f32.mrb[5].mxu1 }
 0x192   :  { %v3305_v47 = vadd.f32 %v4293_v61, %v5906_v32  ;;  %v4297_v57 = vadd.f32 %v4296_v15, %v4279_v21  ;;  %v3220_v11 = vpop.f32.mrb[3].mxu0  ;;  %v4302_v53 = vadd.f32 %v5898_v45, %v1658_v3  ;;  %v4137_v25 = vpop.f32.mrb[6].mxu1 }
 0x193   :  { %v3303_v30 = vadd.f32 %v4295_v63, %v5906_v32  ;;  %v4299_v58 = vadd.f32 %v4298_v4, %v3220_v11  ;;  %v4304_v18 = vadd.f32 %v4137_v25, %v5898_v45  ;;  %v1661_v56 = vpop.f32.mrb[7].mxu1 }
 0x194   :  { %v3321_v14 = vmax.f32 %v3305_v47, 0.0  ;;  %v3306_v33 = vadd.f32 %v4297_v57, %v5906_v32  ;;  %v4306_v24 = vadd.f32 %v5898_v45, %v1661_v56 }
 0x195   :  { %v3319_v12 = vmax.f32 %v3303_v30, 0.0  ;;  %v3304_v46 = vadd.f32 %v4299_v58, %v5906_v32 }
 0x196   :  { %3337 = vst [vmem:[#allocation2 + $0x10] sm:$0xff] %v3321_v14  ;;  %v3322_v23 = vmax.f32 %v3306_v33, 0.0 }
 0x197   :  { %3335 = vst [vmem:[#allocation2] sm:$0xff] %v3319_v12  ;;  %v3320_v60 = vmax.f32 %v3304_v46, 0.0  ;;  %v4282_v44 = vpop.f32.mrb[4].mxu0 }
 0x198   :  { %3338 = vst [vmem:[#allocation2 + $0x18] sm:$0xff] %v3322_v23  ;;  %v4301_v6 = vadd.f32 %v4300_v20, %v4282_v44  ;;  %v3233_v17 = vpop.f32.mrb[5].mxu0  ;;  %v4140_v43 = vpop.f32.mrb[8].mxu1 }
 0x199   :  { %3336 = vst [vmem:[#allocation2 + $0x8] sm:$0xff] %v3320_v60  ;;  %v4303_v52 = vadd.f32 %v4302_v53, %v3233_v17  ;;  %v4283_v38 = vpop.f32.mrb[6].mxu0  ;;  %v4308_v39 = vadd.f32 %v4140_v43, %v5898_v45  ;;  %v1674_v7 = vpop.f32.mrb[9].mxu1 }
 0x19a   :  { %v3309_v2 = vadd.f32 %v4301_v6, %v5906_v32  ;;  %v4305_v0 = vadd.f32 %v4304_v18, %v4283_v38  ;;  %v3236_v48 = vpop.f32.mrb[7].mxu0  ;;  %v4310_v34 = vadd.f32 %v5898_v45, %v1674_v7  ;;  %v4141_v10 = vpop.f32.mrb[10].mxu1 }
 0x19b   :  { %v3307_v27 = vadd.f32 %v4303_v52, %v5906_v32  ;;  %v4307_v50 = vadd.f32 %v4306_v24, %v3236_v48  ;;  %v4312_v37 = vadd.f32 %v4141_v10, %v5898_v45  ;;  %v1677_v62 = vpop.f32.mrb[11].mxu1 }
 0x19c   :  { %v3325_v51 = vmax.f32 %v3309_v2, 0.0  ;;  %v3310_v59 = vadd.f32 %v4305_v0, %v5906_v32  ;;  %v4314_v1 = vadd.f32 %v5898_v45, %v1677_v62 }
 0x19d   :  { %v3323_v9 = vmax.f32 %v3307_v27, 0.0  ;;  %v3308_v42 = vadd.f32 %v4307_v50, %v5906_v32 }
 0x19e   :  { %3341 = vst [vmem:[#allocation2 + $0x30] sm:$0xff] %v3325_v51  ;;  %v3326_v36 = vmax.f32 %v3310_v59, 0.0 }
 0x19f   :  { %3339 = vst [vmem:[#allocation2 + $0x20] sm:$0xff] %v3323_v9  ;;  %v3324_v40 = vmax.f32 %v3308_v42, 0.0  ;;  %v4286_v55 = vpop.f32.mrb[8].mxu0 }
 0x1a0   :  { %3342 = vst [vmem:[#allocation2 + $0x38] sm:$0xff] %v3326_v36  ;;  %v4309_v13 = vadd.f32 %v4308_v39, %v4286_v55  ;;  %v3249_v19 = vpop.f32.mrb[9].mxu0 }
 0x1a1   :  { %3340 = vst [vmem:[#allocation2 + $0x28] sm:$0xff] %v3324_v40  ;;  %v4311_v28 = vadd.f32 %v4310_v34, %v3249_v19  ;;  %v4287_v29 = vpop.f32.mrb[10].mxu0  ;;  %v4144_v61 = vpop.f32.mrb[12].mxu1 }
 0x1a2   :  { %v3313_v35 = vadd.f32 %v4309_v13, %v5906_v32  ;;  %v4313_v31 = vadd.f32 %v4312_v37, %v4287_v29  ;;  %v3252_v22 = vpop.f32.mrb[11].mxu0  ;;  %v4316_v63 = vadd.f32 %v4144_v61, %v5898_v45  ;;  %v1690_v47 = vpop.f32.mrb[13].mxu1 }
 0x1a3   :  { %v3311_v26 = vadd.f32 %v4311_v28, %v5906_v32  ;;  %v4315_v5 = vadd.f32 %v4314_v1, %v3252_v22  ;;  %v4318_v57 = vadd.f32 %v5898_v45, %v1690_v47  ;;  %v4145_v30 = vpop.f32.mrb[14].mxu1 }
 0x1a4   :  { %v3329_v41 = vmax.f32 %v3313_v35, 0.0  ;;  %v3314_v16 = vadd.f32 %v4313_v31, %v5906_v32  ;;  %v4320_v49 = vadd.f32 %v4145_v30, %v5898_v45  ;;  %v1693_v33 = vpop.f32.mrb[15].mxu1 }
 0x1a5   :  { %v3327_v15 = vmax.f32 %v3311_v26, 0.0  ;;  %v3312_v54 = vadd.f32 %v4315_v5, %v5906_v32  ;;  %v4322_v3 = vadd.f32 %v5898_v45, %v1693_v33 }
 0x1a6   :  { %3345 = vst [vmem:[#allocation2 + $0x50] sm:$0xff] %v3329_v41  ;;  %v3330_v4 = vmax.f32 %v3314_v16, 0.0 }
 0x1a7   :  { %3343 = vst [vmem:[#allocation2 + $0x40] sm:$0xff] %v3327_v15  ;;  %v3328_v8 = vmax.f32 %v3312_v54, 0.0  ;;  %v4290_v21 = vpop.f32.mrb[12].mxu0 }
 0x1a8   :  { %3346 = vst [vmem:[#allocation2 + $0x58] sm:$0xff] %v3330_v4  ;;  %v3265_v11 = vpop.f32.mrb[13].mxu0  ;;  %v4317_v58 = vadd.f32 %v4316_v63, %v4290_v21 }
 0x1a9   :  { %3344 = vst [vmem:[#allocation2 + $0x48] sm:$0xff] %v3328_v8  ;;  %v4291_v14 = vpop.f32.mrb[14].mxu0  ;;  %v4319_v20 = vadd.f32 %v4318_v57, %v3265_v11 }
 0x1aa   :  { %v3268_v12 = vpop.f32.mrb[15].mxu0  ;;  %v3317_v46 = vadd.f32 %v4317_v58, %v5906_v32  ;;  %v4321_v53 = vadd.f32 %v4320_v49, %v4291_v14 }
 0x1ab   :  { %v3315_v25 = vadd.f32 %v4319_v20, %v5906_v32  ;;  %v4323_v23 = vadd.f32 %v4322_v3, %v3268_v12 }
 0x1ac   :  { %v3333_v18 = vmax.f32 %v3317_v46, 0.0  ;;  %v3318_v56 = vadd.f32 %v4321_v53, %v5906_v32 }
 0x1ad   :  { %v3331_v60 = vmax.f32 %v3315_v25, 0.0  ;;  %v3316_v44 = vadd.f32 %v4323_v23, %v5906_v32 }
 0x1ae   :  { %3349 = vst [vmem:[#allocation2 + $0x70] sm:$0xff] %v3333_v18  ;;  %v3334_v24 = vmax.f32 %v3318_v56, 0.0 }
 0x1af   :  { %3347 = vst [vmem:[#allocation2 + $0x60] sm:$0xff] %v3331_v60  ;;  %v3332_v6 = vmax.f32 %v3316_v44, 0.0 }
 0x1b0   :  { %3350 = vst [vmem:[#allocation2 + $0x78] sm:$0xff] %v3334_v24 }
 0x1b1   :  { %3348 = vst [vmem:[#allocation2 + $0x68] sm:$0xff] %v3332_v6 }
 0x1b2   :  { %4585 = shalt.err (!%p4582_p4)
}
 0x1b3   :  { %s4586_s24 = scalar_lea.hbm %s5955_s6, 2048 }
 0x1b4   :  { %p4587_p5 = scmp.ne.s32.totalorder %s5955_s6, %s4586_s24  ;;  %p4590_p6 = scmp.lt.u32.totalorder %s4586_s24, %s5955_s6 }
 0x1b6   :  { %p4592_p7 = pnand %p4590_p6, %p4587_p5 }
 0x1b8   :  { %4595 = shalt.err (!%p4592_p7)
}
 0x1b9   :  { %s4599_s2 = smov 128   ;;  %s4600_s29 = smov 8  }
 0x1ba   :  { %3362 = dma.vmem_to_hbm [thread:$0]  %s3357_s5, 2048, %s5955_s6, [#allocation3], %s4599_s2, %s4599_s2, %s4600_s29  }
 0x1bb   :  { %4596 = dma.done.wait [#allocation3], 2048  }
 0x1bc   :  { %4597 = vsyncadd [#allocation3], 4294965248 }
 0x1bd   :  { %3366 = vsyncpa [#allocation3], 1 }

</bundles_post_ra>
